<compile_context>
chip_gen: v6e
topology: v6e:2x2x1
jax: 0.10.0
libtpu: 0.0.40
codegen_flags: <defaults>
</compile_context>

<pallas_src>
import functools

import jax
import jax.numpy as jnp
from jax.experimental import pallas as pl
from jax.experimental.pallas import tpu as pltpu

# Logical (PyTorch) dims.
D_IN = 784
D_H = 400
D_Z = 20

# Lane-padded internal dims (multiples of 128).
D_HP = 512          # 4 * 128   hidden
D_ZP = 128          # 1 * 128   latent
D_MLV = 2 * D_ZP    # fused [mu || logvar] width


def _round_up(n, m):
    return ((n + m - 1) // m) * m


def _cdiv(a, b):
    return (a + b - 1) // b


def _vae_kernel(x_ref, eps_ref,
                w1_ref, b1_ref,
                w2_ref, b2_ref,          # fused [W21 || W22], [b21 || b22] (f32)
                w3_ref, b3_ref,
                w4_ref, b4_ref,
                recon_ref, mlv_ref):
    # ---- encode ----
    x = x_ref[...].astype(jnp.bfloat16)                              # (TB, 784)
    h1 = jnp.dot(x, w1_ref[...], preferred_element_type=jnp.float32) + b1_ref[...]
    h1 = jnp.maximum(h1, 0.0)                                        # ReLU (VPU)

    # Fused mu/logvar projection (kept f32: tiny matmul, protects exp(logvar)).
    mlv = jnp.dot(h1, w2_ref[...], preferred_element_type=jnp.float32) + b2_ref[...]
    mu = mlv[:, :D_ZP]                                               # lane-aligned split
    logvar = mlv[:, D_ZP:]

    # ---- reparameterize (training path) ----
    std = jnp.exp(0.5 * logvar)                                      # EUP
    z = eps_ref[...] * std + mu                                      # (TB, 128) f32

    # ---- decode ----
    h3 = jnp.dot(z.astype(jnp.bfloat16), w3_ref[...],
                 preferred_element_type=jnp.float32) + b3_ref[...]
    h3 = jnp.maximum(h3, 0.0)                                        # ReLU
    recon = jnp.tanh(
        jnp.dot(h3.astype(jnp.bfloat16), w4_ref[...],
                preferred_element_type=jnp.float32) + b4_ref[...])   # f32 tanh (v5e-safe)

    recon_ref[...] = recon.astype(recon_ref.dtype)                   # bf16 store, 784 lanes
    mlv_ref[...] = mlv                                               # fused mu||logvar, f32


def pack_params(params):
    """Pad weights to the internal padded dims, fuse fc21/fc22.

    Zero padding is exact: padded hidden/latent lanes stay exactly zero
    through the ReLUs and contribute nothing to real outputs; the wrapper
    slices the 20 real latent columns out of the fused 256-wide block.
    x rows (784) and recon columns (784) are intentionally NOT padded.
    """
    (w1, b1, w21, b21, w22, b22, w3, b3, w4, b4) = params

    def pad2(a, rows, cols):
        return jnp.pad(a, ((0, rows - a.shape[0]), (0, cols - a.shape[1])))

    w1p = pad2(w1, D_IN, D_HP).astype(jnp.bfloat16)                  # (784, 512)
    b1p = pad2(b1, 1, D_HP).astype(jnp.float32)                      # (1, 512)

    w2p = jnp.concatenate(
        [pad2(w21, D_HP, D_ZP), pad2(w22, D_HP, D_ZP)], axis=1
    ).astype(jnp.float32)                                            # (512, 256) f32
    b2p = jnp.concatenate(
        [pad2(b21, 1, D_ZP), pad2(b22, 1, D_ZP)], axis=1
    ).astype(jnp.float32)                                            # (1, 256)

    w3p = pad2(w3, D_ZP, D_HP).astype(jnp.bfloat16)                  # (128, 512)
    b3p = pad2(b3, 1, D_HP).astype(jnp.float32)                      # (1, 512)
    w4p = pad2(w4, D_HP, D_IN).astype(jnp.bfloat16)                  # (512, 784)
    b4p = pad2(b4, 1, D_IN).astype(jnp.float32)                      # (1, 784)

    return (w1p, b1p, w2p, b2p, w3p, b3p, w4p, b4p)


def _idx_batch(i):
    return (i, 0)


def _idx_const(i):
    return (0, 0)


def _const_spec(shape, single_buffer):
    """Constant-index (resident) block; single-buffered when supported."""
    if single_buffer and hasattr(pl, "Buffered"):
        try:
            return pl.BlockSpec(shape, _idx_const, pipeline_mode=pl.Buffered(1))
        except TypeError:
            pass
    return pl.BlockSpec(shape, _idx_const)


def vae_forward(x, eps, packed_params, *, tile_b=512, single_buffer_weights=True):
    """x: (B, 1, 28, 28) or anything flattening to (B, 784); eps: (B, 20).

    Returns (recon_bf16 (B,784), mu (B,20), logvar (B,20)).
    """
    b = x.shape[0]
    x2d = x.reshape(b, D_IN)

    # Batch tile: multiple of 8 sublanes, capped at tile_b, sized so the grid
    # has >= 2 steps whenever b allows it -> the ("parallel",) batch axis can
    # shard across both TensorCores on v7x.  v5e/v6e may pass tile_b=1024.
    tb = min(tile_b, _round_up(max(_cdiv(b, 2), 4), 8))
    bpad = _round_up(b, tb)
    grid = (bpad // tb,)

    # No lane padding of x / recon (784 == full last dim satisfies the (8,128)
    # rule).  x keeps its input dtype and is cast to bf16 inside the kernel,
    # so no wrapper-side HBM pass over x; only batch rows are padded if needed.
    if bpad != b:
        x2d = jnp.pad(x2d, ((0, bpad - b), (0, 0)))
    epsp = jnp.zeros((bpad, D_ZP), jnp.float32).at[:b, :D_Z].set(
        eps.astype(jnp.float32))

    sb = single_buffer_weights
    in_specs = [
        pl.BlockSpec((tb, D_IN), _idx_batch),         # x (batch-tiled)
        pl.BlockSpec((tb, D_ZP), _idx_batch),         # eps (batch-tiled)
        _const_spec((D_IN, D_HP), sb),                # w1 (VMEM-resident)
        _const_spec((1, D_HP), sb),                   # b1
        _const_spec((D_HP, D_MLV), sb),               # fused w21||w22 (f32)
        _const_spec((1, D_MLV), sb),                  # fused b21||b22
        _const_spec((D_ZP, D_HP), sb),                # w3
        _const_spec((1, D_HP), sb),                   # b3
        _const_spec((D_HP, D_IN), sb),                # w4
        _const_spec((1, D_IN), sb),                   # b4
    ]
    out_specs = (
        pl.BlockSpec((tb, D_IN), _idx_batch),         # recon, bf16, 784 lanes
        pl.BlockSpec((tb, D_MLV), _idx_batch),        # fused mu||logvar, f32
    )
    out_shape = (
        jax.ShapeDtypeStruct((bpad, D_IN), jnp.bfloat16),
        jax.ShapeDtypeStruct((bpad, D_MLV), jnp.float32),
    )

    recon_p, mlv_p = pl.pallas_call(
        _vae_kernel,
        grid=grid,
        in_specs=in_specs,
        out_specs=out_specs,
        out_shape=out_shape,
        compiler_params=pltpu.CompilerParams(
            dimension_semantics=("parallel",),
            vmem_limit_bytes=40 << 20,                # < v7x 64 MiB with headroom
        ),
    )(x2d, epsp, *packed_params)

    recon = recon_p[:b]                               # (b, 784) bf16
    mu = mlv_p[:b, :D_Z]
    logvar = mlv_p[:b, D_ZP:D_ZP + D_Z]
    return recon, mu, logvar


def init_params(key):
    """PyTorch-style Linear init (uniform +-1/sqrt(fan_in)), deterministic.

    Weights stored pre-transposed as (in, out); biases as (1, out).
    """
    def linear(key, fan_in, fan_out):
        kw, kb = jax.random.split(key)
        bound = 1.0 / jnp.sqrt(float(fan_in))
        w = jax.random.uniform(kw, (fan_in, fan_out), jnp.float32, -bound, bound)
        bb = jax.random.uniform(kb, (1, fan_out), jnp.float32, -bound, bound)
        return w, bb

    k1, k21, k22, k3, k4 = jax.random.split(key, 5)
    w1, b1 = linear(k1, D_IN, D_H)       # fc1  : 784 -> 400
    w21, b21 = linear(k21, D_H, D_Z)     # fc21 : 400 -> 20
    w22, b22 = linear(k22, D_H, D_Z)     # fc22 : 400 -> 20
    w3, b3 = linear(k3, D_Z, D_H)        # fc3  : 20  -> 400
    w4, b4 = linear(k4, D_H, D_IN)       # fc4  : 400 -> 784
    return (w1, b1, w21, b21, w22, b22, w3, b3, w4, b4)


def _reference_forward(x, eps, params):
    """Plain-JAX f32 reference for sanity checking the kernel."""
    (w1, b1, w21, b21, w22, b22, w3, b3, w4, b4) = params
    xf = x.reshape(x.shape[0], D_IN).astype(jnp.float32)
    h1 = jnp.maximum(xf @ w1 + b1, 0.0)
    mu = h1 @ w21 + b21
    logvar = h1 @ w22 + b22
    z = eps * jnp.exp(0.5 * logvar) + mu
    h3 = jnp.maximum(z @ w3 + b3, 0.0)
    recon = jnp.tanh(h3 @ w4 + b4)
    return recon, mu, logvar


if __name__ == "__main__":
    key = jax.random.PRNGKey(0)
    kx, keps, kparam = jax.random.split(key, 3)

    B = 2
    x = jax.random.uniform(kx, (B, 1, 28, 28), jnp.float32)   # NCHW MNIST-like
    eps = jax.random.normal(keps, (B, D_Z), jnp.float32)
    params = init_params(kparam)
    packed = pack_params(params)

    try:
        fwd = jax.jit(vae_forward)
        recon, mu, logvar = fwd(x, eps, packed)
        jax.block_until_ready((recon, mu, logvar))
    except Exception:
        # Fallback if this jax build rejects pipeline_mode=pl.Buffered(1):
        # retry with default (double-buffered) resident weight blocks.
        fwd = jax.jit(functools.partial(vae_forward, single_buffer_weights=False))
        recon, mu, logvar = fwd(x, eps, packed)
        jax.block_until_ready((recon, mu, logvar))

    r_recon, r_mu, r_logvar = _reference_forward(x, eps, params)
    assert recon.shape == (B, D_IN) and mu.shape == (B, D_Z) and logvar.shape == (B, D_Z)
    # bf16 matmul operands / bf16 recon output (f32 accumulation) => loose tol.
    assert jnp.allclose(recon.astype(jnp.float32), r_recon, atol=2e-2, rtol=2e-2)
    assert jnp.allclose(mu, r_mu, atol=2e-2, rtol=2e-2)
    assert jnp.allclose(logvar, r_logvar, atol=2e-2, rtol=2e-2)

    print("KERNEL_OK")
</pallas_src>

<mosaic_0001>
module attributes {stable_mosaic.version = 11 : i64} {
  func.func @_vae_kernel(%arg0: i32, %arg1: memref<8x784xf32, #tpu.memory_space<vmem>>, %arg2: memref<8x128xf32, #tpu.memory_space<vmem>>, %arg3: memref<784x512xbf16, #tpu.memory_space<vmem>>, %arg4: memref<1x512xf32, #tpu.memory_space<vmem>>, %arg5: memref<512x256xf32, #tpu.memory_space<vmem>>, %arg6: memref<1x256xf32, #tpu.memory_space<vmem>>, %arg7: memref<128x512xbf16, #tpu.memory_space<vmem>>, %arg8: memref<1x512xf32, #tpu.memory_space<vmem>>, %arg9: memref<512x784xbf16, #tpu.memory_space<vmem>>, %arg10: memref<1x784xf32, #tpu.memory_space<vmem>>, %arg11: memref<8x784xbf16, #tpu.memory_space<vmem>>, %arg12: memref<8x256xf32, #tpu.memory_space<vmem>>) attributes {dimension_semantics = [#tpu.dimension_semantics<parallel>], iteration_bounds = array<i64: 1>, scalar_prefetch = 0 : i64, scratch_operands = 0 : i64, tpu.core_type = #tpu.core_type<tc>, window_params = [{transform_indices = @transform_0, window_bounds = array<i64: 8, 784>}, {transform_indices = @transform_1, window_bounds = array<i64: 8, 128>}, {pipeline_mode = #tpu.pipeline_mode<synchronous>, transform_indices = @transform_2, window_bounds = array<i64: 784, 512>}, {pipeline_mode = #tpu.pipeline_mode<synchronous>, transform_indices = @transform_3, window_bounds = array<i64: 1, 512>}, {pipeline_mode = #tpu.pipeline_mode<synchronous>, transform_indices = @transform_4, window_bounds = array<i64: 512, 256>}, {pipeline_mode = #tpu.pipeline_mode<synchronous>, transform_indices = @transform_5, window_bounds = array<i64: 1, 256>}, {pipeline_mode = #tpu.pipeline_mode<synchronous>, transform_indices = @transform_6, window_bounds = array<i64: 128, 512>}, {pipeline_mode = #tpu.pipeline_mode<synchronous>, transform_indices = @transform_7, window_bounds = array<i64: 1, 512>}, {pipeline_mode = #tpu.pipeline_mode<synchronous>, transform_indices = @transform_8, window_bounds = array<i64: 512, 784>}, {pipeline_mode = #tpu.pipeline_mode<synchronous>, transform_indices = @transform_9, window_bounds = array<i64: 1, 784>}, {transform_indices = @transform_10, window_bounds = array<i64: 8, 784>}, {transform_indices = @transform_11, window_bounds = array<i64: 8, 256>}]} {
    %c0 = arith.constant 0 : index
    %c0_0 = arith.constant 0 : index
    %0 = vector.load %arg1[%c0, %c0_0] : memref<8x784xf32, #tpu.memory_space<vmem>>, vector<8x784xf32>
    %1 = arith.truncf %0 : vector<8x784xf32> to vector<8x784xbf16>
    %c0_1 = arith.constant 0 : index
    %c0_2 = arith.constant 0 : index
    %2 = vector.load %arg3[%c0_1, %c0_2] : memref<784x512xbf16, #tpu.memory_space<vmem>>, vector<784x512xbf16>
    %cst = arith.constant dense<0.000000e+00> : vector<8x512xf32>
    %3 = tpu.matmul %1, %2, %cst {dimension_numbers = #tpu.dot_dimension_numbers<[1], [0], [0], [1], [0, 0, 1, 1], [], []>} : vector<8x784xbf16>, vector<784x512xbf16>, vector<8x512xf32> -> vector<8x512xf32>
    %c0_3 = arith.constant 0 : index
    %c0_4 = arith.constant 0 : index
    %4 = vector.load %arg4[%c0_3, %c0_4] : memref<1x512xf32, #tpu.memory_space<vmem>>, vector<1x512xf32>
    %5 = vector.broadcast %4 : vector<1x512xf32> to vector<8x512xf32>
    %6 = arith.addf %3, %5 : vector<8x512xf32>
    %cst_5 = arith.constant 0.000000e+00 : f32
    %7 = vector.broadcast %cst_5 : f32 to vector<8x512xf32>
    %8 = arith.maximumf %6, %7 : vector<8x512xf32>
    %c0_6 = arith.constant 0 : index
    %c0_7 = arith.constant 0 : index
    %9 = vector.load %arg5[%c0_6, %c0_7] : memref<512x256xf32, #tpu.memory_space<vmem>>, vector<512x256xf32>
    %cst_8 = arith.constant dense<0.000000e+00> : vector<8x256xf32>
    %10 = tpu.matmul %8, %9, %cst_8 {dimension_numbers = #tpu.dot_dimension_numbers<[1], [0], [0], [1], [0, 0, 1, 1], [], []>} : vector<8x512xf32>, vector<512x256xf32>, vector<8x256xf32> -> vector<8x256xf32>
    %c0_9 = arith.constant 0 : index
    %c0_10 = arith.constant 0 : index
    %11 = vector.load %arg6[%c0_9, %c0_10] : memref<1x256xf32, #tpu.memory_space<vmem>>, vector<1x256xf32>
    %12 = vector.broadcast %11 : vector<1x256xf32> to vector<8x256xf32>
    %13 = arith.addf %10, %12 : vector<8x256xf32>
    %14 = vector.extract_strided_slice %13 {offsets = [0, 0], sizes = [8, 128], strides = [1, 1]} : vector<8x256xf32> to vector<8x128xf32>
    %15 = vector.extract_strided_slice %13 {offsets = [0, 128], sizes = [8, 128], strides = [1, 1]} : vector<8x256xf32> to vector<8x128xf32>
    %cst_11 = arith.constant 5.000000e-01 : f32
    %16 = vector.broadcast %cst_11 : f32 to vector<8x128xf32>
    %17 = arith.mulf %16, %15 : vector<8x128xf32>
    %18 = math.exp %17 : vector<8x128xf32>
    %c0_12 = arith.constant 0 : index
    %c0_13 = arith.constant 0 : index
    %19 = vector.load %arg2[%c0_12, %c0_13] : memref<8x128xf32, #tpu.memory_space<vmem>>, vector<8x128xf32>
    %20 = arith.mulf %19, %18 : vector<8x128xf32>
    %21 = arith.addf %20, %14 : vector<8x128xf32>
    %22 = arith.truncf %21 : vector<8x128xf32> to vector<8x128xbf16>
    %c0_14 = arith.constant 0 : index
    %c0_15 = arith.constant 0 : index
    %23 = vector.load %arg7[%c0_14, %c0_15] : memref<128x512xbf16, #tpu.memory_space<vmem>>, vector<128x512xbf16>
    %cst_16 = arith.constant dense<0.000000e+00> : vector<8x512xf32>
    %24 = tpu.matmul %22, %23, %cst_16 {dimension_numbers = #tpu.dot_dimension_numbers<[1], [0], [0], [1], [0, 0, 1, 1], [], []>} : vector<8x128xbf16>, vector<128x512xbf16>, vector<8x512xf32> -> vector<8x512xf32>
    %c0_17 = arith.constant 0 : index
    %c0_18 = arith.constant 0 : index
    %25 = vector.load %arg8[%c0_17, %c0_18] : memref<1x512xf32, #tpu.memory_space<vmem>>, vector<1x512xf32>
    %26 = vector.broadcast %25 : vector<1x512xf32> to vector<8x512xf32>
    %27 = arith.addf %24, %26 : vector<8x512xf32>
    %cst_19 = arith.constant 0.000000e+00 : f32
    %28 = vector.broadcast %cst_19 : f32 to vector<8x512xf32>
    %29 = arith.maximumf %27, %28 : vector<8x512xf32>
    %30 = arith.truncf %29 : vector<8x512xf32> to vector<8x512xbf16>
    %c0_20 = arith.constant 0 : index
    %c0_21 = arith.constant 0 : index
    %31 = vector.load %arg9[%c0_20, %c0_21] : memref<512x784xbf16, #tpu.memory_space<vmem>>, vector<512x784xbf16>
    %cst_22 = arith.constant dense<0.000000e+00> : vector<8x784xf32>
    %32 = tpu.matmul %30, %31, %cst_22 {dimension_numbers = #tpu.dot_dimension_numbers<[1], [0], [0], [1], [0, 0, 1, 1], [], []>} : vector<8x512xbf16>, vector<512x784xbf16>, vector<8x784xf32> -> vector<8x784xf32>
    %c0_23 = arith.constant 0 : index
    %c0_24 = arith.constant 0 : index
    %33 = vector.load %arg10[%c0_23, %c0_24] : memref<1x784xf32, #tpu.memory_space<vmem>>, vector<1x784xf32>
    %34 = vector.broadcast %33 : vector<1x784xf32> to vector<8x784xf32>
    %35 = arith.addf %32, %34 : vector<8x784xf32>
    %36 = math.tanh %35 : vector<8x784xf32>
    %37 = arith.truncf %36 : vector<8x784xf32> to vector<8x784xbf16>
    %c0_25 = arith.constant 0 : index
    %c0_26 = arith.constant 0 : index
    %38 = vector.load %arg11[%c0_25, %c0_26] : memref<8x784xbf16, #tpu.memory_space<vmem>>, vector<8x784xbf16>
    tpu.vector_store %arg11[%c0_25, %c0_26], %37 {strides = array<i32>} : memref<8x784xbf16, #tpu.memory_space<vmem>>, vector<8x784xbf16>,
    %c0_27 = arith.constant 0 : index
    %c0_28 = arith.constant 0 : index
    %39 = vector.load %arg12[%c0_27, %c0_28] : memref<8x256xf32, #tpu.memory_space<vmem>>, vector<8x256xf32>
    tpu.vector_store %arg12[%c0_27, %c0_28], %13 {strides = array<i32>} : memref<8x256xf32, #tpu.memory_space<vmem>>, vector<8x256xf32>,
    return
  }
  func.func @transform_0(%arg0: i32) -> (i32, i32) {
    %c0_i32 = arith.constant 0 : i32
    %c0_i32_0 = arith.constant 0 : i32
    return %arg0, %c0_i32 : i32, i32
  }
  func.func @transform_1(%arg0: i32) -> (i32, i32) {
    %c0_i32 = arith.constant 0 : i32
    %c0_i32_0 = arith.constant 0 : i32
    return %arg0, %c0_i32 : i32, i32
  }
  func.func @transform_2(%arg0: i32) -> (i32, i32) {
    %c0_i32 = arith.constant 0 : i32
    %c0_i32_0 = arith.constant 0 : i32
    %c0_i32_1 = arith.constant 0 : i32
    return %c0_i32, %c0_i32_0 : i32, i32
  }
  func.func @transform_3(%arg0: i32) -> (i32, i32) {
    %c0_i32 = arith.constant 0 : i32
    %c0_i32_0 = arith.constant 0 : i32
    %c0_i32_1 = arith.constant 0 : i32
    return %c0_i32, %c0_i32_0 : i32, i32
  }
  func.func @transform_4(%arg0: i32) -> (i32, i32) {
    %c0_i32 = arith.constant 0 : i32
    %c0_i32_0 = arith.constant 0 : i32
    %c0_i32_1 = arith.constant 0 : i32
    return %c0_i32, %c0_i32_0 : i32, i32
  }
  func.func @transform_5(%arg0: i32) -> (i32, i32) {
    %c0_i32 = arith.constant 0 : i32
    %c0_i32_0 = arith.constant 0 : i32
    %c0_i32_1 = arith.constant 0 : i32
    return %c0_i32, %c0_i32_0 : i32, i32
  }
  func.func @transform_6(%arg0: i32) -> (i32, i32) {
    %c0_i32 = arith.constant 0 : i32
    %c0_i32_0 = arith.constant 0 : i32
    %c0_i32_1 = arith.constant 0 : i32
    return %c0_i32, %c0_i32_0 : i32, i32
  }
  func.func @transform_7(%arg0: i32) -> (i32, i32) {
    %c0_i32 = arith.constant 0 : i32
    %c0_i32_0 = arith.constant 0 : i32
    %c0_i32_1 = arith.constant 0 : i32
    return %c0_i32, %c0_i32_0 : i32, i32
  }
  func.func @transform_8(%arg0: i32) -> (i32, i32) {
    %c0_i32 = arith.constant 0 : i32
    %c0_i32_0 = arith.constant 0 : i32
    %c0_i32_1 = arith.constant 0 : i32
    return %c0_i32, %c0_i32_0 : i32, i32
  }
  func.func @transform_9(%arg0: i32) -> (i32, i32) {
    %c0_i32 = arith.constant 0 : i32
    %c0_i32_0 = arith.constant 0 : i32
    %c0_i32_1 = arith.constant 0 : i32
    return %c0_i32, %c0_i32_0 : i32, i32
  }
  func.func @transform_10(%arg0: i32) -> (i32, i32) {
    %c0_i32 = arith.constant 0 : i32
    %c0_i32_0 = arith.constant 0 : i32
    return %arg0, %c0_i32 : i32, i32
  }
  func.func @transform_11(%arg0: i32) -> (i32, i32) {
    %c0_i32 = arith.constant 0 : i32
    %c0_i32_0 = arith.constant 0 : i32
    return %arg0, %c0_i32 : i32, i32
  }
}

module attributes {stable_mosaic.version = 11 : i64} {
  func.func @_vae_kernel(%arg0: i32, %arg1: memref<8x784xf32, #tpu.memory_space<vmem>>, %arg2: memref<8x128xf32, #tpu.memory_space<vmem>>, %arg3: memref<784x512xbf16, #tpu.memory_space<vmem>>, %arg4: memref<1x512xf32, #tpu.memory_space<vmem>>, %arg5: memref<512x256xf32, #tpu.memory_space<vmem>>, %arg6: memref<1x256xf32, #tpu.memory_space<vmem>>, %arg7: memref<128x512xbf16, #tpu.memory_space<vmem>>, %arg8: memref<1x512xf32, #tpu.memory_space<vmem>>, %arg9: memref<512x784xbf16, #tpu.memory_space<vmem>>, %arg10: memref<1x784xf32, #tpu.memory_space<vmem>>, %arg11: memref<8x784xbf16, #tpu.memory_space<vmem>>, %arg12: memref<8x256xf32, #tpu.memory_space<vmem>>) attributes {dimension_semantics = [#tpu.dimension_semantics<parallel>], iteration_bounds = array<i64: 1>, scalar_prefetch = 0 : i64, scratch_operands = 0 : i64, tpu.core_type = #tpu.core_type<tc>, window_params = [{transform_indices = @transform_0, window_bounds = array<i64: 8, 784>}, {transform_indices = @transform_1, window_bounds = array<i64: 8, 128>}, {pipeline_mode = #tpu.pipeline_mode<synchronous>, transform_indices = @transform_2, window_bounds = array<i64: 784, 512>}, {pipeline_mode = #tpu.pipeline_mode<synchronous>, transform_indices = @transform_3, window_bounds = array<i64: 1, 512>}, {pipeline_mode = #tpu.pipeline_mode<synchronous>, transform_indices = @transform_4, window_bounds = array<i64: 512, 256>}, {pipeline_mode = #tpu.pipeline_mode<synchronous>, transform_indices = @transform_5, window_bounds = array<i64: 1, 256>}, {pipeline_mode = #tpu.pipeline_mode<synchronous>, transform_indices = @transform_6, window_bounds = array<i64: 128, 512>}, {pipeline_mode = #tpu.pipeline_mode<synchronous>, transform_indices = @transform_7, window_bounds = array<i64: 1, 512>}, {pipeline_mode = #tpu.pipeline_mode<synchronous>, transform_indices = @transform_8, window_bounds = array<i64: 512, 784>}, {pipeline_mode = #tpu.pipeline_mode<synchronous>, transform_indices = @transform_9, window_bounds = array<i64: 1, 784>}, {transform_indices = @transform_10, window_bounds = array<i64: 8, 784>}, {transform_indices = @transform_11, window_bounds = array<i64: 8, 256>}]} {
    %c0 = arith.constant 0 : index
    %c0_0 = arith.constant 0 : index
    %0 = vector.load %arg1[%c0, %c0_0] : memref<8x784xf32, #tpu.memory_space<vmem>>, vector<8x784xf32>
    %1 = arith.truncf %0 : vector<8x784xf32> to vector<8x784xbf16>
    %c0_1 = arith.constant 0 : index
    %c0_2 = arith.constant 0 : index
    %2 = vector.load %arg3[%c0_1, %c0_2] : memref<784x512xbf16, #tpu.memory_space<vmem>>, vector<784x512xbf16>
    %cst = arith.constant dense<0.000000e+00> : vector<8x512xf32>
    %3 = tpu.matmul %1, %2, %cst {dimension_numbers = #tpu.dot_dimension_numbers<[1], [0], [0], [1], [0, 0, 1, 1], [], []>} : vector<8x784xbf16>, vector<784x512xbf16>, vector<8x512xf32> -> vector<8x512xf32>
    %c0_3 = arith.constant 0 : index
    %c0_4 = arith.constant 0 : index
    %4 = vector.load %arg4[%c0_3, %c0_4] : memref<1x512xf32, #tpu.memory_space<vmem>>, vector<1x512xf32>
    %5 = vector.broadcast %4 : vector<1x512xf32> to vector<8x512xf32>
    %6 = arith.addf %3, %5 : vector<8x512xf32>
    %cst_5 = arith.constant 0.000000e+00 : f32
    %7 = vector.broadcast %cst_5 : f32 to vector<8x512xf32>
    %8 = arith.maximumf %6, %7 : vector<8x512xf32>
    %c0_6 = arith.constant 0 : index
    %c0_7 = arith.constant 0 : index
    %9 = vector.load %arg5[%c0_6, %c0_7] : memref<512x256xf32, #tpu.memory_space<vmem>>, vector<512x256xf32>
    %cst_8 = arith.constant dense<0.000000e+00> : vector<8x256xf32>
    %10 = tpu.matmul %8, %9, %cst_8 {dimension_numbers = #tpu.dot_dimension_numbers<[1], [0], [0], [1], [0, 0, 1, 1], [], []>} : vector<8x512xf32>, vector<512x256xf32>, vector<8x256xf32> -> vector<8x256xf32>
    %c0_9 = arith.constant 0 : index
    %c0_10 = arith.constant 0 : index
    %11 = vector.load %arg6[%c0_9, %c0_10] : memref<1x256xf32, #tpu.memory_space<vmem>>, vector<1x256xf32>
    %12 = vector.broadcast %11 : vector<1x256xf32> to vector<8x256xf32>
    %13 = arith.addf %10, %12 : vector<8x256xf32>
    %14 = vector.extract_strided_slice %13 {offsets = [0, 0], sizes = [8, 128], strides = [1, 1]} : vector<8x256xf32> to vector<8x128xf32>
    %15 = vector.extract_strided_slice %13 {offsets = [0, 128], sizes = [8, 128], strides = [1, 1]} : vector<8x256xf32> to vector<8x128xf32>
    %cst_11 = arith.constant 5.000000e-01 : f32
    %16 = vector.broadcast %cst_11 : f32 to vector<8x128xf32>
    %17 = arith.mulf %16, %15 : vector<8x128xf32>
    %18 = math.exp %17 : vector<8x128xf32>
    %c0_12 = arith.constant 0 : index
    %c0_13 = arith.constant 0 : index
    %19 = vector.load %arg2[%c0_12, %c0_13] : memref<8x128xf32, #tpu.memory_space<vmem>>, vector<8x128xf32>
    %20 = arith.mulf %19, %18 : vector<8x128xf32>
    %21 = arith.addf %20, %14 : vector<8x128xf32>
    %22 = arith.truncf %21 : vector<8x128xf32> to vector<8x128xbf16>
    %c0_14 = arith.constant 0 : index
    %c0_15 = arith.constant 0 : index
    %23 = vector.load %arg7[%c0_14, %c0_15] : memref<128x512xbf16, #tpu.memory_space<vmem>>, vector<128x512xbf16>
    %cst_16 = arith.constant dense<0.000000e+00> : vector<8x512xf32>
    %24 = tpu.matmul %22, %23, %cst_16 {dimension_numbers = #tpu.dot_dimension_numbers<[1], [0], [0], [1], [0, 0, 1, 1], [], []>} : vector<8x128xbf16>, vector<128x512xbf16>, vector<8x512xf32> -> vector<8x512xf32>
    %c0_17 = arith.constant 0 : index
    %c0_18 = arith.constant 0 : index
    %25 = vector.load %arg8[%c0_17, %c0_18] : memref<1x512xf32, #tpu.memory_space<vmem>>, vector<1x512xf32>
    %26 = vector.broadcast %25 : vector<1x512xf32> to vector<8x512xf32>
    %27 = arith.addf %24, %26 : vector<8x512xf32>
    %cst_19 = arith.constant 0.000000e+00 : f32
    %28 = vector.broadcast %cst_19 : f32 to vector<8x512xf32>
    %29 = arith.maximumf %27, %28 : vector<8x512xf32>
    %30 = arith.truncf %29 : vector<8x512xf32> to vector<8x512xbf16>
    %c0_20 = arith.constant 0 : index
    %c0_21 = arith.constant 0 : index
    %31 = vector.load %arg9[%c0_20, %c0_21] : memref<512x784xbf16, #tpu.memory_space<vmem>>, vector<512x784xbf16>
    %cst_22 = arith.constant dense<0.000000e+00> : vector<8x784xf32>
    %32 = tpu.matmul %30, %31, %cst_22 {dimension_numbers = #tpu.dot_dimension_numbers<[1], [0], [0], [1], [0, 0, 1, 1], [], []>} : vector<8x512xbf16>, vector<512x784xbf16>, vector<8x784xf32> -> vector<8x784xf32>
    %c0_23 = arith.constant 0 : index
    %c0_24 = arith.constant 0 : index
    %33 = vector.load %arg10[%c0_23, %c0_24] : memref<1x784xf32, #tpu.memory_space<vmem>>, vector<1x784xf32>
    %34 = vector.broadcast %33 : vector<1x784xf32> to vector<8x784xf32>
    %35 = arith.addf %32, %34 : vector<8x784xf32>
    %36 = math.tanh %35 : vector<8x784xf32>
    %37 = arith.truncf %36 : vector<8x784xf32> to vector<8x784xbf16>
    %c0_25 = arith.constant 0 : index
    %c0_26 = arith.constant 0 : index
    %38 = vector.load %arg11[%c0_25, %c0_26] : memref<8x784xbf16, #tpu.memory_space<vmem>>, vector<8x784xbf16>
    tpu.vector_store %arg11[%c0_25, %c0_26], %37 {strides = array<i32>} : memref<8x784xbf16, #tpu.memory_space<vmem>>, vector<8x784xbf16>,
    %c0_27 = arith.constant 0 : index
    %c0_28 = arith.constant 0 : index
    %39 = vector.load %arg12[%c0_27, %c0_28] : memref<8x256xf32, #tpu.memory_space<vmem>>, vector<8x256xf32>
    tpu.vector_store %arg12[%c0_27, %c0_28], %13 {strides = array<i32>} : memref<8x256xf32, #tpu.memory_space<vmem>>, vector<8x256xf32>,
    return
  }
  func.func @transform_0(%arg0: i32) -> (i32, i32) {
    %c0_i32 = arith.constant 0 : i32
    %c0_i32_0 = arith.constant 0 : i32
    return %arg0, %c0_i32 : i32, i32
  }
  func.func @transform_1(%arg0: i32) -> (i32, i32) {
    %c0_i32 = arith.constant 0 : i32
    %c0_i32_0 = arith.constant 0 : i32
    return %arg0, %c0_i32 : i32, i32
  }
  func.func @transform_2(%arg0: i32) -> (i32, i32) {
    %c0_i32 = arith.constant 0 : i32
    %c0_i32_0 = arith.constant 0 : i32
    %c0_i32_1 = arith.constant 0 : i32
    return %c0_i32, %c0_i32_0 : i32, i32
  }
  func.func @transform_3(%arg0: i32) -> (i32, i32) {
    %c0_i32 = arith.constant 0 : i32
    %c0_i32_0 = arith.constant 0 : i32
    %c0_i32_1 = arith.constant 0 : i32
    return %c0_i32, %c0_i32_0 : i32, i32
  }
  func.func @transform_4(%arg0: i32) -> (i32, i32) {
    %c0_i32 = arith.constant 0 : i32
    %c0_i32_0 = arith.constant 0 : i32
    %c0_i32_1 = arith.constant 0 : i32
    return %c0_i32, %c0_i32_0 : i32, i32
  }
  func.func @transform_5(%arg0: i32) -> (i32, i32) {
    %c0_i32 = arith.constant 0 : i32
    %c0_i32_0 = arith.constant 0 : i32
    %c0_i32_1 = arith.constant 0 : i32
    return %c0_i32, %c0_i32_0 : i32, i32
  }
  func.func @transform_6(%arg0: i32) -> (i32, i32) {
    %c0_i32 = arith.constant 0 : i32
    %c0_i32_0 = arith.constant 0 : i32
    %c0_i32_1 = arith.constant 0 : i32
    return %c0_i32, %c0_i32_0 : i32, i32
  }
  func.func @transform_7(%arg0: i32) -> (i32, i32) {
    %c0_i32 = arith.constant 0 : i32
    %c0_i32_0 = arith.constant 0 : i32
    %c0_i32_1 = arith.constant 0 : i32
    return %c0_i32, %c0_i32_0 : i32, i32
  }
  func.func @transform_8(%arg0: i32) -> (i32, i32) {
    %c0_i32 = arith.constant 0 : i32
    %c0_i32_0 = arith.constant 0 : i32
    %c0_i32_1 = arith.constant 0 : i32
    return %c0_i32, %c0_i32_0 : i32, i32
  }
  func.func @transform_9(%arg0: i32) -> (i32, i32) {
    %c0_i32 = arith.constant 0 : i32
    %c0_i32_0 = arith.constant 0 : i32
    %c0_i32_1 = arith.constant 0 : i32
    return %c0_i32, %c0_i32_0 : i32, i32
  }
  func.func @transform_10(%arg0: i32) -> (i32, i32) {
    %c0_i32 = arith.constant 0 : i32
    %c0_i32_0 = arith.constant 0 : i32
    return %arg0, %c0_i32 : i32, i32
  }
  func.func @transform_11(%arg0: i32) -> (i32, i32) {
    %c0_i32 = arith.constant 0 : i32
    %c0_i32_0 = arith.constant 0 : i32
    return %arg0, %c0_i32 : i32, i32
  }
}

</mosaic_0001>

<bundles_post_ra>
// kernel: vae_forward.1
= control target key start
LH: loop header
LB: loop body
LE: loop exit
PB: predicated region body
PF: predicated region fallthrough
CT: control target
= control target key end

     0   :  { %vm1250_vm0 = vcmask 130048   ;;  %vm3989_vm1 = vcmask 125952   ;;  %s7145_s2 = inlined_call_operand.vmem [shape: bf16[784,512], index: 2, kind: input, shape index: {}]   ;;  %s7146_s0 = inlined_call_operand.vmem [shape: f32[8,784], index: 0, kind: input, shape index: {}]   ;;  %s7147_s4 = inlined_call_operand.vmem [shape: f32[512,256], index: 4, kind: input, shape index: {}]   ;;  %s7148_s3 = inlined_call_operand.vmem [shape: f32[1,512], index: 3, kind: input, shape index: {}]   ;;  %s7149_s6 = inlined_call_operand.vmem [shape: bf16[128,512], index: 6, kind: input, shape index: {}]   ;;  %s7150_s8 = inlined_call_operand.vmem [shape: bf16[512,784], index: 8, kind: input, shape index: {}]   ;;  %s7151_s5 = inlined_call_operand.vmem [shape: f32[1,256], index: 5, kind: input, shape index: {}]   ;;  %s7152_s11 = inlined_call_operand.vmem [shape: f32[8,256], index: 11, kind: output, shape index: {1}]   ;;  %s7153_s1 = inlined_call_operand.vmem [shape: f32[8,128], index: 1, kind: input, shape index: {}]   ;;  %s7154_s7 = inlined_call_operand.vmem [shape: f32[1,512], index: 7, kind: input, shape index: {}]   ;;  %s7155_s9 = inlined_call_operand.vmem [shape: f32[1,784], index: 9, kind: input, shape index: {}]   ;;  %s7156_s10 = inlined_call_operand.vmem [shape: bf16[8,784], index: 10, kind: output, shape index: {0}]  }
   0x1   :  { %v4508_v0 = vld [vmem:[%s7145_s2 + $0xe4] ss:$16 sps:$4 sm:$0xff]   ;;  %v4512_v2 = vld [vmem:[%s7145_s2 + $0xe0] ss:$16 sps:$4 sm:$0xff]   ;;  %v39_v46 = vld [vmem:[%s7146_s0 + $0x8] sm:$0xff] }
   0x2   :  { %v4510_v1 = vld [vmem:[%s7145_s2 + $0x2e4] ss:$16 sps:$4 sm:$0xff]   ;;  %1254 = vmatprep.subr.bf16.mxu0 %v4508_v0  ;;  %v4513_v3 = vld [vmem:[%s7145_s2 + $0x2e0] ss:$16 sps:$4 sm:$0xff]   ;;  %v5394_v49 = vpack.c.bf16 %v39_v46, %v39_v46  ;;  %v41_v50 = vld [vmem:[%s7146_s0 + $0x18] sm:$0xff] }
   0x3   :  { %1295 = vmatprep.subr.bf16.mxu1 %v4510_v1  ;;  %v4514_v4 = vld [vmem:[%s7145_s2 + $0xc4] ss:$16 sps:$4 sm:$0xff]   ;;  %1255 = vmatpush1.bf16.msra.mxu0 %v4512_v2  ;;  %v4518_v6 = vld [vmem:[%s7145_s2 + $0xc0] ss:$16 sps:$4 sm:$0xff]   ;;  %v5402_v52 = vpack.c.bf16 %v41_v50, %v41_v50 }
   0x4   :  { %1296 = vmatpush1.bf16.msra.mxu1 %v4513_v3  ;;  %v4516_v5 = vld [vmem:[%s7145_s2 + $0x2c4] ss:$16 sps:$4 sm:$0xff]   ;;  %1256 = vmatprep.subr.bf16.mxu0 %v4514_v4  ;;  %v4519_v7 = vld [vmem:[%s7145_s2 + $0x2c0] ss:$16 sps:$4 sm:$0xff]  }
   0x5   :  { %1297 = vmatprep.subr.bf16.mxu1 %v4516_v5  ;;  %v4520_v8 = vld [vmem:[%s7145_s2 + $0xa4] ss:$16 sps:$4 sm:$0xff]   ;;  %v4524_v10 = vld [vmem:[%s7145_s2 + $0xa0] ss:$16 sps:$4 sm:$0xff]   ;;  %1286 = vmatprep.mubr.bf16.mxu0 %v5394_v49 }
   0x6   :  { %v4522_v9 = vld [vmem:[%s7145_s2 + $0x2a4] ss:$16 sps:$4 sm:$0xff]   ;;  %v4525_v11 = vld [vmem:[%s7145_s2 + $0x2a0] ss:$16 sps:$4 sm:$0xff]   ;;  %1327 = vmatprep.mubr.bf16.mxu1 %v5402_v52 }
   0x7   :  { %1257 = vmatpush1.bf16.msra.mxu0 %v4518_v6  ;;  %v4526_v12 = vld [vmem:[%s7145_s2 + $0x84] ss:$16 sps:$4 sm:$0xff]   ;;  %v4530_v14 = vld [vmem:[%s7145_s2 + $0x80] ss:$16 sps:$4 sm:$0xff]  }
   0x8   :  { %1298 = vmatpush1.bf16.msra.mxu1 %v4519_v7  ;;  %1258 = vmatprep.subr.bf16.mxu0 %v4520_v8  ;;  %v4528_v13 = vld [vmem:[%s7145_s2 + $0x284] ss:$16 sps:$4 sm:$0xff]   ;;  %v4531_v15 = vld [vmem:[%s7145_s2 + $0x280] ss:$16 sps:$4 sm:$0xff]  }
   0x9   :  { %1299 = vmatprep.subr.bf16.mxu1 %v4522_v9  ;;  %v4532_v16 = vld [vmem:[%s7145_s2 + $0x64] ss:$16 sps:$4 sm:$0xff]   ;;  %v4536_v18 = vld [vmem:[%s7145_s2 + $0x60] ss:$16 sps:$4 sm:$0xff]  }
   0xa   :  { %v4534_v17 = vld [vmem:[%s7145_s2 + $0x264] ss:$16 sps:$4 sm:$0xff]   ;;  %v4537_v19 = vld [vmem:[%s7145_s2 + $0x260] ss:$16 sps:$4 sm:$0xff]  }
   0xb   :  { %1259 = vmatpush1.bf16.msra.mxu0 %v4524_v10  ;;  %v4538_v20 = vld [vmem:[%s7145_s2 + $0x44] ss:$16 sps:$4 sm:$0xff]   ;;  %v4542_v22 = vld [vmem:[%s7145_s2 + $0x40] ss:$16 sps:$4 sm:$0xff]  }
   0xc   :  { %1300 = vmatpush1.bf16.msra.mxu1 %v4525_v11  ;;  %1260 = vmatprep.subr.bf16.mxu0 %v4526_v12  ;;  %v4540_v21 = vld [vmem:[%s7145_s2 + $0x244] ss:$16 sps:$4 sm:$0xff]   ;;  %v4543_v23 = vld [vmem:[%s7145_s2 + $0x240] ss:$16 sps:$4 sm:$0xff]  }
   0xd   :  { %1301 = vmatprep.subr.bf16.mxu1 %v4528_v13  ;;  %v4544_v24 = vld [vmem:[%s7145_s2 + $0x24] ss:$16 sps:$4 sm:$0xff]   ;;  %v4548_v26 = vld [vmem:[%s7145_s2 + $0x20] ss:$16 sps:$4 sm:$0xff]   ;;  %v4615_v13 = vld [vmem:[%s7145_s2 + $0xec] ss:$16 sps:$4 sm:$0xff]  }
   0xe   :  { %v4546_v25 = vld [vmem:[%s7145_s2 + $0x224] ss:$16 sps:$4 sm:$0xff]   ;;  %v4549_v27 = vld [vmem:[%s7145_s2 + $0x220] ss:$16 sps:$4 sm:$0xff]  }
   0xf   :  { %1261 = vmatpush1.bf16.msra.mxu0 %v4530_v14  ;;  %v4550_v28 = vld [vmem:[%s7145_s2 + $0x4] ss:$16 sps:$4 sm:$0xff]   ;;  %v4554_v30 = vld [vmem:[%s7145_s2] ss:$16 sps:$4 sm:$0xff]  }
  0x10   :  { %1302 = vmatpush1.bf16.msra.mxu1 %v4531_v15  ;;  %1262 = vmatprep.subr.bf16.mxu0 %v4532_v16  ;;  %v4552_v29 = vld [vmem:[%s7145_s2 + $0x204] ss:$16 sps:$4 sm:$0xff]   ;;  %v4555_v31 = vld [vmem:[%s7145_s2 + $0x200] ss:$16 sps:$4 sm:$0xff]   ;;  %v5186_v16 = vmov 0  }
  0x11   :  { %1303 = vmatprep.subr.bf16.mxu1 %v4534_v17  ;;  %v4556_v32 = vld [vmem:[%s7145_s2 + $0x1e4] ss:$16 sps:$4 sm:$0xff]   ;;  %v4560_v34 = vld [vmem:[%s7145_s2 + $0x1e0] ss:$16 sps:$4 sm:$0xff]  }
  0x12   :  { %v4558_v33 = vld [vmem:[%s7145_s2 + $0x3e4] ss:$16 sps:$4 sm:$0xff]   ;;  %v4561_v35 = vld [vmem:[%s7145_s2 + $0x3e0] ss:$16 sps:$4 sm:$0xff]  }
  0x13   :  { %1263 = vmatpush1.bf16.msra.mxu0 %v4536_v18  ;;  %v4562_v36 = vld [vmem:[%s7145_s2 + $0x1c4] ss:$16 sps:$4 sm:$0xff]   ;;  %v4566_v38 = vld [vmem:[%s7145_s2 + $0x1c0] ss:$16 sps:$4 sm:$0xff]   ;;  %v4613_v18 = vld [vmem:[%s7145_s2 + $0xe8] ss:$16 sps:$4 sm:$0xff]  }
  0x14   :  { %1304 = vmatpush1.bf16.msra.mxu1 %v4537_v19  ;;  %1264 = vmatprep.subr.bf16.mxu0 %v4538_v20  ;;  %v4564_v37 = vld [vmem:[%s7145_s2 + $0x3c4] ss:$16 sps:$4 sm:$0xff]   ;;  %v4567_v39 = vld [vmem:[%s7145_s2 + $0x3c0] ss:$16 sps:$4 sm:$0xff]  }
  0x15   :  { %1305 = vmatprep.subr.bf16.mxu1 %v4540_v21  ;;  %v4568_v40 = vld [vmem:[%s7145_s2 + $0x1a4] ss:$16 sps:$4 sm:$0xff]   ;;  %v4572_v42 = vld [vmem:[%s7145_s2 + $0x1a0] ss:$16 sps:$4 sm:$0xff]   ;;  %v4621_v21 = vld [vmem:[%s7145_s2 + $0xcc] ss:$16 sps:$4 sm:$0xff]  }
  0x16   :  { %v4570_v41 = vld [vmem:[%s7145_s2 + $0x3a4] ss:$16 sps:$4 sm:$0xff]   ;;  %v4573_v43 = vld [vmem:[%s7145_s2 + $0x3a0] ss:$16 sps:$4 sm:$0xff]  }
  0x17   :  { %1265 = vmatpush1.bf16.msra.mxu0 %v4542_v22  ;;  %v4574_v44 = vld [vmem:[%s7145_s2 + $0x184] ss:$16 sps:$4 sm:$0xff]   ;;  %v4578_v47 = vld [vmem:[%s7145_s2 + $0x180] ss:$16 sps:$4 sm:$0xff]  }
  0x18   :  { %1306 = vmatpush1.bf16.msra.mxu1 %v4543_v23  ;;  %1266 = vmatprep.subr.bf16.mxu0 %v4544_v24  ;;  %v4576_v45 = vld [vmem:[%s7145_s2 + $0x384] ss:$16 sps:$4 sm:$0xff]   ;;  %v4579_v48 = vld [vmem:[%s7145_s2 + $0x380] ss:$16 sps:$4 sm:$0xff]   ;;  %v4619_v23 = vld [vmem:[%s7145_s2 + $0xc8] ss:$16 sps:$4 sm:$0xff]  }
  0x19   :  { %1307 = vmatprep.subr.bf16.mxu1 %v4546_v25  ;;  %v4580_v51 = vld [vmem:[%s7145_s2 + $0x164] ss:$16 sps:$4 sm:$0xff]   ;;  %v4584_v54 = vld [vmem:[%s7145_s2 + $0x160] ss:$16 sps:$4 sm:$0xff]   ;;  %v4627_v25 = vld [vmem:[%s7145_s2 + $0xac] ss:$16 sps:$4 sm:$0xff]  }
  0x1a   :  { %v4582_v53 = vld [vmem:[%s7145_s2 + $0x364] ss:$16 sps:$4 sm:$0xff]   ;;  %v4585_v55 = vld [vmem:[%s7145_s2 + $0x360] ss:$16 sps:$4 sm:$0xff]  }
  0x1b   :  { %1267 = vmatpush1.bf16.msra.mxu0 %v4548_v26  ;;  %v4586_v56 = vld [vmem:[%s7145_s2 + $0x144] ss:$16 sps:$4 sm:$0xff]   ;;  %v4590_v58 = vld [vmem:[%s7145_s2 + $0x140] ss:$16 sps:$4 sm:$0xff]  }
  0x1c   :  { %1308 = vmatpush1.bf16.msra.mxu1 %v4549_v27  ;;  %1268 = vmatprep.subr.bf16.mxu0 %v4550_v28  ;;  %v4588_v57 = vld [vmem:[%s7145_s2 + $0x344] ss:$16 sps:$4 sm:$0xff]   ;;  %v4591_v59 = vld [vmem:[%s7145_s2 + $0x340] ss:$16 sps:$4 sm:$0xff]   ;;  %v4625_v27 = vld [vmem:[%s7145_s2 + $0xa8] ss:$16 sps:$4 sm:$0xff]  }
  0x1d   :  { %1309 = vmatprep.subr.bf16.mxu1 %v4552_v29  ;;  %v4592_v60 = vld [vmem:[%s7145_s2 + $0x124] ss:$16 sps:$4 sm:$0xff]   ;;  %v4596_v62 = vld [vmem:[%s7145_s2 + $0x120] ss:$16 sps:$4 sm:$0xff]   ;;  %v4633_v29 = vld [vmem:[%s7145_s2 + $0x8c] ss:$16 sps:$4 sm:$0xff]  }
  0x1e   :  { %v4594_v61 = vld [vmem:[%s7145_s2 + $0x324] ss:$16 sps:$4 sm:$0xff]   ;;  %v4597_v63 = vld [vmem:[%s7145_s2 + $0x320] ss:$16 sps:$4 sm:$0xff]  }
  0x1f   :  { %1269 = vmatpush1.bf16.msra.mxu0 %v4554_v30  ;;  %v4598_v0 = vld [vmem:[%s7145_s2 + $0x104] ss:$16 sps:$4 sm:$0xff]   ;;  %v4602_v2 = vld [vmem:[%s7145_s2 + $0x100] ss:$16 sps:$4 sm:$0xff]  }
  0x20   :  { %1310 = vmatpush1.bf16.msra.mxu1 %v4555_v31  ;;  %1270 = vmatprep.subr.bf16.mxu0 %v4556_v32  ;;  %v4600_v1 = vld [vmem:[%s7145_s2 + $0x304] ss:$16 sps:$4 sm:$0xff]   ;;  %v4603_v3 = vld [vmem:[%s7145_s2 + $0x300] ss:$16 sps:$4 sm:$0xff]   ;;  %v4631_v31 = vld [vmem:[%s7145_s2 + $0x88] ss:$16 sps:$4 sm:$0xff]  }
  0x21   :  { %1311 = vmatprep.subr.bf16.mxu1 %v4558_v33  ;;  %v38_v4 = vld [vmem:[%s7146_s0] sm:$0xff]  ;;  %v40_v5 = vld [vmem:[%s7146_s0 + $0x10] sm:$0xff]  ;;  %v4639_v33 = vld [vmem:[%s7145_s2 + $0x6c] ss:$16 sps:$4 sm:$0xff]  }
  0x22   :  { %v4606_v6 = vld [vmem:[%s7145_s2 + $0x4e4] ss:$16 sps:$4 sm:$0xff]   ;;  %v5463_v8 = vpack.c.bf16 %v38_v4, %v38_v4  ;;  %v5465_v9 = vpack.c.bf16 %v40_v5, %v40_v5  ;;  %v4604_v10 = vld [vmem:[%s7145_s2 + $0x4e0] ss:$16 sps:$4 sm:$0xff]   ;;  %v4687_v4 = vld [vmem:[%s7145_s2 + $0x16c] ss:$16 sps:$4 sm:$0xff]  }
  0x23   :  { %1271 = vmatpush2.bf16.msra.mxu0 %v4560_v34  ;;  %v4609_v7 = vld [vmem:[%s7145_s2 + $0x604] ss:$16 sps:$4 sm:$0xff]   ;;  %v4607_v11 = vld [vmem:[%s7145_s2 + $0x600] ss:$16 sps:$4 sm:$0xff]  }
  0x24   :  { %1312 = vmatpush2.bf16.msra.mxu1 %v4561_v35  ;;  %1272 = vmatprep.subr.bf16.mxu0 %v4562_v36  ;;  %v4612_v12 = vld [vmem:[%s7145_s2 + $0x4c4] ss:$16 sps:$4 sm:$0xff]   ;;  %v4610_v14 = vld [vmem:[%s7145_s2 + $0x4c0] ss:$16 sps:$4 sm:$0xff]   ;;  %v43_v35 = vld [vmem:[%s7146_s0 + $0x28] sm:$0xff] }
  0x25   :  { %1313 = vmatprep.subr.bf16.mxu1 %v4564_v37  ;;  %v44_v15 = vld [vmem:[%s7146_s0 + $0x30] sm:$0xff]  ;;  %v5547_v36 = vpack.c.bf16 %v43_v35, %v43_v35  ;;  %v4637_v37 = vld [vmem:[%s7145_s2 + $0x68] ss:$16 sps:$4 sm:$0xff]  }
  0x26   :  { %v4618_v17 = vld [vmem:[%s7145_s2 + $0x4a4] ss:$16 sps:$4 sm:$0xff]   ;;  %v5494_v19 = vpack.c.bf16 %v44_v15, %v44_v15  ;;  %v4616_v20 = vld [vmem:[%s7145_s2 + $0x4a0] ss:$16 sps:$4 sm:$0xff]   ;;  %v4724_v35 = vld [vmem:[%s7145_s2 + $0x268] ss:$16 sps:$4 sm:$0xff]  }
  0x27   :  { %1273 = vmatpush2.bf16.msra.mxu0 %v4566_v38  ;;  %v4624_v22 = vld [vmem:[%s7145_s2 + $0x484] ss:$16 sps:$4 sm:$0xff]   ;;  %v4622_v24 = vld [vmem:[%s7145_s2 + $0x480] ss:$16 sps:$4 sm:$0xff]  }
  0x28   :  { %1314 = vmatpush2.bf16.msra.mxu1 %v4567_v39  ;;  %1274 = vmatprep.subr.bf16.mxu0 %v4568_v40  ;;  %v4630_v26 = vld [vmem:[%s7145_s2 + $0x464] ss:$16 sps:$4 sm:$0xff]   ;;  %v4628_v28 = vld [vmem:[%s7145_s2 + $0x460] ss:$16 sps:$4 sm:$0xff]   ;;  %v4645_v39 = vld [vmem:[%s7145_s2 + $0x4c] ss:$16 sps:$4 sm:$0xff]  }
  0x29   :  { %1315 = vmatprep.subr.bf16.mxu1 %v4570_v41  ;;  %v4636_v30 = vld [vmem:[%s7145_s2 + $0x444] ss:$16 sps:$4 sm:$0xff]   ;;  %v4634_v32 = vld [vmem:[%s7145_s2 + $0x440] ss:$16 sps:$4 sm:$0xff]   ;;  %v4643_v41 = vld [vmem:[%s7145_s2 + $0x48] ss:$16 sps:$4 sm:$0xff]  }
  0x2a   :  { %v4642_v34 = vld [vmem:[%s7145_s2 + $0x424] ss:$16 sps:$4 sm:$0xff]   ;;  %v4640_v38 = vld [vmem:[%s7145_s2 + $0x420] ss:$16 sps:$4 sm:$0xff]  }
  0x2b   :  { %1275 = vmatpush2.bf16.msra.mxu0 %v4572_v42  ;;  %v4648_v40 = vld [vmem:[%s7145_s2 + $0x404] ss:$16 sps:$4 sm:$0xff]   ;;  %v4646_v42 = vld [vmem:[%s7145_s2 + $0x400] ss:$16 sps:$4 sm:$0xff]  }
  0x2c   :  { %1316 = vmatpush2.bf16.msra.mxu1 %v4573_v43  ;;  %1276 = vmatprep.subr.bf16.mxu0 %v4574_v44  ;;  %v4651_v43 = vld [vmem:[%s7145_s2 + $0x2c] ss:$16 sps:$4 sm:$0xff]   ;;  %v4654_v44 = vld [vmem:[%s7145_s2 + $0x5e4] ss:$16 sps:$4 sm:$0xff]   ;;  %v4652_v46 = vld [vmem:[%s7145_s2 + $0x5e0] ss:$16 sps:$4 sm:$0xff]  }
  0x2d   :  { %1317 = vmatprep.subr.bf16.mxu1 %v4576_v45  ;;  %v4649_v45 = vld [vmem:[%s7145_s2 + $0x28] ss:$16 sps:$4 sm:$0xff]   ;;  %v4658_v50 = vld [vmem:[%s7145_s2 + $0x5c0] ss:$16 sps:$4 sm:$0xff]   ;;  %v4690_v5 = vld [vmem:[%s7145_s2 + $0x524] ss:$16 sps:$4 sm:$0xff]  }
  0x2e   :  { %v42_v15 = vld [vmem:[%s7146_s0 + $0x20] sm:$0xff] }
  0x2f   :  { %1277 = vmatpush2.bf16.msra.mxu0 %v4578_v47  ;;  %v4657_v47 = vld [vmem:[%s7145_s2 + $0xc] ss:$16 sps:$4 sm:$0xff]  }
  0x30   :  { %1318 = vmatpush2.bf16.msra.mxu1 %v4579_v48  ;;  %1278 = vmatprep.subr.bf16.mxu0 %v4580_v51  ;;  %v4660_v48 = vld [vmem:[%s7145_s2 + $0x5c4] ss:$16 sps:$4 sm:$0xff]   ;;  %v4663_v51 = vld [vmem:[%s7145_s2 + $0x1ec] ss:$16 sps:$4 sm:$0xff]  }
  0x31   :  { %1319 = vmatprep.subr.bf16.mxu1 %v4582_v53  ;;  %v4666_v53 = vld [vmem:[%s7145_s2 + $0x5a4] ss:$16 sps:$4 sm:$0xff]  }
  0x33   :  { %1279 = vmatpush2.bf16.msra.mxu0 %v4584_v54  ;;  %v4661_v54 = vld [vmem:[%s7145_s2 + $0x1e8] ss:$16 sps:$4 sm:$0xff]  }
  0x34   :  { %1320 = vmatpush2.bf16.msra.mxu1 %v4585_v55  ;;  %1280 = vmatprep.subr.bf16.mxu0 %v4586_v56  ;;  %v4664_v55 = vld [vmem:[%s7145_s2 + $0x5a0] ss:$16 sps:$4 sm:$0xff]   ;;  %v4669_v56 = vld [vmem:[%s7145_s2 + $0x1cc] ss:$16 sps:$4 sm:$0xff]  }
  0x35   :  { %1321 = vmatprep.subr.bf16.mxu1 %v4588_v57  ;;  %v4672_v57 = vld [vmem:[%s7145_s2 + $0x584] ss:$16 sps:$4 sm:$0xff]  }
  0x37   :  { %1281 = vmatpush2.bf16.msra.mxu0 %v4590_v58  ;;  %v4667_v58 = vld [vmem:[%s7145_s2 + $0x1c8] ss:$16 sps:$4 sm:$0xff]  }
  0x38   :  { %1322 = vmatpush2.bf16.msra.mxu1 %v4591_v59  ;;  %1282 = vmatprep.subr.bf16.mxu0 %v4592_v60  ;;  %v4670_v59 = vld [vmem:[%s7145_s2 + $0x580] ss:$16 sps:$4 sm:$0xff]   ;;  %v4675_v60 = vld [vmem:[%s7145_s2 + $0x1ac] ss:$16 sps:$4 sm:$0xff]  }
  0x39   :  { %1323 = vmatprep.subr.bf16.mxu1 %v4594_v61  ;;  %v4678_v61 = vld [vmem:[%s7145_s2 + $0x564] ss:$16 sps:$4 sm:$0xff]  }
  0x3b   :  { %1283 = vmatpush2.bf16.msra.mxu0 %v4596_v62  ;;  %v4673_v62 = vld [vmem:[%s7145_s2 + $0x1a8] ss:$16 sps:$4 sm:$0xff]  }
  0x3c   :  { %1324 = vmatpush2.bf16.msra.mxu1 %v4597_v63  ;;  %1284 = vmatprep.subr.bf16.mxu0 %v4598_v0  ;;  %v4676_v63 = vld [vmem:[%s7145_s2 + $0x560] ss:$16 sps:$4 sm:$0xff]   ;;  %v4681_v0 = vld [vmem:[%s7145_s2 + $0x18c] ss:$16 sps:$4 sm:$0xff]  }
  0x3d   :  { %1325 = vmatprep.subr.bf16.mxu1 %v4600_v1  ;;  %v4684_v1 = vld [vmem:[%s7145_s2 + $0x544] ss:$16 sps:$4 sm:$0xff]  }
  0x3f   :  { %1285 = vmatpush2.bf16.msra.mxu0 %v4602_v2  ;;  %v4679_v2 = vld [vmem:[%s7145_s2 + $0x188] ss:$16 sps:$4 sm:$0xff]  }
  0x40   :  { %1326 = vmatpush2.bf16.msra.mxu1 %v4603_v3  ;;  %1336 = vmatprep.subr.bf16.mxu0 %v4606_v6  ;;  %v4682_v3 = vld [vmem:[%s7145_s2 + $0x540] ss:$16 sps:$4 sm:$0xff]   ;;  %v4685_v6 = vld [vmem:[%s7145_s2 + $0x168] ss:$16 sps:$4 sm:$0xff]  }
  0x41   :  { %1391 = vmatprep.subr.bf16.mxu1 %v4609_v7  ;;  %v4688_v7 = vld [vmem:[%s7145_s2 + $0x520] ss:$16 sps:$4 sm:$0xff]  }
  0x42   :  { %1287 = vmatmul.mubr.bf16.vlgmr.msra.gmra.mxu0 %v5463_v8 }
  0x43   :  { %1328 = vmatmul.mubr.bf16.vlgmr.msra.gmra.mxu1 %v5465_v9  ;;  %1337 = vmatpush1.bf16.msra.mxu0 %v4604_v10  ;;  %v4693_v10 = vld [vmem:[%s7145_s2 + $0x14c] ss:$16 sps:$4 sm:$0xff]  }
  0x44   :  { %1392 = vmatpush1.bf16.msra.mxu1 %v4607_v11  ;;  %1338 = vmatprep.subr.bf16.mxu0 %v4612_v12  ;;  %v4696_v11 = vld [vmem:[%s7145_s2 + $0x504] ss:$16 sps:$4 sm:$0xff]   ;;  %v4691_v12 = vld [vmem:[%s7145_s2 + $0x148] ss:$16 sps:$4 sm:$0xff]  }
  0x45   :  { %1409 = vmatprep.mubr.bf16.mxu1 %v5186_v16  ;;  %1418 = vmatprep.subr.bf16.mxu1 %v4615_v13  ;;  %v4694_v13 = vld [vmem:[%s7145_s2 + $0x500] ss:$16 sps:$4 sm:$0xff]  }
  0x46   :  { %1368 = vmatprep.mubr.bf16.mxu0 %v5547_v36 }
  0x47   :  { %1339 = vmatpush1.bf16.msra.mxu0 %v4610_v14  ;;  %v4699_v14 = vld [vmem:[%s7145_s2 + $0x12c] ss:$16 sps:$4 sm:$0xff]  }
  0x48   :  { %1340 = vmatprep.subr.bf16.mxu0 %v4618_v17  ;;  %v4702_v17 = vld [vmem:[%s7145_s2 + $0x2ec] ss:$16 sps:$4 sm:$0xff]  }
  0x4b   :  { %4197 = vmatmul.mubr.msk.bf16.vlgmr.msra.gmra.mxu1 %vm1250_vm0, %v5494_v19  ;;  %1341 = vmatpush1.bf16.msra.mxu0 %v4616_v20  ;;  %v5676_v20 = vpack.c.bf16 %v42_v15, %v42_v15  ;;  %v4789_v15 = vld [vmem:[%s7145_s2 + $0x54c] ss:$16 sps:$4 sm:$0xff]  }
  0x4c   :  { %1419 = vmatpush1.bf16.msra.mxu1 %v4613_v18  ;;  %1342 = vmatprep.subr.bf16.mxu0 %v4624_v22  ;;  %v4697_v18 = vld [vmem:[%s7145_s2 + $0x128] ss:$16 sps:$4 sm:$0xff]   ;;  %v4705_v22 = vld [vmem:[%s7145_s2 + $0x10c] ss:$16 sps:$4 sm:$0xff]  }
  0x4d   :  { %1420 = vmatprep.subr.bf16.mxu1 %v4621_v21  ;;  %1450 = vmatprep.mubr.bf16.mxu1 %v5394_v49  ;;  %v4655_v49 = vld [vmem:[%s7145_s2 + $0x8] ss:$16 sps:$4 sm:$0xff]  }
  0x4e   :  { %v4700_v21 = vld [vmem:[%s7145_s2 + $0x2e8] ss:$16 sps:$4 sm:$0xff]  }
  0x4f   :  { %1343 = vmatpush1.bf16.msra.mxu0 %v4622_v24  ;;  %v4703_v24 = vld [vmem:[%s7145_s2 + $0x108] ss:$16 sps:$4 sm:$0xff]  }
  0x50   :  { %1421 = vmatpush1.bf16.msra.mxu1 %v4619_v23  ;;  %1344 = vmatprep.subr.bf16.mxu0 %v4630_v26  ;;  %v4708_v23 = vld [vmem:[%s7145_s2 + $0x2cc] ss:$16 sps:$4 sm:$0xff]  }
  0x51   :  { %1422 = vmatprep.subr.bf16.mxu1 %v4627_v25  ;;  %v4706_v25 = vld [vmem:[%s7145_s2 + $0x2c8] ss:$16 sps:$4 sm:$0xff]   ;;  %v4711_v26 = vld [vmem:[%s7145_s2 + $0x4ec] ss:$16 sps:$4 sm:$0xff]  }
  0x53   :  { %1345 = vmatpush1.bf16.msra.mxu0 %v4628_v28  ;;  %v4709_v28 = vld [vmem:[%s7145_s2 + $0x4e8] ss:$16 sps:$4 sm:$0xff]  }
  0x54   :  { %1423 = vmatpush1.bf16.msra.mxu1 %v4625_v27  ;;  %1346 = vmatprep.subr.bf16.mxu0 %v4636_v30  ;;  %v4714_v27 = vld [vmem:[%s7145_s2 + $0x2ac] ss:$16 sps:$4 sm:$0xff]  }
  0x55   :  { %1424 = vmatprep.subr.bf16.mxu1 %v4633_v29  ;;  %v4712_v29 = vld [vmem:[%s7145_s2 + $0x2a8] ss:$16 sps:$4 sm:$0xff]   ;;  %v4717_v30 = vld [vmem:[%s7145_s2 + $0x4cc] ss:$16 sps:$4 sm:$0xff]  }
  0x57   :  { %1347 = vmatpush1.bf16.msra.mxu0 %v4634_v32  ;;  %v4718_v32 = vld [vmem:[%s7145_s2 + $0x288] ss:$16 sps:$4 sm:$0xff]  }
  0x58   :  { %1425 = vmatpush1.bf16.msra.mxu1 %v4631_v31  ;;  %1348 = vmatprep.subr.bf16.mxu0 %v4642_v34  ;;  %v4715_v31 = vld [vmem:[%s7145_s2 + $0x4c8] ss:$16 sps:$4 sm:$0xff]  }
  0x59   :  { %1426 = vmatprep.subr.bf16.mxu1 %v4639_v33  ;;  %v4723_v33 = vld [vmem:[%s7145_s2 + $0x4ac] ss:$16 sps:$4 sm:$0xff]   ;;  %v4721_v34 = vld [vmem:[%s7145_s2 + $0x4a8] ss:$16 sps:$4 sm:$0xff]  }
  0x5b   :  { %1349 = vmatpush1.bf16.msra.mxu0 %v4640_v38  ;;  %v4727_v38 = vld [vmem:[%s7145_s2 + $0x488] ss:$16 sps:$4 sm:$0xff]  }
  0x5c   :  { %1427 = vmatpush1.bf16.msra.mxu1 %v4637_v37  ;;  %1350 = vmatprep.subr.bf16.mxu0 %v4648_v40  ;;  %v4729_v37 = vld [vmem:[%s7145_s2 + $0x48c] ss:$16 sps:$4 sm:$0xff]  }
  0x5d   :  { %1428 = vmatprep.subr.bf16.mxu1 %v4645_v39  ;;  %v4730_v39 = vld [vmem:[%s7145_s2 + $0x248] ss:$16 sps:$4 sm:$0xff]   ;;  %v4735_v40 = vld [vmem:[%s7145_s2 + $0x46c] ss:$16 sps:$4 sm:$0xff]  }
  0x5f   :  { %1351 = vmatpush1.bf16.msra.mxu0 %v4646_v42  ;;  %v4733_v42 = vld [vmem:[%s7145_s2 + $0x468] ss:$16 sps:$4 sm:$0xff]  }
  0x60   :  { %1429 = vmatpush1.bf16.msra.mxu1 %v4643_v41  ;;  %1352 = vmatprep.subr.bf16.mxu0 %v4654_v44  ;;  %v4738_v41 = vld [vmem:[%s7145_s2 + $0x22c] ss:$16 sps:$4 sm:$0xff]  }
  0x61   :  { %1430 = vmatprep.subr.bf16.mxu1 %v4651_v43  ;;  %v4736_v43 = vld [vmem:[%s7145_s2 + $0x228] ss:$16 sps:$4 sm:$0xff]   ;;  %v4741_v44 = vld [vmem:[%s7145_s2 + $0x44c] ss:$16 sps:$4 sm:$0xff]  }
  0x63   :  { %1353 = vmatpush2.bf16.msra.mxu0 %v4652_v46  ;;  %v4739_v46 = vld [vmem:[%s7145_s2 + $0x448] ss:$16 sps:$4 sm:$0xff]  }
  0x64   :  { %1431 = vmatpush1.bf16.msra.mxu1 %v4649_v45  ;;  %1354 = vmatprep.subr.bf16.mxu0 %v4660_v48  ;;  %v4744_v45 = vld [vmem:[%s7145_s2 + $0x20c] ss:$16 sps:$4 sm:$0xff]  }
  0x65   :  { %1432 = vmatprep.subr.bf16.mxu1 %v4657_v47  ;;  %v4742_v47 = vld [vmem:[%s7145_s2 + $0x208] ss:$16 sps:$4 sm:$0xff]   ;;  %v4747_v48 = vld [vmem:[%s7145_s2 + $0x42c] ss:$16 sps:$4 sm:$0xff]  }
  0x67   :  { %1355 = vmatpush2.bf16.msra.mxu0 %v4658_v50  ;;  %v4745_v50 = vld [vmem:[%s7145_s2 + $0x428] ss:$16 sps:$4 sm:$0xff]  }
  0x68   :  { %1433 = vmatpush1.bf16.msra.mxu1 %v4655_v49  ;;  %1356 = vmatprep.subr.bf16.mxu0 %v4666_v53  ;;  %v4750_v49 = vld [vmem:[%s7145_s2 + $0x3ec] ss:$16 sps:$4 sm:$0xff]  }
  0x69   :  { %1434 = vmatprep.subr.bf16.mxu1 %v4663_v51  ;;  %v4748_v51 = vld [vmem:[%s7145_s2 + $0x3e8] ss:$16 sps:$4 sm:$0xff]   ;;  %v4753_v53 = vld [vmem:[%s7145_s2 + $0x40c] ss:$16 sps:$4 sm:$0xff]  }
  0x6b   :  { %1357 = vmatpush2.bf16.msra.mxu0 %v4664_v55  ;;  %v4751_v55 = vld [vmem:[%s7145_s2 + $0x408] ss:$16 sps:$4 sm:$0xff]  }
  0x6c   :  { %1435 = vmatpush2.bf16.msra.mxu1 %v4661_v54  ;;  %1358 = vmatprep.subr.bf16.mxu0 %v4672_v57  ;;  %v4756_v54 = vld [vmem:[%s7145_s2 + $0x3cc] ss:$16 sps:$4 sm:$0xff]  }
  0x6d   :  { %1436 = vmatprep.subr.bf16.mxu1 %v4669_v56  ;;  %v4754_v56 = vld [vmem:[%s7145_s2 + $0x3c8] ss:$16 sps:$4 sm:$0xff]   ;;  %v4759_v57 = vld [vmem:[%s7145_s2 + $0x5ec] ss:$16 sps:$4 sm:$0xff]  }
  0x6f   :  { %1359 = vmatpush2.bf16.msra.mxu0 %v4670_v59  ;;  %v4757_v59 = vld [vmem:[%s7145_s2 + $0x5e8] ss:$16 sps:$4 sm:$0xff]  }
  0x70   :  { %1437 = vmatpush2.bf16.msra.mxu1 %v4667_v58  ;;  %1360 = vmatprep.subr.bf16.mxu0 %v4678_v61  ;;  %v4762_v58 = vld [vmem:[%s7145_s2 + $0x3ac] ss:$16 sps:$4 sm:$0xff]  }
  0x71   :  { %1438 = vmatprep.subr.bf16.mxu1 %v4675_v60  ;;  %v4760_v60 = vld [vmem:[%s7145_s2 + $0x3a8] ss:$16 sps:$4 sm:$0xff]   ;;  %v4765_v61 = vld [vmem:[%s7145_s2 + $0x5cc] ss:$16 sps:$4 sm:$0xff]  }
  0x73   :  { %1361 = vmatpush2.bf16.msra.mxu0 %v4676_v63  ;;  %v4763_v63 = vld [vmem:[%s7145_s2 + $0x5c8] ss:$16 sps:$4 sm:$0xff]  }
  0x74   :  { %1439 = vmatpush2.bf16.msra.mxu1 %v4673_v62  ;;  %1362 = vmatprep.subr.bf16.mxu0 %v4684_v1  ;;  %v4768_v62 = vld [vmem:[%s7145_s2 + $0x38c] ss:$16 sps:$4 sm:$0xff]  }
  0x75   :  { %1440 = vmatprep.subr.bf16.mxu1 %v4681_v0  ;;  %v4766_v0 = vld [vmem:[%s7145_s2 + $0x388] ss:$16 sps:$4 sm:$0xff]   ;;  %v4771_v1 = vld [vmem:[%s7145_s2 + $0x5ac] ss:$16 sps:$4 sm:$0xff]  }
  0x77   :  { %1363 = vmatpush2.bf16.msra.mxu0 %v4682_v3  ;;  %v4769_v3 = vld [vmem:[%s7145_s2 + $0x5a8] ss:$16 sps:$4 sm:$0xff]  }
  0x78   :  { %1441 = vmatpush2.bf16.msra.mxu1 %v4679_v2  ;;  %1364 = vmatprep.subr.bf16.mxu0 %v4690_v5  ;;  %v4774_v2 = vld [vmem:[%s7145_s2 + $0x36c] ss:$16 sps:$4 sm:$0xff]  }
  0x79   :  { %1442 = vmatprep.subr.bf16.mxu1 %v4687_v4  ;;  %v4772_v4 = vld [vmem:[%s7145_s2 + $0x368] ss:$16 sps:$4 sm:$0xff]   ;;  %v4777_v5 = vld [vmem:[%s7145_s2 + $0x58c] ss:$16 sps:$4 sm:$0xff]  }
  0x7b   :  { %1365 = vmatpush2.bf16.msra.mxu0 %v4688_v7  ;;  %v4775_v7 = vld [vmem:[%s7145_s2 + $0x588] ss:$16 sps:$4 sm:$0xff]  }
  0x7c   :  { %1443 = vmatpush2.bf16.msra.mxu1 %v4685_v6  ;;  %1366 = vmatprep.subr.bf16.mxu0 %v4696_v11  ;;  %v4780_v6 = vld [vmem:[%s7145_s2 + $0x34c] ss:$16 sps:$4 sm:$0xff]  }
  0x7d   :  { %1444 = vmatprep.subr.bf16.mxu1 %v4693_v10  ;;  %v4778_v10 = vld [vmem:[%s7145_s2 + $0x348] ss:$16 sps:$4 sm:$0xff]   ;;  %v4783_v11 = vld [vmem:[%s7145_s2 + $0x56c] ss:$16 sps:$4 sm:$0xff]  }
  0x7f   :  { %1367 = vmatpush2.bf16.msra.mxu0 %v4694_v13  ;;  %v4781_v13 = vld [vmem:[%s7145_s2 + $0x568] ss:$16 sps:$4 sm:$0xff]  }
  0x80   :  { %1445 = vmatpush2.bf16.msra.mxu1 %v4691_v12  ;;  %1459 = vmatprep.subr.bf16.mxu0 %v4702_v17  ;;  %v4786_v12 = vld [vmem:[%s7145_s2 + $0x32c] ss:$16 sps:$4 sm:$0xff]  }
  0x81   :  { %1446 = vmatprep.subr.bf16.mxu1 %v4699_v14  ;;  %v4784_v14 = vld [vmem:[%s7145_s2 + $0x328] ss:$16 sps:$4 sm:$0xff]   ;;  %v4792_v17 = vld [vmem:[%s7145_s2 + $0x30c] ss:$16 sps:$4 sm:$0xff]  }
  0x82   :  { %1369 = vmatmul.mubr.bf16.vlgmr.msra.gmra.mxu0 %v5676_v20 }
  0x83   :  { %1460 = vmatpush1.bf16.msra.mxu0 %v4700_v21  ;;  %1491 = vmatprep.mubr.bf16.mxu0 %v5402_v52  ;;  %v4720_v52 = vld [vmem:[%s7145_s2 + $0x28c] ss:$16 sps:$4 sm:$0xff]   ;;  %v4790_v21 = vld [vmem:[%s7145_s2 + $0x308] ss:$16 sps:$4 sm:$0xff]  }
  0x84   :  { %1447 = vmatpush2.bf16.msra.mxu1 %v4697_v18  ;;  %1461 = vmatprep.subr.bf16.mxu0 %v4708_v23  ;;  %v4787_v18 = vld [vmem:[%s7145_s2 + $0x548] ss:$16 sps:$4 sm:$0xff]   ;;  %v4798_v23 = vld [vmem:[%s7145_s2 + $0x60c] ss:$16 sps:$4 sm:$0xff]  }
  0x85   :  { %1448 = vmatprep.subr.bf16.mxu1 %v4705_v22  ;;  %v4795_v22 = vld [vmem:[%s7145_s2 + $0x52c] ss:$16 sps:$4 sm:$0xff]  }
  0x87   :  { %1462 = vmatpush1.bf16.msra.mxu0 %v4706_v25  ;;  %v4796_v25 = vld [vmem:[%s7145_s2 + $0x608] ss:$16 sps:$4 sm:$0xff]  }
  0x88   :  { %1449 = vmatpush2.bf16.msra.mxu1 %v4703_v24  ;;  %1463 = vmatprep.subr.bf16.mxu0 %v4714_v27  ;;  %v4793_v24 = vld [vmem:[%s7145_s2 + $0x528] ss:$16 sps:$4 sm:$0xff]  }
  0x89   :  { %1500 = vmatprep.subr.bf16.mxu1 %v4711_v26  ;;  %v4801_v26 = vld [vmem:[%s7145_s2 + $0x50c] ss:$16 sps:$4 sm:$0xff]  }
  0x8a   :  { %v1617_v27 = vld [vmem:[%s7147_s4 + $0xf8] sm:$0xff] }
  0x8b   :  { %1451 = vmatmul.mubr.bf16.vlgmr.msra.gmra.mxu1 %v5463_v8  ;;  %1464 = vmatpush1.bf16.msra.mxu0 %v4712_v29  ;;  %v4726_v8 = vld [vmem:[%s7145_s2 + $0x26c] ss:$16 sps:$4 sm:$0xff]   ;;  %v1616_v29 = vld [vmem:[%s7147_s4 + $0xf0] sm:$0xff] }
  0x8c   :  { %1501 = vmatpush1.bf16.msra.mxu1 %v4709_v28  ;;  %1465 = vmatprep.subr.bf16.mxu0 %v4720_v52  ;;  %v4799_v28 = vld [vmem:[%s7145_s2 + $0x508] ss:$16 sps:$4 sm:$0xff]  }
  0x8d   :  { %1502 = vmatprep.subr.bf16.mxu1 %v4717_v30  ;;  %1532 = vmatprep.mubr.bf16.mxu1 %v5547_v36  ;;  %v4732_v36 = vld [vmem:[%s7145_s2 + $0x24c] ss:$16 sps:$4 sm:$0xff]   ;;  %v1614_v30 = vld [vmem:[%s7147_s4 + $0xe0] sm:$0xff] }
  0x8e   :  { %v1613_v52 = vld [vmem:[%s7147_s4 + $0xd8] sm:$0xff] }
  0x8f   :  { %1466 = vmatpush1.bf16.msra.mxu0 %v4718_v32  ;;  %v1609_v32 = vld [vmem:[%s7147_s4 + $0xb8] sm:$0xff] }
  0x90   :  { %1503 = vmatpush1.bf16.msra.mxu1 %v4715_v31  ;;  %1467 = vmatprep.subr.bf16.mxu0 %v4726_v8  ;;  %v1612_v31 = vld [vmem:[%s7147_s4 + $0xd0] sm:$0xff]  ;;  %v1681_v8 = vld [vmem:[%s7147_s4 + $0x2f8] sm:$0xff] }
  0x91   :  { %1504 = vmatprep.subr.bf16.mxu1 %v4723_v33  ;;  %v1608_v33 = vld [vmem:[%s7147_s4 + $0xb0] sm:$0xff] }
  0x93   :  { %1468 = vmatpush1.bf16.msra.mxu0 %v4724_v35  ;;  %v1679_v35 = vld [vmem:[%s7147_s4 + $0x2e8] sm:$0xff] }
  0x94   :  { %1505 = vmatpush1.bf16.msra.mxu1 %v4721_v34  ;;  %1469 = vmatprep.subr.bf16.mxu0 %v4732_v36  ;;  %v1680_v34 = vld [vmem:[%s7147_s4 + $0x2f0] sm:$0xff]  ;;  %v1678_v36 = vld [vmem:[%s7147_s4 + $0x2e0] sm:$0xff] }
  0x95   :  { %1506 = vmatprep.subr.bf16.mxu1 %v4729_v37  ;;  %v1607_v37 = vld [vmem:[%s7147_s4 + $0xa8] sm:$0xff] }
  0x97   :  { %1470 = vmatpush1.bf16.msra.mxu0 %v4730_v39  ;;  %v1677_v39 = vld [vmem:[%s7147_s4 + $0x2d8] sm:$0xff] }
  0x98   :  { %1507 = vmatpush1.bf16.msra.mxu1 %v4727_v38  ;;  %1471 = vmatprep.subr.bf16.mxu0 %v4738_v41  ;;  %v1606_v38 = vld [vmem:[%s7147_s4 + $0xa0] sm:$0xff]  ;;  %v1676_v41 = vld [vmem:[%s7147_s4 + $0x2d0] sm:$0xff] }
  0x99   :  { %1508 = vmatprep.subr.bf16.mxu1 %v4735_v40  ;;  %v1605_v40 = vld [vmem:[%s7147_s4 + $0x98] sm:$0xff] }
  0x9b   :  { %1472 = vmatpush1.bf16.msra.mxu0 %v4736_v43  ;;  %v1675_v43 = vld [vmem:[%s7147_s4 + $0x2c8] sm:$0xff] }
  0x9c   :  { %1509 = vmatpush1.bf16.msra.mxu1 %v4733_v42  ;;  %1473 = vmatprep.subr.bf16.mxu0 %v4744_v45  ;;  %v1604_v42 = vld [vmem:[%s7147_s4 + $0x90] sm:$0xff]  ;;  %v1674_v45 = vld [vmem:[%s7147_s4 + $0x2c0] sm:$0xff] }
  0x9d   :  { %1510 = vmatprep.subr.bf16.mxu1 %v4741_v44  ;;  %v1603_v44 = vld [vmem:[%s7147_s4 + $0x88] sm:$0xff] }
  0x9f   :  { %1474 = vmatpush1.bf16.msra.mxu0 %v4742_v47  ;;  %v1673_v47 = vld [vmem:[%s7147_s4 + $0x2b8] sm:$0xff] }
  0xa0   :  { %1511 = vmatpush1.bf16.msra.mxu1 %v4739_v46  ;;  %1475 = vmatprep.subr.bf16.mxu0 %v4750_v49  ;;  %v1602_v46 = vld [vmem:[%s7147_s4 + $0x80] sm:$0xff]  ;;  %v1672_v49 = vld [vmem:[%s7147_s4 + $0x2b0] sm:$0xff] }
  0xa1   :  { %1512 = vmatprep.subr.bf16.mxu1 %v4747_v48  ;;  %v1601_v48 = vld [vmem:[%s7147_s4 + $0x78] sm:$0xff] }
  0xa3   :  { %1476 = vmatpush2.bf16.msra.mxu0 %v4748_v51  ;;  %v1671_v51 = vld [vmem:[%s7147_s4 + $0x2a8] sm:$0xff] }
  0xa4   :  { %1513 = vmatpush1.bf16.msra.mxu1 %v4745_v50  ;;  %1477 = vmatprep.subr.bf16.mxu0 %v4756_v54  ;;  %v1600_v50 = vld [vmem:[%s7147_s4 + $0x70] sm:$0xff]  ;;  %v1670_v54 = vld [vmem:[%s7147_s4 + $0x2a0] sm:$0xff] }
  0xa5   :  { %1514 = vmatprep.subr.bf16.mxu1 %v4753_v53  ;;  %v1599_v53 = vld [vmem:[%s7147_s4 + $0x68] sm:$0xff] }
  0xa7   :  { %1478 = vmatpush2.bf16.msra.mxu0 %v4754_v56  ;;  %v1669_v56 = vld [vmem:[%s7147_s4 + $0x298] sm:$0xff] }
  0xa8   :  { %1515 = vmatpush1.bf16.msra.mxu1 %v4751_v55  ;;  %1479 = vmatprep.subr.bf16.mxu0 %v4762_v58  ;;  %v1598_v55 = vld [vmem:[%s7147_s4 + $0x60] sm:$0xff]  ;;  %v1668_v58 = vld [vmem:[%s7147_s4 + $0x290] sm:$0xff] }
  0xa9   :  { %1516 = vmatprep.subr.bf16.mxu1 %v4759_v57  ;;  %v1597_v57 = vld [vmem:[%s7147_s4 + $0x58] sm:$0xff] }
  0xab   :  { %1480 = vmatpush2.bf16.msra.mxu0 %v4760_v60  ;;  %v1667_v60 = vld [vmem:[%s7147_s4 + $0x288] sm:$0xff] }
  0xac   :  { %1517 = vmatpush2.bf16.msra.mxu1 %v4757_v59  ;;  %1481 = vmatprep.subr.bf16.mxu0 %v4768_v62  ;;  %v1596_v59 = vld [vmem:[%s7147_s4 + $0x50] sm:$0xff]  ;;  %v1666_v62 = vld [vmem:[%s7147_s4 + $0x280] sm:$0xff] }
  0xad   :  { %1518 = vmatprep.subr.bf16.mxu1 %v4765_v61  ;;  %v1595_v61 = vld [vmem:[%s7147_s4 + $0x48] sm:$0xff] }
  0xaf   :  { %1482 = vmatpush2.bf16.msra.mxu0 %v4766_v0  ;;  %v1665_v0 = vld [vmem:[%s7147_s4 + $0x278] sm:$0xff] }
  0xb0   :  { %1519 = vmatpush2.bf16.msra.mxu1 %v4763_v63  ;;  %1483 = vmatprep.subr.bf16.mxu0 %v4774_v2  ;;  %v1594_v63 = vld [vmem:[%s7147_s4 + $0x40] sm:$0xff]  ;;  %v1664_v2 = vld [vmem:[%s7147_s4 + $0x270] sm:$0xff] }
  0xb1   :  { %1520 = vmatprep.subr.bf16.mxu1 %v4771_v1  ;;  %v1593_v1 = vld [vmem:[%s7147_s4 + $0x38] sm:$0xff] }
  0xb3   :  { %1484 = vmatpush2.bf16.msra.mxu0 %v4772_v4  ;;  %v1663_v4 = vld [vmem:[%s7147_s4 + $0x268] sm:$0xff] }
  0xb4   :  { %1521 = vmatpush2.bf16.msra.mxu1 %v4769_v3  ;;  %1485 = vmatprep.subr.bf16.mxu0 %v4780_v6  ;;  %v1592_v3 = vld [vmem:[%s7147_s4 + $0x30] sm:$0xff]  ;;  %v1662_v6 = vld [vmem:[%s7147_s4 + $0x260] sm:$0xff] }
  0xb5   :  { %1522 = vmatprep.subr.bf16.mxu1 %v4777_v5  ;;  %v1591_v5 = vld [vmem:[%s7147_s4 + $0x28] sm:$0xff] }
  0xb7   :  { %1486 = vmatpush2.bf16.msra.mxu0 %v4778_v10  ;;  %v1661_v10 = vld [vmem:[%s7147_s4 + $0x258] sm:$0xff] }
  0xb8   :  { %1523 = vmatpush2.bf16.msra.mxu1 %v4775_v7  ;;  %1487 = vmatprep.subr.bf16.mxu0 %v4786_v12  ;;  %v1590_v7 = vld [vmem:[%s7147_s4 + $0x20] sm:$0xff]  ;;  %v1660_v12 = vld [vmem:[%s7147_s4 + $0x250] sm:$0xff] }
  0xb9   :  { %1524 = vmatprep.subr.bf16.mxu1 %v4783_v11  ;;  %v1589_v11 = vld [vmem:[%s7147_s4 + $0x18] sm:$0xff] }
  0xbb   :  { %1488 = vmatpush2.bf16.msra.mxu0 %v4784_v14  ;;  %v1659_v14 = vld [vmem:[%s7147_s4 + $0x248] sm:$0xff] }
  0xbc   :  { %1525 = vmatpush2.bf16.msra.mxu1 %v4781_v13  ;;  %1489 = vmatprep.subr.bf16.mxu0 %v4792_v17  ;;  %v1588_v13 = vld [vmem:[%s7147_s4 + $0x10] sm:$0xff]  ;;  %v1658_v17 = vld [vmem:[%s7147_s4 + $0x240] sm:$0xff] }
  0xbd   :  { %1526 = vmatprep.subr.bf16.mxu1 %v4789_v15  ;;  %v1587_v15 = vld [vmem:[%s7147_s4 + $0x8] sm:$0xff] }
  0xbf   :  { %1490 = vmatpush2.bf16.msra.mxu0 %v4790_v21  ;;  %v1657_v21 = vld [vmem:[%s7147_s4 + $0x238] sm:$0xff] }
  0xc0   :  { %1527 = vmatpush2.bf16.msra.mxu1 %v4787_v18  ;;  %1555 = vmatprep.subr.bf16.mxu0 %v4798_v23  ;;  %v1586_v18 = vld [vmem:[%s7147_s4] sm:$0xff]  ;;  %v1656_v23 = vld [vmem:[%s7147_s4 + $0x230] sm:$0xff] }
  0xc1   :  { %1528 = vmatprep.subr.bf16.mxu1 %v4795_v22  ;;  %v1649_v22 = vld [vmem:[%s7147_s4 + $0x1f8] sm:$0xff] }
  0xc2   :  { %1492 = vmatmul.mubr.bf16.vlgmr.msra.gmra.mxu0 %v5465_v9  ;;  %v1615_v9 = vld [vmem:[%s7147_s4 + $0xe8] sm:$0xff] }
  0xc3   :  { %1556 = vmatpush1.bf16.msra.mxu0 %v4796_v25  ;;  %1573 = vmatprep.mubr.bf16.mxu0 %v5186_v16  ;;  %v1655_v25 = vld [vmem:[%s7147_s4 + $0x228] sm:$0xff] }
  0xc4   :  { %1529 = vmatpush2.bf16.msra.mxu1 %v4793_v24  ;;  %1726 = vmatprep.subr.mxu0 %v1617_v27  ;;  %v1648_v24 = vld [vmem:[%s7147_s4 + $0x1f0] sm:$0xff]  ;;  %v1654_v27 = vld [vmem:[%s7147_s4 + $0x220] sm:$0xff] }
  0xc5   :  { %1530 = vmatprep.subr.bf16.mxu1 %v4801_v26  ;;  %v1647_v26 = vld [vmem:[%s7147_s4 + $0x1e8] sm:$0xff] }
  0xc8   :  { %1531 = vmatpush2.bf16.msra.mxu1 %v4799_v28  ;;  %v1646_v28 = vld [vmem:[%s7147_s4 + $0x1e0] sm:$0xff] }
  0xc9   :  { %1797 = vmatprep.subr.mxu1 %v1681_v8  ;;  %v1641_v8 = vld [vmem:[%s7147_s4 + $0x1b8] sm:$0xff] }
  0xca   :  { %4198 = vmatmul.mubr.msk.bf16.vlgmr.msra.gmra.mxu0 %vm1250_vm0, %v5494_v19  ;;  %v1610_v19 = vld [vmem:[%s7147_s4 + $0xc0] sm:$0xff] }
  0xcb   :  { %1533 = vmatmul.mubr.bf16.vlgmr.msra.gmra.mxu1 %v5676_v20  ;;  %1727 = vmatpush1.msra.mxu0 %v1616_v29  ;;  %v1611_v20 = vld [vmem:[%s7147_s4 + $0xc8] sm:$0xff]  ;;  %v1653_v29 = vld [vmem:[%s7147_s4 + $0x218] sm:$0xff] }
  0xcc   :  { %1728 = vmatprep.subr.mxu0 %v1615_v9  ;;  %1798 = vmatpush1.msra.mxu1 %v1680_v34  ;;  %v1645_v9 = vld [vmem:[%s7147_s4 + $0x1d8] sm:$0xff]  ;;  %v1712_v34 = vld [vmem:[%s7147_s4 + $0x3f0] sm:$0xff] }
  0xcd   :  { %1729 = vmatpush1.msra.mxu0 %v1614_v30  ;;  %1799 = vmatprep.subr.mxu1 %v1679_v35  ;;  %v1652_v30 = vld [vmem:[%s7147_s4 + $0x210] sm:$0xff] }
  0xce   :  { %1730 = vmatprep.subr.mxu0 %v1613_v52  ;;  %1800 = vmatpush1.msra.mxu1 %v1678_v36  ;;  %v1644_v52 = vld [vmem:[%s7147_s4 + $0x1d0] sm:$0xff]  ;;  %v1639_v36 = vld [vmem:[%s7147_s4 + $0x1a8] sm:$0xff] }
  0xcf   :  { %1731 = vmatpush1.msra.mxu0 %v1612_v31  ;;  %1801 = vmatprep.subr.mxu1 %v1677_v39  ;;  %v1651_v31 = vld [vmem:[%s7147_s4 + $0x208] sm:$0xff]  ;;  %v1640_v35 = vld [vmem:[%s7147_s4 + $0x1b0] sm:$0xff]  ;;  %v1638_v39 = vld [vmem:[%s7147_s4 + $0x1a0] sm:$0xff] }
  0xd0   :  { %1732 = vmatprep.subr.mxu0 %v1611_v20  ;;  %1802 = vmatpush1.msra.mxu1 %v1676_v41  ;;  %v1643_v20 = vld [vmem:[%s7147_s4 + $0x1c8] sm:$0xff]  ;;  %v1637_v41 = vld [vmem:[%s7147_s4 + $0x198] sm:$0xff] }
  0xd1   :  { %1733 = vmatpush1.msra.mxu0 %v1610_v19  ;;  %1803 = vmatprep.subr.mxu1 %v1675_v43  ;;  %v1650_v19 = vld [vmem:[%s7147_s4 + $0x200] sm:$0xff]  ;;  %v1636_v43 = vld [vmem:[%s7147_s4 + $0x190] sm:$0xff] }
  0xd2   :  { %1734 = vmatprep.subr.mxu0 %v1609_v32  ;;  %1804 = vmatpush1.msra.mxu1 %v1674_v45  ;;  %v1642_v32 = vld [vmem:[%s7147_s4 + $0x1c0] sm:$0xff]  ;;  %v1635_v45 = vld [vmem:[%s7147_s4 + $0x188] sm:$0xff] }
  0xd3   :  { %1735 = vmatpush1.msra.mxu0 %v1608_v33  ;;  %1805 = vmatprep.subr.mxu1 %v1673_v47  ;;  %v1713_v33 = vld [vmem:[%s7147_s4 + $0x3f8] sm:$0xff]  ;;  %v1634_v47 = vld [vmem:[%s7147_s4 + $0x180] sm:$0xff] }
  0xd4   :  { %1736 = vmatprep.subr.mxu0 %v1607_v37  ;;  %1806 = vmatpush1.msra.mxu1 %v1672_v49  ;;  %v1711_v37 = vld [vmem:[%s7147_s4 + $0x3e8] sm:$0xff]  ;;  %v1633_v49 = vld [vmem:[%s7147_s4 + $0x178] sm:$0xff] }
  0xd5   :  { %1737 = vmatpush1.msra.mxu0 %v1606_v38  ;;  %1807 = vmatprep.subr.mxu1 %v1671_v51  ;;  %v1710_v38 = vld [vmem:[%s7147_s4 + $0x3e0] sm:$0xff]  ;;  %v1632_v51 = vld [vmem:[%s7147_s4 + $0x170] sm:$0xff] }
  0xd6   :  { %1738 = vmatprep.subr.mxu0 %v1605_v40  ;;  %1808 = vmatpush1.msra.mxu1 %v1670_v54  ;;  %v1709_v40 = vld [vmem:[%s7147_s4 + $0x3d8] sm:$0xff]  ;;  %v1631_v54 = vld [vmem:[%s7147_s4 + $0x168] sm:$0xff] }
  0xd7   :  { %1739 = vmatpush1.msra.mxu0 %v1604_v42  ;;  %1809 = vmatprep.subr.mxu1 %v1669_v56  ;;  %v1708_v42 = vld [vmem:[%s7147_s4 + $0x3d0] sm:$0xff]  ;;  %v1630_v56 = vld [vmem:[%s7147_s4 + $0x160] sm:$0xff] }
  0xd8   :  { %1740 = vmatprep.subr.mxu0 %v1603_v44  ;;  %1810 = vmatpush1.msra.mxu1 %v1668_v58  ;;  %v1707_v44 = vld [vmem:[%s7147_s4 + $0x3c8] sm:$0xff]  ;;  %v1629_v58 = vld [vmem:[%s7147_s4 + $0x158] sm:$0xff] }
  0xd9   :  { %1741 = vmatpush1.msra.mxu0 %v1602_v46  ;;  %1811 = vmatprep.subr.mxu1 %v1667_v60  ;;  %v1706_v46 = vld [vmem:[%s7147_s4 + $0x3c0] sm:$0xff]  ;;  %v1628_v60 = vld [vmem:[%s7147_s4 + $0x150] sm:$0xff] }
  0xda   :  { %1742 = vmatprep.subr.mxu0 %v1601_v48  ;;  %1812 = vmatpush1.msra.mxu1 %v1666_v62  ;;  %v1705_v48 = vld [vmem:[%s7147_s4 + $0x3b8] sm:$0xff]  ;;  %v1627_v62 = vld [vmem:[%s7147_s4 + $0x148] sm:$0xff] }
  0xdb   :  { %1743 = vmatpush1.msra.mxu0 %v1600_v50  ;;  %1813 = vmatprep.subr.mxu1 %v1665_v0  ;;  %v1704_v50 = vld [vmem:[%s7147_s4 + $0x3b0] sm:$0xff]  ;;  %v1625_v0 = vld [vmem:[%s7147_s4 + $0x138] sm:$0xff] }
  0xdc   :  { %1744 = vmatprep.subr.mxu0 %v1599_v53  ;;  %1814 = vmatpush1.msra.mxu1 %v1664_v2  ;;  %v1703_v53 = vld [vmem:[%s7147_s4 + $0x3a8] sm:$0xff] }
  0xdd   :  { %1745 = vmatpush1.msra.mxu0 %v1598_v55  ;;  %1815 = vmatprep.subr.mxu1 %v1663_v4  ;;  %v1702_v55 = vld [vmem:[%s7147_s4 + $0x3a0] sm:$0xff]  ;;  %v1623_v2 = vld [vmem:[%s7147_s4 + $0x128] sm:$0xff] }
  0xde   :  { %1746 = vmatprep.subr.mxu0 %v1597_v57  ;;  %1816 = vmatpush1.msra.mxu1 %v1662_v6  ;;  %v1701_v57 = vld [vmem:[%s7147_s4 + $0x398] sm:$0xff]  ;;  %v1698_v6 = vld [vmem:[%s7147_s4 + $0x380] sm:$0xff] }
  0xdf   :  { %1747 = vmatpush1.msra.mxu0 %v1596_v59  ;;  %1817 = vmatprep.subr.mxu1 %v1661_v10  ;;  %v1700_v59 = vld [vmem:[%s7147_s4 + $0x390] sm:$0xff]  ;;  %v1697_v10 = vld [vmem:[%s7147_s4 + $0x378] sm:$0xff] }
  0xe0   :  { %1748 = vmatprep.subr.mxu0 %v1595_v61  ;;  %1818 = vmatpush1.msra.mxu1 %v1660_v12  ;;  %v1699_v61 = vld [vmem:[%s7147_s4 + $0x388] sm:$0xff] }
  0xe1   :  { %1749 = vmatpush1.msra.mxu0 %v1594_v63  ;;  %1819 = vmatprep.subr.mxu1 %v1659_v14  ;;  %v1626_v63 = vld [vmem:[%s7147_s4 + $0x140] sm:$0xff]  ;;  %v1696_v14 = vld [vmem:[%s7147_s4 + $0x370] sm:$0xff] }
  0xe2   :  { %1750 = vmatprep.subr.mxu0 %v1593_v1  ;;  %1820 = vmatpush1.msra.mxu1 %v1658_v17  ;;  %v1624_v1 = vld [vmem:[%s7147_s4 + $0x130] sm:$0xff]  ;;  %v1695_v17 = vld [vmem:[%s7147_s4 + $0x368] sm:$0xff] }
  0xe3   :  { %1751 = vmatpush1.msra.mxu0 %v1592_v3  ;;  %1821 = vmatprep.subr.mxu1 %v1657_v21 }
  0xe4   :  { %1752 = vmatprep.subr.mxu0 %v1591_v5  ;;  %1822 = vmatpush1.msra.mxu1 %v1656_v23  ;;  %v1622_v5 = vld [vmem:[%s7147_s4 + $0x120] sm:$0xff] }
  0xe5   :  { %1753 = vmatpush1.msra.mxu0 %v1590_v7  ;;  %1823 = vmatprep.subr.mxu1 %v1655_v25  ;;  %v1621_v7 = vld [vmem:[%s7147_s4 + $0x118] sm:$0xff]  ;;  %v1694_v23 = vld [vmem:[%s7147_s4 + $0x360] sm:$0xff] }
  0xe6   :  { %1754 = vmatprep.subr.mxu0 %v1589_v11  ;;  %1824 = vmatpush1.msra.mxu1 %v1654_v27  ;;  %v1692_v27 = vld [vmem:[%s7147_s4 + $0x350] sm:$0xff] }
  0xe7   :  { %1755 = vmatpush1.msra.mxu0 %v1588_v13  ;;  %1825 = vmatprep.subr.mxu1 %v1653_v29  ;;  %v1620_v13 = vld [vmem:[%s7147_s4 + $0x110] sm:$0xff] }
  0xe8   :  { %1756 = vmatprep.subr.mxu0 %v1587_v15  ;;  %1826 = vmatpush1.msra.mxu1 %v1652_v30  ;;  %v1619_v15 = vld [vmem:[%s7147_s4 + $0x108] sm:$0xff]  ;;  %v1689_v30 = vld [vmem:[%s7147_s4 + $0x338] sm:$0xff] }
  0xe9   :  { %1757 = vmatpush1.msra.mxu0 %v1586_v18  ;;  %1827 = vmatprep.subr.mxu1 %v1651_v31  ;;  %v1688_v31 = vld [vmem:[%s7147_s4 + $0x330] sm:$0xff] }
  0xea   :  { %1758 = vmatprep.subr.mxu0 %v1649_v22  ;;  %1828 = vmatpush1.msra.mxu1 %v1650_v19  ;;  %v1618_v22 = vld [vmem:[%s7147_s4 + $0x100] sm:$0xff] }
  0xeb   :  { %1759 = vmatpush2.msra.mxu0 %v1648_v24  ;;  %1829 = vmatprep.subr.mxu1 %v1713_v33  ;;  %v1693_v24 = vld [vmem:[%s7147_s4 + $0x358] sm:$0xff] }
  0xec   :  { %1760 = vmatprep.subr.mxu0 %v1647_v26  ;;  %1830 = vmatpush2.msra.mxu1 %v1712_v34  ;;  %v1685_v33 = vld [vmem:[%s7147_s4 + $0x318] sm:$0xff]  ;;  %v1684_v34 = vld [vmem:[%s7147_s4 + $0x310] sm:$0xff] }
  0xed   :  { %1761 = vmatpush2.msra.mxu0 %v1646_v28  ;;  %1831 = vmatprep.subr.mxu1 %v1711_v37  ;;  %v1691_v28 = vld [vmem:[%s7147_s4 + $0x348] sm:$0xff]  ;;  %v1682_v37 = vld [vmem:[%s7147_s4 + $0x300] sm:$0xff] }
  0xee   :  { %1762 = vmatprep.subr.mxu0 %v1645_v9  ;;  %1832 = vmatpush2.msra.mxu1 %v1710_v38  ;;  %v1690_v9 = vld [vmem:[%s7147_s4 + $0x340] sm:$0xff] }
  0xef   :  { %1763 = vmatpush2.msra.mxu0 %v1644_v52  ;;  %1833 = vmatprep.subr.mxu1 %v1709_v40  ;;  %v248_v40 = vld [vmem:[%s7148_s3] sm:$0xf] }
  0xf0   :  { %1764 = vmatprep.subr.mxu0 %v1643_v20  ;;  %1834 = vmatpush2.msra.mxu1 %v1708_v42  ;;  %v1687_v20 = vld [vmem:[%s7147_s4 + $0x328] sm:$0xff] }
  0xf1   :  { %1765 = vmatpush2.msra.mxu0 %v1642_v32  ;;  %1835 = vmatprep.subr.mxu1 %v1707_v44  ;;  %v1686_v32 = vld [vmem:[%s7147_s4 + $0x320] sm:$0xff] }
  0xf2   :  { %1766 = vmatprep.subr.mxu0 %v1641_v8  ;;  %1836 = vmatpush2.msra.mxu1 %v1706_v46 }
  0xf3   :  { %1767 = vmatpush2.msra.mxu0 %v1640_v35  ;;  %1837 = vmatprep.subr.mxu1 %v1705_v48  ;;  %v1683_v35 = vld [vmem:[%s7147_s4 + $0x308] sm:$0xff] }
  0xf4   :  { %1768 = vmatprep.subr.mxu0 %v1639_v36  ;;  %1838 = vmatpush2.msra.mxu1 %v1704_v50  ;;  %v250_v36 = vlaneseq }
  0xf5   :  { %1769 = vmatpush2.msra.mxu0 %v1638_v39  ;;  %1839 = vmatprep.subr.mxu1 %v1703_v53 }
  0xf6   :  { %1770 = vmatprep.subr.mxu0 %v1637_v41  ;;  %1840 = vmatpush2.msra.mxu1 %v1702_v55  ;;  %v6276_v38 = vshrl.u32 %v250_v36, 7  ;;  %v4825_v36 = vld [vmem:[%s7149_s6 + $0x8c] ss:$16 sps:$4 sm:$0xff]  }
  0xf7   :  { %1771 = vmatpush2.msra.mxu0 %v1636_v43  ;;  %1841 = vmatprep.subr.mxu1 %v1701_v57 }
  0xf8   :  { %1772 = vmatprep.subr.mxu0 %v1635_v45  ;;  %1842 = vmatpush2.msra.mxu1 %v1700_v59  ;;  %v6279_v39 = vsub.s32 0, %v6276_v38  ;;  %v6285_v41 = vsub.s32 1, %v6276_v38 }
  0xf9   :  { %1773 = vmatpush2.msra.mxu0 %v1634_v47  ;;  %1843 = vmatprep.subr.mxu1 %v1699_v61 }
  0xfa   :  { %1774 = vmatprep.subr.mxu0 %v1633_v49  ;;  %1844 = vmatpush2.msra.mxu1 %v1698_v6  ;;  %v253_v42 = vrot.slane %v248_v40, %v6279_v39  ;;  %v257_v43 = vrot.slane %v248_v40, %v6285_v41 }
  0xfb   :  { %1775 = vmatpush2.msra.mxu0 %v1632_v51  ;;  %1845 = vmatprep.subr.mxu1 %v1697_v10 }
  0xfc   :  { %1776 = vmatprep.subr.mxu0 %v1631_v54  ;;  %1846 = vmatpush2.msra.mxu1 %v1696_v14 }
  0xfd   :  { %1777 = vmatpush2.msra.mxu0 %v1630_v56  ;;  %1847 = vmatprep.subr.mxu1 %v1695_v17 }
  0xfe   :  { %1778 = vmatprep.subr.mxu0 %v1629_v58  ;;  %1848 = vmatpush2.msra.mxu1 %v1694_v23 }
  0xff   :  { %1779 = vmatpush2.msra.mxu0 %v1628_v60  ;;  %1849 = vmatprep.subr.mxu1 %v1693_v24 }
 0x100   :  { %1780 = vmatprep.subr.mxu0 %v1627_v62  ;;  %1850 = vmatpush2.msra.mxu1 %v1692_v27 }
 0x101   :  { %1781 = vmatpush2.msra.mxu0 %v1626_v63  ;;  %1851 = vmatprep.subr.mxu1 %v1691_v28  ;;  %v6293_v63 = vsub.s32 2, %v6276_v38  ;;  %v4802_v28 = vld [vmem:[%s7149_s6 + $0xe0] ss:$16 sps:$4 sm:$0xff]  }
 0x102   :  { %v6206_v3 = vpop.f32.mrf.mxu0  ;;  %1782 = vmatprep.subr.mxu0 %v1625_v0  ;;  %1852 = vmatpush2.msra.mxu1 %v1690_v9  ;;  %v6296_v0 = vsub.s32 3, %v6276_v38  ;;  %v4804_v9 = vld [vmem:[%s7149_s6 + $0xe4] ss:$16 sps:$4 sm:$0xff]  }
 0x103   :  { %v6208_v4 = vpop.f32.mrf.mxu1  ;;  %1783 = vmatpush2.msra.mxu0 %v1624_v1  ;;  %1853 = vmatprep.subr.mxu1 %v1689_v30  ;;  %v1289_v44 = vadd.f32 %v6206_v3, %v253_v42  ;;  %v4823_v42 = vld [vmem:[%s7149_s6 + $0x88] ss:$16 sps:$4 sm:$0xff]  }
 0x104   :  { %v1290_v11 = vpop.f32.mrf.mxu0  ;;  %1784 = vmatprep.subr.mxu0 %v1623_v2  ;;  %1854 = vmatpush2.msra.mxu1 %v1688_v31  ;;  %v261_v2 = vrot.slane %v248_v40, %v6293_v63  ;;  %v4807_v31 = vld [vmem:[%s7149_s6 + $0xec] ss:$16 sps:$4 sm:$0xff]  }
 0x105   :  { %v1331_v12 = vpop.f32.mrf.mxu1  ;;  %1785 = vmatpush2.msra.mxu0 %v1622_v5  ;;  %1855 = vmatprep.subr.mxu1 %v1687_v20  ;;  %v1291_v45 = vadd.f32 %v1290_v11, %v257_v43  ;;  %v1330_v46 = vadd.f32 %v6208_v4, %v1289_v44  ;;  %v265_v4 = vrot.slane %v248_v40, %v6296_v0  ;;  %v4810_v20 = vld [vmem:[%s7149_s6 + $0xc4] ss:$16 sps:$4 sm:$0xff]   ;;  %v4820_v40 = vld [vmem:[%s7149_s6 + $0x80] ss:$16 sps:$4 sm:$0xff]  }
 0x106   :  { %v1292_v18 = vpop.f32.mrf.mxu0  ;;  %1786 = vmatprep.subr.mxu0 %v1621_v7  ;;  %1856 = vmatpush2.msra.mxu1 %v1686_v32  ;;  %v4808_v32 = vld [vmem:[%s7149_s6 + $0xc0] ss:$16 sps:$4 sm:$0xff]   ;;  %v4828_v43 = vld [vmem:[%s7149_s6 + $0x64] ss:$16 sps:$4 sm:$0xff]  }
 0x107   :  { %v1333_v21 = vpop.f32.mrf.mxu1  ;;  %1787 = vmatpush2.msra.mxu0 %v1620_v13  ;;  %1857 = vmatprep.subr.mxu1 %v1685_v33  ;;  %v1332_v48 = vadd.f32 %v1331_v12, %v1291_v45  ;;  %v4811_v33 = vld [vmem:[%s7149_s6 + $0xc8] ss:$16 sps:$4 sm:$0xff]   ;;  %v4826_v44 = vld [vmem:[%s7149_s6 + $0x60] ss:$16 sps:$4 sm:$0xff]  }
 0x108   :  { %v1293_v25 = vpop.f32.mrf.mxu0  ;;  %1788 = vmatprep.subr.mxu0 %v1619_v15  ;;  %1858 = vmatpush2.msra.mxu1 %v1684_v34  ;;  %v4814_v34 = vld [vmem:[%s7149_s6 + $0xa0] ss:$16 sps:$4 sm:$0xff]   ;;  %v4829_v45 = vld [vmem:[%s7149_s6 + $0x68] ss:$16 sps:$4 sm:$0xff]  }
 0x109   :  { %v1334_v26 = vpop.f32.mrf.mxu1  ;;  %1789 = vmatpush2.msra.mxu0 %v1618_v22  ;;  %1859 = vmatprep.subr.mxu1 %v1683_v35  ;;  %v4817_v35 = vld [vmem:[%s7149_s6 + $0xa8] ss:$16 sps:$4 sm:$0xff]  }
 0x10a   :  { %1860 = vmatpush2.msra.mxu1 %v1682_v37  ;;  %2089 = vmatprep.subr.bf16.mxu0 %v4804_v9  ;;  %v4822_v37 = vld [vmem:[%s7149_s6 + $0x84] ss:$16 sps:$4 sm:$0xff]   ;;  %v4867_v9 = vld [vmem:[%s7150_s8 + $0x49c] ss:$28 sps:$4 sm:$0xff]  }
 0x10b   :  { %v1411_v29 = vpop.f32.mrf.mxu1  ;;  %2130 = vmatprep.subr.bf16.mxu1 %v4807_v31  ;;  %v4870_v31 = vld [vmem:[%s7150_s8 + $0xe4] ss:$28 sps:$4 sm:$0xff]  }
 0x10d   :  { %v1413_v52 = vpop.f32.mrf.mxu1 }
 0x10f   :  { %v1415_v19 = vpop.f32.mrf.mxu1 }
 0x110   :  { %v4813_v19 = vld [vmem:[%s7149_s6 + $0xcc] ss:$16 sps:$4 sm:$0xff]  }
 0x111   :  { %v1416_v8 = vpop.f32.mrf.mxu1 }
 0x112   :  { %v4819_v8 = vld [vmem:[%s7149_s6 + $0xac] ss:$16 sps:$4 sm:$0xff]  }
 0x142   :  { %v1370_v47 = vpop.f32.mrf.mxu0 }
 0x143   :  { %v1371_v49 = vadd.f32 %v1370_v47, %v1330_v46  ;;  %v4831_v46 = vld [vmem:[%s7149_s6 + $0x6c] ss:$16 sps:$4 sm:$0xff]   ;;  %v4834_v47 = vld [vmem:[%s7149_s6 + $0x44] ss:$16 sps:$4 sm:$0xff]  }
 0x144   :  { %v1372_v50 = vpop.f32.mrf.mxu0 }
 0x145   :  { %v1373_v51 = vadd.f32 %v1372_v50, %v1332_v48  ;;  %v1412_v53 = vadd.f32 %v1411_v29, %v1371_v49  ;;  %v4837_v48 = vld [vmem:[%s7149_s6 + $0x4c] ss:$16 sps:$4 sm:$0xff]   ;;  %v4832_v49 = vld [vmem:[%s7149_s6 + $0x40] ss:$16 sps:$4 sm:$0xff]   ;;  %v4835_v50 = vld [vmem:[%s7149_s6 + $0x48] ss:$16 sps:$4 sm:$0xff]  }
 0x146   :  { %v1374_v54 = vpop.f32.mrf.mxu0 }
 0x147   :  { %v1414_v55 = vadd.f32 %v1413_v52, %v1373_v51  ;;  %v1582_v58 = vmax.f32 %v1412_v53, 0.0  ;;  %v4805_v52 = vld [vmem:[%s7149_s6 + $0xe8] ss:$16 sps:$4 sm:$0xff]   ;;  %v4840_v51 = vld [vmem:[%s7149_s6 + $0x24] ss:$16 sps:$4 sm:$0xff]  }
 0x148   :  { %v1375_v56 = vpop.f32.mrf.mxu0  ;;  %v4843_v53 = vld [vmem:[%s7149_s6 + $0x2c] ss:$16 sps:$4 sm:$0xff]   ;;  %v4838_v54 = vld [vmem:[%s7149_s6 + $0x20] ss:$16 sps:$4 sm:$0xff]  }
 0x149   :  { %v1583_v57 = vmax.f32 %v1414_v55, 0.0  ;;  %v4841_v55 = vld [vmem:[%s7149_s6 + $0x28] ss:$16 sps:$4 sm:$0xff]   ;;  %v4846_v56 = vld [vmem:[%s7149_s6 + $0x4] ss:$16 sps:$4 sm:$0xff]  }
 0x14b   :  { %v1452_v59 = vpop.f32.mrf.mxu1  ;;  %1790 = vmatprep.mubr.f32.mxu0 %v1583_v57  ;;  %v4849_v57 = vld [vmem:[%s7149_s6 + $0xc] ss:$16 sps:$4 sm:$0xff]  }
 0x14c   :  { %1791 = vmatmul.mubr.f32.vlgmr.msra.gmra.mxu0 %v1582_v58  ;;  %v1453_v6 = vadd.f32 %v1452_v59, %v261_v2  ;;  %v4844_v58 = vld [vmem:[%s7149_s6] ss:$16 sps:$4 sm:$0xff]   ;;  %v4847_v59 = vld [vmem:[%s7149_s6 + $0x8] ss:$16 sps:$4 sm:$0xff]  }
 0x14d   :  { %v1454_v60 = vpop.f32.mrf.mxu1  ;;  %2121 = vmatprep.mubr.bf16.mxu0 %v5186_v16  ;;  %2090 = vmatpush1.bf16.msra.mxu0 %v4802_v28  ;;  %v4859_v28 = vld [vmem:[%s7150_s8 + $0x4d0] ss:$28 sps:$4 sm:$0xff]  }
 0x14e   :  { %v1455_v10 = vadd.f32 %v1454_v60, %v265_v4  ;;  %2091 = vmatprep.subr.bf16.mxu0 %v4810_v20  ;;  %v4852_v60 = vld [vmem:[%s7150_s8 + $0x18c] ss:$28 sps:$4 sm:$0xff]   ;;  %v4873_v20 = vld [vmem:[%s7150_s8 + $0x464] ss:$28 sps:$4 sm:$0xff]  }
 0x14f   :  { %v1456_v61 = vpop.f32.mrf.mxu1 }
 0x150   :  { %v4855_v61 = vld [vmem:[%s7150_s8 + $0x50c] ss:$28 sps:$4 sm:$0xff]  }
 0x151   :  { %v1457_v62 = vpop.f32.mrf.mxu1  ;;  %2092 = vmatpush1.bf16.msra.mxu0 %v4808_v32  ;;  %v4871_v32 = vld [vmem:[%s7150_s8 + $0x460] ss:$28 sps:$4 sm:$0xff]  }
 0x152   :  { %v1714_v62 = vld [vmem:[%s7151_s5] sm:$0x3] }
 0x153   :  { %v1719_v2 = vrot.slane %v1714_v62, %v6279_v39 }
 0x182   :  { %v1493_v1 = vpop.f32.mrf.mxu0 }
 0x183   :  { %v1494_v11 = vadd.f32 %v1493_v1, %v1453_v6 }
 0x184   :  { %v1495_v3 = vpop.f32.mrf.mxu0 }
 0x185   :  { %v1496_v14 = vadd.f32 %v1495_v3, %v1455_v10  ;;  %v1723_v3 = vrot.slane %v1714_v62, %v6285_v41  ;;  %v4913_v62 = vld [vmem:[%s7150_s8 + $0x658] ss:$28 sps:$4 sm:$0xff]  }
 0x186   :  { %v1497_v5 = vpop.f32.mrf.mxu0 }
 0x188   :  { %v1498_v7 = vpop.f32.mrf.mxu0 }
 0x18a   :  { %v1575_v13 = vpop.f32.mrf.mxu0 }
 0x18b   :  { %v1534_v12 = vpop.f32.mrf.mxu1 }
 0x18c   :  { %v1535_v15 = vadd.f32 %v1534_v12, %v1494_v11  ;;  %v1577_v18 = vpop.f32.mrf.mxu0 }
 0x18d   :  { %v1536_v17 = vpop.f32.mrf.mxu1 }
 0x18e   :  { %v1537_v21 = vadd.f32 %v1536_v17, %v1496_v14  ;;  %v1576_v22 = vadd.f32 %v1575_v13, %v1535_v15  ;;  %v1579_v24 = vpop.f32.mrf.mxu0  ;;  %v1871_v15 = vld [vmem:[%s7153_s1] sm:$0xff] }
 0x18f   :  { %v1538_v23 = vpop.f32.mrf.mxu1 }
 0x190   :  { %v1578_v25 = vadd.f32 %v1577_v18, %v1537_v21  ;;  %v1580_v27 = vpop.f32.mrf.mxu0  ;;  %v1584_v30 = vmax.f32 %v1576_v22, 0.0  ;;  %v4850_v22 = vld [vmem:[%s7150_s8 + $0x188] ss:$28 sps:$4 sm:$0xff]  }
 0x191   :  { %v1539_v26 = vpop.f32.mrf.mxu1  ;;  %v4853_v23 = vld [vmem:[%s7150_s8 + $0x508] ss:$28 sps:$4 sm:$0xff]   ;;  %v4856_v27 = vld [vmem:[%s7150_s8 + $0x150] ss:$28 sps:$4 sm:$0xff]  }
 0x192   :  { %v1585_v29 = vmax.f32 %v1578_v25, 0.0  ;;  %v4858_v25 = vld [vmem:[%s7150_s8 + $0x154] ss:$28 sps:$4 sm:$0xff]  }
 0x193   :  { %v4861_v26 = vld [vmem:[%s7150_s8 + $0x4d4] ss:$28 sps:$4 sm:$0xff]  }
 0x194   :  { %1861 = vmatprep.mubr.f32.mxu1 %v1585_v29  ;;  %v4864_v29 = vld [vmem:[%s7150_s8 + $0x11c] ss:$28 sps:$4 sm:$0xff]  }
 0x195   :  { %1862 = vmatmul.mubr.f32.vlgmr.msra.gmra.mxu1 %v1584_v30  ;;  %v4862_v30 = vld [vmem:[%s7150_s8 + $0x118] ss:$28 sps:$4 sm:$0xff]  }
 0x196   :  { %2131 = vmatpush1.bf16.msra.mxu1 %v4805_v52  ;;  %2162 = vmatprep.mubr.bf16.mxu1 %v5186_v16  ;;  %v4816_v16 = vld [vmem:[%s7149_s6 + $0xa4] ss:$16 sps:$4 sm:$0xff]  }
 0x197   :  { %2132 = vmatprep.subr.bf16.mxu1 %v4813_v19  ;;  %2093 = vmatprep.subr.bf16.mxu0 %v4816_v16  ;;  %v4865_v52 = vld [vmem:[%s7150_s8 + $0x498] ss:$28 sps:$4 sm:$0xff]   ;;  %v4868_v19 = vld [vmem:[%s7150_s8 + $0xe0] ss:$28 sps:$4 sm:$0xff]   ;;  %v4879_v16 = vld [vmem:[%s7150_s8 + $0x42c] ss:$28 sps:$4 sm:$0xff]  }
 0x198   :  { %2094 = vmatpush1.bf16.msra.mxu0 %v4814_v34  ;;  %v4877_v34 = vld [vmem:[%s7150_s8 + $0x428] ss:$28 sps:$4 sm:$0xff]  }
 0x199   :  { %2095 = vmatprep.subr.bf16.mxu0 %v4822_v37  ;;  %v4885_v37 = vld [vmem:[%s7150_s8 + $0x3f4] ss:$28 sps:$4 sm:$0xff]  }
 0x19a   :  { %2133 = vmatpush1.bf16.msra.mxu1 %v4811_v33  ;;  %v4876_v33 = vld [vmem:[%s7150_s8 + $0xac] ss:$28 sps:$4 sm:$0xff]  }
 0x19b   :  { %2134 = vmatprep.subr.bf16.mxu1 %v4819_v8  ;;  %v4874_v8 = vld [vmem:[%s7150_s8 + $0xa8] ss:$28 sps:$4 sm:$0xff]  }
 0x19c   :  { %2096 = vmatpush1.bf16.msra.mxu0 %v4820_v40  ;;  %v4883_v40 = vld [vmem:[%s7150_s8 + $0x3f0] ss:$28 sps:$4 sm:$0xff]  }
 0x19d   :  { %2097 = vmatprep.subr.bf16.mxu0 %v4828_v43  ;;  %v4891_v43 = vld [vmem:[%s7150_s8 + $0x3bc] ss:$28 sps:$4 sm:$0xff]  }
 0x19e   :  { %2135 = vmatpush1.bf16.msra.mxu1 %v4817_v35  ;;  %v4882_v35 = vld [vmem:[%s7150_s8 + $0x74] ss:$28 sps:$4 sm:$0xff]  }
 0x19f   :  { %2136 = vmatprep.subr.bf16.mxu1 %v4825_v36  ;;  %v4880_v36 = vld [vmem:[%s7150_s8 + $0x70] ss:$28 sps:$4 sm:$0xff]  }
 0x1a0   :  { %2098 = vmatpush1.bf16.msra.mxu0 %v4826_v44  ;;  %v4886_v44 = vld [vmem:[%s7150_s8 + $0x38] ss:$28 sps:$4 sm:$0xff]  }
 0x1a1   :  { %2099 = vmatprep.subr.bf16.mxu0 %v4834_v47  ;;  %v4897_v47 = vld [vmem:[%s7150_s8 + $0x384] ss:$28 sps:$4 sm:$0xff]  }
 0x1a2   :  { %2137 = vmatpush1.bf16.msra.mxu1 %v4823_v42  ;;  %v4888_v42 = vld [vmem:[%s7150_s8 + $0x3c] ss:$28 sps:$4 sm:$0xff]  }
 0x1a3   :  { %2138 = vmatprep.subr.bf16.mxu1 %v4831_v46  ;;  %v4894_v46 = vld [vmem:[%s7150_s8 + $0x4] ss:$28 sps:$4 sm:$0xff]  }
 0x1a4   :  { %2100 = vmatpush1.bf16.msra.mxu0 %v4832_v49  ;;  %v4895_v49 = vld [vmem:[%s7150_s8 + $0x380] ss:$28 sps:$4 sm:$0xff]  }
 0x1a5   :  { %2101 = vmatprep.subr.bf16.mxu0 %v4840_v51  ;;  %v4903_v51 = vld [vmem:[%s7150_s8 + $0x6cc] ss:$28 sps:$4 sm:$0xff]  }
 0x1a6   :  { %2139 = vmatpush1.bf16.msra.mxu1 %v4829_v45  ;;  %v4889_v45 = vld [vmem:[%s7150_s8 + $0x3b8] ss:$28 sps:$4 sm:$0xff]  }
 0x1a7   :  { %2140 = vmatprep.subr.bf16.mxu1 %v4837_v48  ;;  %v4892_v48 = vld [vmem:[%s7150_s8] ss:$28 sps:$4 sm:$0xff]  }
 0x1a8   :  { %2102 = vmatpush1.bf16.msra.mxu0 %v4838_v54  ;;  %v4901_v54 = vld [vmem:[%s7150_s8 + $0x6c8] ss:$28 sps:$4 sm:$0xff]  }
 0x1a9   :  { %2103 = vmatprep.subr.bf16.mxu0 %v4846_v56  ;;  %v4909_v56 = vld [vmem:[%s7150_s8 + $0x694] ss:$28 sps:$4 sm:$0xff]  }
 0x1aa   :  { %2141 = vmatpush1.bf16.msra.mxu1 %v4835_v50  ;;  %v4900_v50 = vld [vmem:[%s7150_s8 + $0x34c] ss:$28 sps:$4 sm:$0xff]  }
 0x1ab   :  { %2142 = vmatprep.subr.bf16.mxu1 %v4843_v53  ;;  %v4898_v53 = vld [vmem:[%s7150_s8 + $0x348] ss:$28 sps:$4 sm:$0xff]  }
 0x1ac   :  { %2104 = vmatpush1.bf16.msra.mxu0 %v4844_v58  ;;  %v4907_v58 = vld [vmem:[%s7150_s8 + $0x690] ss:$28 sps:$4 sm:$0xff]  }
 0x1ad   :  { %3624 = vmatprep.subr.bf16.mxu0 %v4852_v60  ;;  %v4915_v60 = vld [vmem:[%s7150_s8 + $0x65c] ss:$28 sps:$4 sm:$0xff]  }
 0x1ae   :  { %2143 = vmatpush1.bf16.msra.mxu1 %v4841_v55  ;;  %v4906_v55 = vld [vmem:[%s7150_s8 + $0x314] ss:$28 sps:$4 sm:$0xff]  }
 0x1af   :  { %2144 = vmatprep.subr.bf16.mxu1 %v4849_v57  ;;  %v4904_v57 = vld [vmem:[%s7150_s8 + $0x310] ss:$28 sps:$4 sm:$0xff]  }
 0x1b2   :  { %2145 = vmatpush1.bf16.msra.mxu1 %v4847_v59  ;;  %v4912_v59 = vld [vmem:[%s7150_s8 + $0x2dc] ss:$28 sps:$4 sm:$0xff]  }
 0x1b3   :  { %3665 = vmatprep.subr.bf16.mxu1 %v4855_v61  ;;  %v4910_v61 = vld [vmem:[%s7150_s8 + $0x2d8] ss:$28 sps:$4 sm:$0xff]  }
 0x20c   :  { %v1792_v1 = vpop.f32.mrf.mxu0 }
 0x20d   :  { %v1793_v5 = vadd.f32 %v1792_v1, %v1719_v2  ;;  %v4918_v1 = vld [vmem:[%s7150_s8 + $0x2a4] ss:$28 sps:$4 sm:$0xff]  }
 0x20e   :  { %v1794_v4 = vpop.f32.mrf.mxu0  ;;  %v4921_v2 = vld [vmem:[%s7150_s8 + $0x624] ss:$28 sps:$4 sm:$0xff]  }
 0x20f   :  { %v1795_v7 = vadd.f32 %v1794_v4, %v1723_v3  ;;  %v4916_v3 = vld [vmem:[%s7150_s8 + $0x2a0] ss:$28 sps:$4 sm:$0xff]  }
 0x210   :  { %v4919_v4 = vld [vmem:[%s7150_s8 + $0x620] ss:$28 sps:$4 sm:$0xff]  }
 0x255   :  { %v1863_v6 = vpop.f32.mrf.mxu1 }
 0x256   :  { %v1864_v10 = vadd.f32 %v1863_v6, %v1793_v5  ;;  %v4924_v5 = vld [vmem:[%s7150_s8 + $0x26c] ss:$28 sps:$4 sm:$0xff]  }
 0x257   :  { %v1865_v11 = vpop.f32.mrf.mxu1  ;;  %v4927_v6 = vld [vmem:[%s7150_s8 + $0x5ec] ss:$28 sps:$4 sm:$0xff]  }
 0x258   :  { %3991 = vst [vmem:[%s7152_s11] sm:$0xff] %v1864_v10  ;;  %v1866_v12 = vadd.f32 %v1865_v11, %v1795_v7  ;;  %v4922_v7 = vld [vmem:[%s7150_s8 + $0x268] ss:$28 sps:$4 sm:$0xff]   ;;  %v4930_v11 = vld [vmem:[%s7150_s8 + $0x234] ss:$28 sps:$4 sm:$0xff]  }
 0x25a   :  { %v1868_v13 = vmul.f32 0.5, %v1866_v12  ;;  %3992 = vst [vmem:[%s7152_s11 + $0x8] sm:$0xff] %v1866_v12  ;;  %v4933_v12 = vld [vmem:[%s7150_s8 + $0x5b4] ss:$28 sps:$4 sm:$0xff]  }
 0x25c   :  { %v1869_v14 = vmul.f32 1.442695, %v1868_v13  ;;  %v4928_v13 = vld [vmem:[%s7150_s8 + $0x230] ss:$28 sps:$4 sm:$0xff]  }
 0x25e   :  { %5170 = vpow2.f32 %v1869_v14  ;;  %v4931_v14 = vld [vmem:[%s7150_s8 + $0x5b0] ss:$28 sps:$4 sm:$0xff]  }
 0x26b   :  { %v5171_v17 = vpop.eup %5170 }
 0x26c   :  { %v1872_v18 = vmul.f32 %v5171_v17, %v1871_v15  ;;  %v4936_v15 = vld [vmem:[%s7150_s8 + $0x1fc] ss:$28 sps:$4 sm:$0xff]  }
 0x26d   :  { %v4939_v17 = vld [vmem:[%s7150_s8 + $0x57c] ss:$28 sps:$4 sm:$0xff]  }
 0x26e   :  { %v1873_v21 = vadd.f32 %v1872_v18, %v1864_v10  ;;  %v4925_v10 = vld [vmem:[%s7150_s8 + $0x5e8] ss:$28 sps:$4 sm:$0xff]   ;;  %v4934_v18 = vld [vmem:[%s7150_s8 + $0x1f8] ss:$28 sps:$4 sm:$0xff]  }
 0x270   :  { %v1874_v24 = vpack.c.bf16 %v1873_v21, %v1873_v21  ;;  %v4937_v21 = vld [vmem:[%s7150_s8 + $0x578] ss:$28 sps:$4 sm:$0xff]  }
 0x272   :  { %2122 = vmatmul.mubr.bf16.vlgmr.msra.gmra.mxu0 %v1874_v24  ;;  %2163 = vmatmul.mubr.bf16.vlgmr.msra.gmra.mxu1 %v1874_v24  ;;  %v4940_v24 = vld [vmem:[%s7150_s8 + $0x1c0] ss:$28 sps:$4 sm:$0xff]  }
 0x273   :  { %3625 = vmatpush1.bf16.msra.mxu0 %v4850_v22  ;;  %3666 = vmatpush1.bf16.msra.mxu1 %v4853_v23  ;;  %v4942_v22 = vld [vmem:[%s7150_s8 + $0x1c4] ss:$28 sps:$4 sm:$0xff]  }
 0x274   :  { %3626 = vmatprep.subr.bf16.mxu0 %v4858_v25  ;;  %3667 = vmatprep.subr.bf16.mxu1 %v4861_v26  ;;  %v4945_v23 = vld [vmem:[%s7150_s8 + $0x544] ss:$28 sps:$4 sm:$0xff]   ;;  %v4948_v26 = vld [vmem:[%s7150_s8 + $0x194] ss:$28 sps:$4 sm:$0xff]  }
 0x275   :  { %v4943_v25 = vld [vmem:[%s7150_s8 + $0x540] ss:$28 sps:$4 sm:$0xff]  }
 0x277   :  { %3627 = vmatpush1.bf16.msra.mxu0 %v4856_v27  ;;  %3668 = vmatpush1.bf16.msra.mxu1 %v4859_v28  ;;  %v4951_v27 = vld [vmem:[%s7150_s8 + $0x514] ss:$28 sps:$4 sm:$0xff]   ;;  %v1907_v28 = vld [vmem:[%s7154_s7] sm:$0xf] }
 0x278   :  { %3628 = vmatprep.subr.bf16.mxu0 %v4864_v29  ;;  %3669 = vmatprep.subr.bf16.mxu1 %v4867_v9  ;;  %v1912_v29 = vrot.slane %v1907_v28, %v6279_v39  ;;  %v1920_v9 = vrot.slane %v1907_v28, %v6293_v63 }
 0x27b   :  { %3629 = vmatpush1.bf16.msra.mxu0 %v4862_v30  ;;  %3670 = vmatpush1.bf16.msra.mxu1 %v4865_v52  ;;  %v1916_v30 = vrot.slane %v1907_v28, %v6285_v41  ;;  %v1924_v52 = vrot.slane %v1907_v28, %v6296_v0  ;;  %v5002_v28 = vld [vmem:[%s7150_s8 + $0x31c] ss:$28 sps:$4 sm:$0xff]  }
 0x27c   :  { %3630 = vmatprep.subr.bf16.mxu0 %v4870_v31  ;;  %3671 = vmatprep.subr.bf16.mxu1 %v4873_v20 }
 0x27f   :  { %3631 = vmatpush1.bf16.msra.mxu0 %v4868_v19  ;;  %3672 = vmatpush1.bf16.msra.mxu1 %v4871_v32 }
 0x280   :  { %3632 = vmatprep.subr.bf16.mxu0 %v4876_v33  ;;  %3673 = vmatprep.subr.bf16.mxu1 %v4879_v16 }
 0x283   :  { %3633 = vmatpush1.bf16.msra.mxu0 %v4874_v8  ;;  %3674 = vmatpush1.bf16.msra.mxu1 %v4877_v34 }
 0x284   :  { %3634 = vmatprep.subr.bf16.mxu0 %v4882_v35  ;;  %3675 = vmatprep.subr.bf16.mxu1 %v4885_v37 }
 0x287   :  { %3635 = vmatpush1.bf16.msra.mxu0 %v4880_v36  ;;  %3676 = vmatpush1.bf16.msra.mxu1 %v4883_v40 }
 0x288   :  { %3636 = vmatprep.subr.bf16.mxu0 %v4888_v42  ;;  %3677 = vmatprep.subr.bf16.mxu1 %v4891_v43 }
 0x28b   :  { %3637 = vmatpush1.bf16.msra.mxu0 %v4886_v44  ;;  %3678 = vmatpush1.bf16.msra.mxu1 %v4889_v45 }
 0x28c   :  { %3638 = vmatprep.subr.bf16.mxu0 %v4894_v46  ;;  %3679 = vmatprep.subr.bf16.mxu1 %v4897_v47 }
 0x28f   :  { %3639 = vmatpush1.bf16.msra.mxu0 %v4892_v48  ;;  %3680 = vmatpush1.bf16.msra.mxu1 %v4895_v49  ;;  %v4946_v48 = vld [vmem:[%s7150_s8 + $0x190] ss:$28 sps:$4 sm:$0xff]  }
 0x290   :  { %3640 = vmatprep.subr.bf16.mxu0 %v4900_v50  ;;  %3681 = vmatprep.subr.bf16.mxu1 %v4903_v51  ;;  %v4949_v49 = vld [vmem:[%s7150_s8 + $0x510] ss:$28 sps:$4 sm:$0xff]  }
 0x293   :  { %3641 = vmatpush2.bf16.msra.mxu0 %v4898_v53  ;;  %3682 = vmatpush2.bf16.msra.mxu1 %v4901_v54  ;;  %v4954_v53 = vld [vmem:[%s7150_s8 + $0x15c] ss:$28 sps:$4 sm:$0xff]  }
 0x294   :  { %3642 = vmatprep.subr.bf16.mxu0 %v4906_v55  ;;  %3683 = vmatprep.subr.bf16.mxu1 %v4909_v56  ;;  %v4957_v54 = vld [vmem:[%s7150_s8 + $0x4dc] ss:$28 sps:$4 sm:$0xff]  }
 0x295   :  { %v4952_v55 = vld [vmem:[%s7150_s8 + $0x158] ss:$28 sps:$4 sm:$0xff]  }
 0x296   :  { %v4955_v56 = vld [vmem:[%s7150_s8 + $0x4d8] ss:$28 sps:$4 sm:$0xff]  }
 0x297   :  { %3643 = vmatpush2.bf16.msra.mxu0 %v4904_v57  ;;  %3684 = vmatpush2.bf16.msra.mxu1 %v4907_v58  ;;  %v4960_v57 = vld [vmem:[%s7150_s8 + $0x124] ss:$28 sps:$4 sm:$0xff]  }
 0x298   :  { %3644 = vmatprep.subr.bf16.mxu0 %v4912_v59  ;;  %3685 = vmatprep.subr.bf16.mxu1 %v4915_v60  ;;  %v4963_v58 = vld [vmem:[%s7150_s8 + $0x4a4] ss:$28 sps:$4 sm:$0xff]  }
 0x299   :  { %v4958_v59 = vld [vmem:[%s7150_s8 + $0x120] ss:$28 sps:$4 sm:$0xff]  }
 0x29a   :  { %v4961_v60 = vld [vmem:[%s7150_s8 + $0x4a0] ss:$28 sps:$4 sm:$0xff]  }
 0x29b   :  { %3645 = vmatpush2.bf16.msra.mxu0 %v4910_v61  ;;  %3686 = vmatpush2.bf16.msra.mxu1 %v4913_v62  ;;  %v4966_v61 = vld [vmem:[%s7150_s8 + $0xec] ss:$28 sps:$4 sm:$0xff]  }
 0x29c   :  { %3646 = vmatprep.subr.bf16.mxu0 %v4918_v1  ;;  %3687 = vmatprep.subr.bf16.mxu1 %v4921_v2  ;;  %v4969_v62 = vld [vmem:[%s7150_s8 + $0x46c] ss:$28 sps:$4 sm:$0xff]  }
 0x29d   :  { %v4964_v1 = vld [vmem:[%s7150_s8 + $0xe8] ss:$28 sps:$4 sm:$0xff]  }
 0x29e   :  { %v4967_v2 = vld [vmem:[%s7150_s8 + $0x468] ss:$28 sps:$4 sm:$0xff]  }
 0x29f   :  { %3647 = vmatpush2.bf16.msra.mxu0 %v4916_v3  ;;  %3688 = vmatpush2.bf16.msra.mxu1 %v4919_v4  ;;  %v4972_v3 = vld [vmem:[%s7150_s8 + $0xb4] ss:$28 sps:$4 sm:$0xff]  }
 0x2a0   :  { %3648 = vmatprep.subr.bf16.mxu0 %v4924_v5  ;;  %3689 = vmatprep.subr.bf16.mxu1 %v4927_v6  ;;  %v4975_v4 = vld [vmem:[%s7150_s8 + $0x434] ss:$28 sps:$4 sm:$0xff]  }
 0x2a1   :  { %v4970_v5 = vld [vmem:[%s7150_s8 + $0xb0] ss:$28 sps:$4 sm:$0xff]  }
 0x2a2   :  { %v4973_v6 = vld [vmem:[%s7150_s8 + $0x430] ss:$28 sps:$4 sm:$0xff]  }
 0x2a3   :  { %3649 = vmatpush2.bf16.msra.mxu0 %v4922_v7  ;;  %3690 = vmatpush2.bf16.msra.mxu1 %v4925_v10  ;;  %v4978_v7 = vld [vmem:[%s7150_s8 + $0x7c] ss:$28 sps:$4 sm:$0xff]  }
 0x2a4   :  { %3650 = vmatprep.subr.bf16.mxu0 %v4930_v11  ;;  %3691 = vmatprep.subr.bf16.mxu1 %v4933_v12  ;;  %v4981_v10 = vld [vmem:[%s7150_s8 + $0x3fc] ss:$28 sps:$4 sm:$0xff]  }
 0x2a5   :  { %v4976_v11 = vld [vmem:[%s7150_s8 + $0x78] ss:$28 sps:$4 sm:$0xff]  }
 0x2a6   :  { %v4979_v12 = vld [vmem:[%s7150_s8 + $0x3f8] ss:$28 sps:$4 sm:$0xff]  }
 0x2a7   :  { %3651 = vmatpush2.bf16.msra.mxu0 %v4928_v13  ;;  %3692 = vmatpush2.bf16.msra.mxu1 %v4931_v14  ;;  %v4984_v13 = vld [vmem:[%s7150_s8 + $0x44] ss:$28 sps:$4 sm:$0xff]  }
 0x2a8   :  { %3652 = vmatprep.subr.bf16.mxu0 %v4936_v15  ;;  %3693 = vmatprep.subr.bf16.mxu1 %v4939_v17  ;;  %v4987_v14 = vld [vmem:[%s7150_s8 + $0x3c4] ss:$28 sps:$4 sm:$0xff]  }
 0x2a9   :  { %v4982_v15 = vld [vmem:[%s7150_s8 + $0x40] ss:$28 sps:$4 sm:$0xff]  }
 0x2aa   :  { %v4985_v17 = vld [vmem:[%s7150_s8 + $0x3c0] ss:$28 sps:$4 sm:$0xff]  }
 0x2ab   :  { %3653 = vmatpush2.bf16.msra.mxu0 %v4934_v18  ;;  %3694 = vmatpush2.bf16.msra.mxu1 %v4937_v21  ;;  %v4990_v18 = vld [vmem:[%s7150_s8 + $0xc] ss:$28 sps:$4 sm:$0xff]  }
 0x2ac   :  { %3654 = vmatprep.subr.bf16.mxu0 %v4942_v22  ;;  %3695 = vmatprep.subr.bf16.mxu1 %v4945_v23  ;;  %v4993_v21 = vld [vmem:[%s7150_s8 + $0x38c] ss:$28 sps:$4 sm:$0xff]  }
 0x2ad   :  { %v4988_v22 = vld [vmem:[%s7150_s8 + $0x8] ss:$28 sps:$4 sm:$0xff]  }
 0x2ae   :  { %v4991_v23 = vld [vmem:[%s7150_s8 + $0x388] ss:$28 sps:$4 sm:$0xff]  }
 0x2af   :  { %3655 = vmatpush2.bf16.msra.mxu0 %v4940_v24  ;;  %3696 = vmatpush2.bf16.msra.mxu1 %v4943_v25  ;;  %v4996_v24 = vld [vmem:[%s7150_s8 + $0x354] ss:$28 sps:$4 sm:$0xff]  }
 0x2b0   :  { %3706 = vmatprep.subr.bf16.mxu0 %v4948_v26  ;;  %3747 = vmatprep.subr.bf16.mxu1 %v4951_v27  ;;  %v4999_v25 = vld [vmem:[%s7150_s8 + $0x6d4] ss:$28 sps:$4 sm:$0xff]  }
 0x2b1   :  { %v4994_v26 = vld [vmem:[%s7150_s8 + $0x350] ss:$28 sps:$4 sm:$0xff]  }
 0x2b2   :  { %v4997_v27 = vld [vmem:[%s7150_s8 + $0x6d0] ss:$28 sps:$4 sm:$0xff]  }
 0x332   :  { %v2123_v31 = vpop.f32.mrf.mxu0  ;;  %v2164_v20 = vpop.f32.mrf.mxu1 }
 0x333   :  { %v2124_v19 = vadd.f32 %v2123_v31, %v1912_v29  ;;  %v2165_v32 = vadd.f32 %v2164_v20, %v1920_v9  ;;  %v5005_v29 = vld [vmem:[%s7150_s8 + $0x69c] ss:$28 sps:$4 sm:$0xff]   ;;  %v5011_v31 = vld [vmem:[%s7150_s8 + $0x664] ss:$28 sps:$4 sm:$0xff]  }
 0x334   :  { %v2125_v33 = vpop.f32.mrf.mxu0  ;;  %v2166_v16 = vpop.f32.mrf.mxu1  ;;  %v5000_v9 = vld [vmem:[%s7150_s8 + $0x318] ss:$28 sps:$4 sm:$0xff]   ;;  %v5006_v20 = vld [vmem:[%s7150_s8 + $0x2e0] ss:$28 sps:$4 sm:$0xff]  }
 0x335   :  { %v2126_v8 = vadd.f32 %v2125_v33, %v1916_v30  ;;  %v2167_v34 = vadd.f32 %v2166_v16, %v1924_v52  ;;  %v2171_v35 = vmax.f32 %v2124_v19, 0.0  ;;  %v2173_v37 = vmax.f32 %v2165_v32, 0.0  ;;  %v5003_v30 = vld [vmem:[%s7150_s8 + $0x698] ss:$28 sps:$4 sm:$0xff]   ;;  %v5008_v52 = vld [vmem:[%s7150_s8 + $0x2e4] ss:$28 sps:$4 sm:$0xff]  }
 0x336   :  { %v2127_v36 = vpop.f32.mrf.mxu0  ;;  %v2168_v40 = vpop.f32.mrf.mxu1  ;;  %v5009_v19 = vld [vmem:[%s7150_s8 + $0x660] ss:$28 sps:$4 sm:$0xff]   ;;  %v5014_v32 = vld [vmem:[%s7150_s8 + $0x2ac] ss:$28 sps:$4 sm:$0xff]  }
 0x337   :  { %v2172_v42 = vmax.f32 %v2126_v8, 0.0  ;;  %v2174_v43 = vmax.f32 %v2167_v34, 0.0  ;;  %v6626_v50 = vpack.c.bf16 %v2171_v35, %v2171_v35  ;;  %v6628_v51 = vpack.c.bf16 %v2173_v37, %v2173_v37  ;;  %v5017_v33 = vld [vmem:[%s7150_s8 + $0x62c] ss:$28 sps:$4 sm:$0xff]   ;;  %v5020_v34 = vld [vmem:[%s7150_s8 + $0x274] ss:$28 sps:$4 sm:$0xff]  }
 0x338   :  { %v2128_v44 = vpop.f32.mrf.mxu0  ;;  %v2169_v45 = vpop.f32.mrf.mxu1  ;;  %v5012_v16 = vld [vmem:[%s7150_s8 + $0x2a8] ss:$28 sps:$4 sm:$0xff]   ;;  %v5023_v35 = vld [vmem:[%s7150_s8 + $0x5f4] ss:$28 sps:$4 sm:$0xff]   ;;  %v5026_v40 = vld [vmem:[%s7150_s8 + $0x23c] ss:$28 sps:$4 sm:$0xff]  }
 0x339   :  { %v6616_v46 = vpack.c.bf16 %v2172_v42, %v2172_v42  ;;  %v6618_v47 = vpack.c.bf16 %v2174_v43, %v2174_v43  ;;  %v5015_v8 = vld [vmem:[%s7150_s8 + $0x628] ss:$28 sps:$4 sm:$0xff]   ;;  %v5018_v37 = vld [vmem:[%s7150_s8 + $0x270] ss:$28 sps:$4 sm:$0xff]   ;;  %v5029_v42 = vld [vmem:[%s7150_s8 + $0x5bc] ss:$28 sps:$4 sm:$0xff]  }
 0x33a   :  { %v5021_v36 = vld [vmem:[%s7150_s8 + $0x5f0] ss:$28 sps:$4 sm:$0xff]   ;;  %v5024_v43 = vld [vmem:[%s7150_s8 + $0x238] ss:$28 sps:$4 sm:$0xff]   ;;  %v5032_v45 = vld [vmem:[%s7150_s8 + $0x204] ss:$28 sps:$4 sm:$0xff]  }
 0x33b   :  { %3656 = vmatprep.mubr.bf16.mxu0 %v6616_v46  ;;  %3697 = vmatprep.mubr.bf16.mxu1 %v6618_v47  ;;  %v5027_v44 = vld [vmem:[%s7150_s8 + $0x5b8] ss:$28 sps:$4 sm:$0xff]  }
 0x33c   :  { %3657 = vmatmul.mubr.bf16.vlgmr.msra.gmra.mxu0 %v6626_v50  ;;  %3698 = vmatmul.mubr.bf16.vlgmr.msra.gmra.mxu1 %v6628_v51 }
 0x33d   :  { %3707 = vmatpush1.bf16.msra.mxu0 %v4946_v48  ;;  %3748 = vmatpush1.bf16.msra.mxu1 %v4949_v49  ;;  %v5035_v48 = vld [vmem:[%s7150_s8 + $0x584] ss:$28 sps:$4 sm:$0xff]  }
 0x33e   :  { %3738 = vmatprep.mubr.bf16.mxu0 %v6616_v46  ;;  %3779 = vmatprep.mubr.bf16.mxu1 %v6618_v47  ;;  %v5030_v49 = vld [vmem:[%s7150_s8 + $0x200] ss:$28 sps:$4 sm:$0xff]  }
 0x33f   :  { %3708 = vmatprep.subr.bf16.mxu0 %v4954_v53  ;;  %3749 = vmatprep.subr.bf16.mxu1 %v4957_v54  ;;  %v5033_v53 = vld [vmem:[%s7150_s8 + $0x580] ss:$28 sps:$4 sm:$0xff]   ;;  %v5038_v54 = vld [vmem:[%s7150_s8 + $0x1cc] ss:$28 sps:$4 sm:$0xff]  }
 0x341   :  { %3709 = vmatpush1.bf16.msra.mxu0 %v4952_v55  ;;  %3750 = vmatpush1.bf16.msra.mxu1 %v4955_v56  ;;  %v5041_v55 = vld [vmem:[%s7150_s8 + $0x54c] ss:$28 sps:$4 sm:$0xff]  }
 0x342   :  { %3710 = vmatprep.subr.bf16.mxu0 %v4960_v57  ;;  %3751 = vmatprep.subr.bf16.mxu1 %v4963_v58  ;;  %v5036_v56 = vld [vmem:[%s7150_s8 + $0x1c8] ss:$28 sps:$4 sm:$0xff]   ;;  %v5044_v58 = vld [vmem:[%s7150_s8 + $0x19c] ss:$28 sps:$4 sm:$0xff]  }
 0x343   :  { %v5039_v57 = vld [vmem:[%s7150_s8 + $0x548] ss:$28 sps:$4 sm:$0xff]  }
 0x345   :  { %3711 = vmatpush1.bf16.msra.mxu0 %v4958_v59  ;;  %3752 = vmatpush1.bf16.msra.mxu1 %v4961_v60  ;;  %v5047_v59 = vld [vmem:[%s7150_s8 + $0x51c] ss:$28 sps:$4 sm:$0xff]  }
 0x346   :  { %3712 = vmatprep.subr.bf16.mxu0 %v4966_v61  ;;  %3753 = vmatprep.subr.bf16.mxu1 %v4969_v62  ;;  %v5042_v60 = vld [vmem:[%s7150_s8 + $0x198] ss:$28 sps:$4 sm:$0xff]   ;;  %v5050_v62 = vld [vmem:[%s7150_s8 + $0x164] ss:$28 sps:$4 sm:$0xff]  }
 0x347   :  { %v5045_v61 = vld [vmem:[%s7150_s8 + $0x518] ss:$28 sps:$4 sm:$0xff]  }
 0x349   :  { %3713 = vmatpush1.bf16.msra.mxu0 %v4964_v1  ;;  %3754 = vmatpush1.bf16.msra.mxu1 %v4967_v2  ;;  %v5053_v1 = vld [vmem:[%s7150_s8 + $0x4e4] ss:$28 sps:$4 sm:$0xff]  }
 0x34a   :  { %3714 = vmatprep.subr.bf16.mxu0 %v4972_v3  ;;  %3755 = vmatprep.subr.bf16.mxu1 %v4975_v4  ;;  %v5048_v2 = vld [vmem:[%s7150_s8 + $0x160] ss:$28 sps:$4 sm:$0xff]   ;;  %v5056_v4 = vld [vmem:[%s7150_s8 + $0x12c] ss:$28 sps:$4 sm:$0xff]  }
 0x34b   :  { %v5051_v3 = vld [vmem:[%s7150_s8 + $0x4e0] ss:$28 sps:$4 sm:$0xff]  }
 0x34d   :  { %3715 = vmatpush1.bf16.msra.mxu0 %v4970_v5  ;;  %3756 = vmatpush1.bf16.msra.mxu1 %v4973_v6  ;;  %v5059_v5 = vld [vmem:[%s7150_s8 + $0x4ac] ss:$28 sps:$4 sm:$0xff]  }
 0x34e   :  { %3716 = vmatprep.subr.bf16.mxu0 %v4978_v7  ;;  %3757 = vmatprep.subr.bf16.mxu1 %v4981_v10  ;;  %v5054_v6 = vld [vmem:[%s7150_s8 + $0x128] ss:$28 sps:$4 sm:$0xff]   ;;  %v5062_v10 = vld [vmem:[%s7150_s8 + $0xf4] ss:$28 sps:$4 sm:$0xff]  }
 0x34f   :  { %v5057_v7 = vld [vmem:[%s7150_s8 + $0x4a8] ss:$28 sps:$4 sm:$0xff]  }
 0x351   :  { %3717 = vmatpush1.bf16.msra.mxu0 %v4976_v11  ;;  %3758 = vmatpush1.bf16.msra.mxu1 %v4979_v12  ;;  %v5065_v11 = vld [vmem:[%s7150_s8 + $0x474] ss:$28 sps:$4 sm:$0xff]  }
 0x352   :  { %3718 = vmatprep.subr.bf16.mxu0 %v4984_v13  ;;  %3759 = vmatprep.subr.bf16.mxu1 %v4987_v14  ;;  %v5060_v12 = vld [vmem:[%s7150_s8 + $0xf0] ss:$28 sps:$4 sm:$0xff]   ;;  %v5068_v14 = vld [vmem:[%s7150_s8 + $0xbc] ss:$28 sps:$4 sm:$0xff]  }
 0x353   :  { %v5063_v13 = vld [vmem:[%s7150_s8 + $0x470] ss:$28 sps:$4 sm:$0xff]  }
 0x355   :  { %3719 = vmatpush1.bf16.msra.mxu0 %v4982_v15  ;;  %3760 = vmatpush1.bf16.msra.mxu1 %v4985_v17  ;;  %v5071_v15 = vld [vmem:[%s7150_s8 + $0x43c] ss:$28 sps:$4 sm:$0xff]  }
 0x356   :  { %3720 = vmatprep.subr.bf16.mxu0 %v4990_v18  ;;  %3761 = vmatprep.subr.bf16.mxu1 %v4993_v21  ;;  %v5066_v17 = vld [vmem:[%s7150_s8 + $0xb8] ss:$28 sps:$4 sm:$0xff]   ;;  %v5074_v21 = vld [vmem:[%s7150_s8 + $0x84] ss:$28 sps:$4 sm:$0xff]  }
 0x357   :  { %v5069_v18 = vld [vmem:[%s7150_s8 + $0x438] ss:$28 sps:$4 sm:$0xff]  }
 0x359   :  { %3721 = vmatpush1.bf16.msra.mxu0 %v4988_v22  ;;  %3762 = vmatpush1.bf16.msra.mxu1 %v4991_v23  ;;  %v5077_v22 = vld [vmem:[%s7150_s8 + $0x404] ss:$28 sps:$4 sm:$0xff]  }
 0x35a   :  { %3722 = vmatprep.subr.bf16.mxu0 %v4996_v24  ;;  %3763 = vmatprep.subr.bf16.mxu1 %v4999_v25  ;;  %v5072_v23 = vld [vmem:[%s7150_s8 + $0x80] ss:$28 sps:$4 sm:$0xff]   ;;  %v5080_v25 = vld [vmem:[%s7150_s8 + $0x4c] ss:$28 sps:$4 sm:$0xff]  }
 0x35b   :  { %v5075_v24 = vld [vmem:[%s7150_s8 + $0x400] ss:$28 sps:$4 sm:$0xff]  }
 0x35d   :  { %3723 = vmatpush2.bf16.msra.mxu0 %v4994_v26  ;;  %3764 = vmatpush2.bf16.msra.mxu1 %v4997_v27  ;;  %v5083_v26 = vld [vmem:[%s7150_s8 + $0x3cc] ss:$28 sps:$4 sm:$0xff]  }
 0x35e   :  { %3724 = vmatprep.subr.bf16.mxu0 %v5002_v28  ;;  %3765 = vmatprep.subr.bf16.mxu1 %v5005_v29  ;;  %v5078_v27 = vld [vmem:[%s7150_s8 + $0x48] ss:$28 sps:$4 sm:$0xff]   ;;  %v5086_v29 = vld [vmem:[%s7150_s8 + $0x14] ss:$28 sps:$4 sm:$0xff]  }
 0x35f   :  { %v5081_v28 = vld [vmem:[%s7150_s8 + $0x3c8] ss:$28 sps:$4 sm:$0xff]  }
 0x361   :  { %3725 = vmatpush2.bf16.msra.mxu0 %v5000_v9  ;;  %3766 = vmatpush2.bf16.msra.mxu1 %v5003_v30  ;;  %v5089_v9 = vld [vmem:[%s7150_s8 + $0x394] ss:$28 sps:$4 sm:$0xff]  }
 0x362   :  { %3726 = vmatprep.subr.bf16.mxu0 %v5008_v52  ;;  %3767 = vmatprep.subr.bf16.mxu1 %v5011_v31  ;;  %v5084_v30 = vld [vmem:[%s7150_s8 + $0x10] ss:$28 sps:$4 sm:$0xff]   ;;  %v5092_v31 = vld [vmem:[%s7150_s8 + $0x35c] ss:$28 sps:$4 sm:$0xff]  }
 0x363   :  { %v5087_v52 = vld [vmem:[%s7150_s8 + $0x390] ss:$28 sps:$4 sm:$0xff]  }
 0x365   :  { %3727 = vmatpush2.bf16.msra.mxu0 %v5006_v20  ;;  %3768 = vmatpush2.bf16.msra.mxu1 %v5009_v19  ;;  %v5095_v20 = vld [vmem:[%s7150_s8 + $0x6dc] ss:$28 sps:$4 sm:$0xff]  }
 0x366   :  { %3728 = vmatprep.subr.bf16.mxu0 %v5014_v32  ;;  %3769 = vmatprep.subr.bf16.mxu1 %v5017_v33  ;;  %v5090_v19 = vld [vmem:[%s7150_s8 + $0x358] ss:$28 sps:$4 sm:$0xff]   ;;  %v5098_v33 = vld [vmem:[%s7150_s8 + $0x324] ss:$28 sps:$4 sm:$0xff]  }
 0x367   :  { %v5093_v32 = vld [vmem:[%s7150_s8 + $0x6d8] ss:$28 sps:$4 sm:$0xff]  }
 0x369   :  { %3729 = vmatpush2.bf16.msra.mxu0 %v5012_v16  ;;  %3770 = vmatpush2.bf16.msra.mxu1 %v5015_v8  ;;  %v5101_v16 = vld [vmem:[%s7150_s8 + $0x6a4] ss:$28 sps:$4 sm:$0xff]  }
 0x36a   :  { %3730 = vmatprep.subr.bf16.mxu0 %v5020_v34  ;;  %3771 = vmatprep.subr.bf16.mxu1 %v5023_v35  ;;  %v5096_v8 = vld [vmem:[%s7150_s8 + $0x320] ss:$28 sps:$4 sm:$0xff]   ;;  %v5104_v35 = vld [vmem:[%s7150_s8 + $0x2ec] ss:$28 sps:$4 sm:$0xff]  }
 0x36b   :  { %v5099_v34 = vld [vmem:[%s7150_s8 + $0x6a0] ss:$28 sps:$4 sm:$0xff]  }
 0x36d   :  { %3731 = vmatpush2.bf16.msra.mxu0 %v5018_v37  ;;  %3772 = vmatpush2.bf16.msra.mxu1 %v5021_v36  ;;  %v5107_v37 = vld [vmem:[%s7150_s8 + $0x66c] ss:$28 sps:$4 sm:$0xff]  }
 0x36e   :  { %3732 = vmatprep.subr.bf16.mxu0 %v5026_v40  ;;  %3773 = vmatprep.subr.bf16.mxu1 %v5029_v42  ;;  %v5102_v36 = vld [vmem:[%s7150_s8 + $0x2e8] ss:$28 sps:$4 sm:$0xff]   ;;  %v5110_v42 = vld [vmem:[%s7150_s8 + $0x2b4] ss:$28 sps:$4 sm:$0xff]  }
 0x36f   :  { %v5105_v40 = vld [vmem:[%s7150_s8 + $0x668] ss:$28 sps:$4 sm:$0xff]  }
 0x371   :  { %3733 = vmatpush2.bf16.msra.mxu0 %v5024_v43  ;;  %3774 = vmatpush2.bf16.msra.mxu1 %v5027_v44  ;;  %v5113_v43 = vld [vmem:[%s7150_s8 + $0x634] ss:$28 sps:$4 sm:$0xff]  }
 0x372   :  { %3734 = vmatprep.subr.bf16.mxu0 %v5032_v45  ;;  %3775 = vmatprep.subr.bf16.mxu1 %v5035_v48  ;;  %v5108_v44 = vld [vmem:[%s7150_s8 + $0x2b0] ss:$28 sps:$4 sm:$0xff]   ;;  %v5116_v48 = vld [vmem:[%s7150_s8 + $0x27c] ss:$28 sps:$4 sm:$0xff]  }
 0x373   :  { %v5111_v45 = vld [vmem:[%s7150_s8 + $0x630] ss:$28 sps:$4 sm:$0xff]  }
 0x375   :  { %3735 = vmatpush2.bf16.msra.mxu0 %v5030_v49  ;;  %3776 = vmatpush2.bf16.msra.mxu1 %v5033_v53  ;;  %v5119_v49 = vld [vmem:[%s7150_s8 + $0x5fc] ss:$28 sps:$4 sm:$0xff]  }
 0x376   :  { %3736 = vmatprep.subr.bf16.mxu0 %v5038_v54  ;;  %3777 = vmatprep.subr.bf16.mxu1 %v5041_v55  ;;  %v5114_v53 = vld [vmem:[%s7150_s8 + $0x278] ss:$28 sps:$4 sm:$0xff]   ;;  %v5122_v55 = vld [vmem:[%s7150_s8 + $0x244] ss:$28 sps:$4 sm:$0xff]  }
 0x377   :  { %v5117_v54 = vld [vmem:[%s7150_s8 + $0x5f8] ss:$28 sps:$4 sm:$0xff]  }
 0x379   :  { %3737 = vmatpush2.bf16.msra.mxu0 %v5036_v56  ;;  %3778 = vmatpush2.bf16.msra.mxu1 %v5039_v57  ;;  %v5125_v56 = vld [vmem:[%s7150_s8 + $0x5c4] ss:$28 sps:$4 sm:$0xff]  }
 0x37a   :  { %3788 = vmatprep.subr.bf16.mxu0 %v5044_v58  ;;  %3829 = vmatprep.subr.bf16.mxu1 %v5047_v59  ;;  %v5120_v57 = vld [vmem:[%s7150_s8 + $0x240] ss:$28 sps:$4 sm:$0xff]   ;;  %v5128_v59 = vld [vmem:[%s7150_s8 + $0x20c] ss:$28 sps:$4 sm:$0xff]  }
 0x37b   :  { %v5123_v58 = vld [vmem:[%s7150_s8 + $0x5c0] ss:$28 sps:$4 sm:$0xff]  }
 0x37c   :  { %3739 = vmatmul.mubr.bf16.vlgmr.msra.gmra.mxu0 %v6626_v50  ;;  %3780 = vmatmul.mubr.bf16.vlgmr.msra.gmra.mxu1 %v6628_v51 }
 0x37d   :  { %3789 = vmatpush1.bf16.msra.mxu0 %v5042_v60  ;;  %3820 = vmatprep.mubr.bf16.mxu0 %v6616_v46  ;;  %v5131_v60 = vld [vmem:[%s7150_s8 + $0x58c] ss:$28 sps:$4 sm:$0xff]  }
 0x37e   :  { %3830 = vmatpush1.bf16.msra.mxu1 %v5045_v61  ;;  %3861 = vmatprep.mubr.bf16.mxu1 %v6618_v47  ;;  %v5126_v61 = vld [vmem:[%s7150_s8 + $0x208] ss:$28 sps:$4 sm:$0xff]  }
 0x37f   :  { %3790 = vmatprep.subr.bf16.mxu0 %v5050_v62  ;;  %3831 = vmatprep.subr.bf16.mxu1 %v5053_v1  ;;  %v5129_v62 = vld [vmem:[%s7150_s8 + $0x588] ss:$28 sps:$4 sm:$0xff]   ;;  %v5134_v1 = vld [vmem:[%s7150_s8 + $0x1d4] ss:$28 sps:$4 sm:$0xff]  }
 0x381   :  { %3791 = vmatpush1.bf16.msra.mxu0 %v5048_v2  ;;  %v5137_v2 = vld [vmem:[%s7150_s8 + $0x554] ss:$28 sps:$4 sm:$0xff]  }
 0x382   :  { %3832 = vmatpush1.bf16.msra.mxu1 %v5051_v3  ;;  %3792 = vmatprep.subr.bf16.mxu0 %v5056_v4  ;;  %v5132_v3 = vld [vmem:[%s7150_s8 + $0x1d0] ss:$28 sps:$4 sm:$0xff]  }
 0x383   :  { %3833 = vmatprep.subr.bf16.mxu1 %v5059_v5  ;;  %v5135_v4 = vld [vmem:[%s7150_s8 + $0x550] ss:$28 sps:$4 sm:$0xff]   ;;  %v5138_v5 = vld [vmem:[%s7150_s8 + $0x360] ss:$28 sps:$4 sm:$0xff]  }
 0x385   :  { %3793 = vmatpush1.bf16.msra.mxu0 %v5054_v6  ;;  %v5139_v6 = vld [vmem:[%s7150_s8 + $0x6e0] ss:$28 sps:$4 sm:$0xff]  }
 0x386   :  { %3834 = vmatpush1.bf16.msra.mxu1 %v5057_v7  ;;  %3794 = vmatprep.subr.bf16.mxu0 %v5062_v10  ;;  %v5140_v7 = vld [vmem:[%s7150_s8 + $0x1a0] ss:$28 sps:$4 sm:$0xff]  }
 0x387   :  { %3835 = vmatprep.subr.bf16.mxu1 %v5065_v11  ;;  %v5141_v10 = vld [vmem:[%s7150_s8 + $0x520] ss:$28 sps:$4 sm:$0xff]   ;;  %v5142_v11 = vld [vmem:[%s7150_s8 + $0x328] ss:$28 sps:$4 sm:$0xff]  }
 0x389   :  { %3795 = vmatpush1.bf16.msra.mxu0 %v5060_v12  ;;  %v5143_v12 = vld [vmem:[%s7150_s8 + $0x6a8] ss:$28 sps:$4 sm:$0xff]  }
 0x38a   :  { %3836 = vmatpush1.bf16.msra.mxu1 %v5063_v13  ;;  %3796 = vmatprep.subr.bf16.mxu0 %v5068_v14  ;;  %v5144_v13 = vld [vmem:[%s7150_s8 + $0x168] ss:$28 sps:$4 sm:$0xff]  }
 0x38b   :  { %3837 = vmatprep.subr.bf16.mxu1 %v5071_v15  ;;  %v5145_v14 = vld [vmem:[%s7150_s8 + $0x4e8] ss:$28 sps:$4 sm:$0xff]   ;;  %v5146_v15 = vld [vmem:[%s7150_s8 + $0x2f0] ss:$28 sps:$4 sm:$0xff]  }
 0x38d   :  { %3797 = vmatpush1.bf16.msra.mxu0 %v5066_v17  ;;  %v5147_v17 = vld [vmem:[%s7150_s8 + $0x670] ss:$28 sps:$4 sm:$0xff]  }
 0x38e   :  { %3838 = vmatpush1.bf16.msra.mxu1 %v5069_v18  ;;  %3798 = vmatprep.subr.bf16.mxu0 %v5074_v21  ;;  %v5149_v18 = vld [vmem:[%s7150_s8 + $0x4b0] ss:$28 sps:$4 sm:$0xff]   ;;  %v5151_v21 = vld [vmem:[%s7150_s8 + $0x638] ss:$28 sps:$4 sm:$0xff]  }
 0x38f   :  { %3839 = vmatprep.subr.bf16.mxu1 %v5077_v22  ;;  %v5152_v22 = vld [vmem:[%s7150_s8 + $0xf8] ss:$28 sps:$4 sm:$0xff]  }
 0x391   :  { %3799 = vmatpush1.bf16.msra.mxu0 %v5072_v23  ;;  %v5153_v23 = vld [vmem:[%s7150_s8 + $0x478] ss:$28 sps:$4 sm:$0xff]  }
 0x392   :  { %3840 = vmatpush1.bf16.msra.mxu1 %v5075_v24  ;;  %3800 = vmatprep.subr.bf16.mxu0 %v5080_v25  ;;  %v5154_v24 = vld [vmem:[%s7150_s8 + $0x280] ss:$28 sps:$4 sm:$0xff]  }
 0x393   :  { %3841 = vmatprep.subr.bf16.mxu1 %v5083_v26  ;;  %v5155_v25 = vld [vmem:[%s7150_s8 + $0x600] ss:$28 sps:$4 sm:$0xff]  }
 0x394   :  { %v5156_v26 = vld [vmem:[%s7150_s8 + $0xc0] ss:$28 sps:$4 sm:$0xff]  }
 0x395   :  { %3801 = vmatpush1.bf16.msra.mxu0 %v5078_v27  ;;  %v5157_v27 = vld [vmem:[%s7150_s8 + $0x440] ss:$28 sps:$4 sm:$0xff]  }
 0x396   :  { %3842 = vmatpush1.bf16.msra.mxu1 %v5081_v28  ;;  %3802 = vmatprep.subr.bf16.mxu0 %v5086_v29  ;;  %v5158_v28 = vld [vmem:[%s7150_s8 + $0x248] ss:$28 sps:$4 sm:$0xff]  }
 0x397   :  { %3843 = vmatprep.subr.bf16.mxu1 %v5089_v9  ;;  %v5159_v29 = vld [vmem:[%s7150_s8 + $0x5c8] ss:$28 sps:$4 sm:$0xff]  }
 0x398   :  { %v5160_v9 = vld [vmem:[%s7150_s8 + $0x88] ss:$28 sps:$4 sm:$0xff]  }
 0x399   :  { %3803 = vmatpush1.bf16.msra.mxu0 %v5084_v30  ;;  %v5161_v30 = vld [vmem:[%s7150_s8 + $0x408] ss:$28 sps:$4 sm:$0xff]  }
 0x39a   :  { %3844 = vmatpush1.bf16.msra.mxu1 %v5087_v52  ;;  %3804 = vmatprep.subr.bf16.mxu0 %v5092_v31  ;;  %v5162_v52 = vld [vmem:[%s7150_s8 + $0x210] ss:$28 sps:$4 sm:$0xff]  }
 0x39b   :  { %3845 = vmatprep.subr.bf16.mxu1 %v5095_v20  ;;  %v5163_v31 = vld [vmem:[%s7150_s8 + $0x590] ss:$28 sps:$4 sm:$0xff]  }
 0x39c   :  { %v5164_v20 = vld [vmem:[%s7150_s8 + $0x50] ss:$28 sps:$4 sm:$0xff]  }
 0x39d   :  { %3805 = vmatpush2.bf16.msra.mxu0 %v5090_v19  ;;  %v5165_v19 = vld [vmem:[%s7150_s8 + $0x3d0] ss:$28 sps:$4 sm:$0xff]  }
 0x39e   :  { %3846 = vmatpush2.bf16.msra.mxu1 %v5093_v32  ;;  %3806 = vmatprep.subr.bf16.mxu0 %v5098_v33  ;;  %v5166_v32 = vld [vmem:[%s7150_s8 + $0x1d8] ss:$28 sps:$4 sm:$0xff]  }
 0x39f   :  { %3847 = vmatprep.subr.bf16.mxu1 %v5101_v16  ;;  %v5167_v33 = vld [vmem:[%s7150_s8 + $0x558] ss:$28 sps:$4 sm:$0xff]  }
 0x3a0   :  { %v5168_v16 = vld [vmem:[%s7150_s8 + $0x18] ss:$28 sps:$4 sm:$0xff]  }
 0x3a1   :  { %3807 = vmatpush2.bf16.msra.mxu0 %v5096_v8  ;;  %v5169_v8 = vld [vmem:[%s7150_s8 + $0x398] ss:$28 sps:$4 sm:$0xff]  }
 0x3a2   :  { %3848 = vmatpush2.bf16.msra.mxu1 %v5099_v34  ;;  %3808 = vmatprep.subr.bf16.mxu0 %v5104_v35  ;;  %v7117_v34 = vld [vmem:[%s7155_s9] sm:$0x7f] }
 0x3a3   :  { %3849 = vmatprep.subr.bf16.mxu1 %v5107_v37  ;;  %v2440_v35 = vrot.slane %v7117_v34, %v6279_v39  ;;  %v2444_v37 = vrot.slane %v7117_v34, %v6285_v41  ;;  %v2448_v41 = vrot.slane %v7117_v34, %v6293_v63 }
 0x3a5   :  { %3809 = vmatpush2.bf16.msra.mxu0 %v5102_v36 }
 0x3a6   :  { %3850 = vmatpush2.bf16.msra.mxu1 %v5105_v40  ;;  %3810 = vmatprep.subr.bf16.mxu0 %v5110_v42 }
 0x3a7   :  { %3851 = vmatprep.subr.bf16.mxu1 %v5113_v43 }
 0x3a9   :  { %3811 = vmatpush2.bf16.msra.mxu0 %v5108_v44 }
 0x3aa   :  { %3852 = vmatpush2.bf16.msra.mxu1 %v5111_v45  ;;  %3812 = vmatprep.subr.bf16.mxu0 %v5116_v48 }
 0x3ab   :  { %3853 = vmatprep.subr.bf16.mxu1 %v5119_v49 }
 0x3ad   :  { %3813 = vmatpush2.bf16.msra.mxu0 %v5114_v53 }
 0x3ae   :  { %3854 = vmatpush2.bf16.msra.mxu1 %v5117_v54  ;;  %3814 = vmatprep.subr.bf16.mxu0 %v5122_v55 }
 0x3af   :  { %3855 = vmatprep.subr.bf16.mxu1 %v5125_v56 }
 0x3b1   :  { %3815 = vmatpush2.bf16.msra.mxu0 %v5120_v57  ;;  %v2452_v57 = vrot.slane %v7117_v34, %v6296_v0  ;;  %v2455_v0 = vsub.s32 4, %v6276_v38 }
 0x3b2   :  { %3856 = vmatpush2.bf16.msra.mxu1 %v5123_v58  ;;  %3816 = vmatprep.subr.bf16.mxu0 %v5128_v59 }
 0x3b3   :  { %3857 = vmatprep.subr.bf16.mxu1 %v5131_v60 }
 0x3b5   :  { %3817 = vmatpush2.bf16.msra.mxu0 %v5126_v61 }
 0x3b6   :  { %3858 = vmatpush2.bf16.msra.mxu1 %v5129_v62  ;;  %3818 = vmatprep.subr.bf16.mxu0 %v5134_v1 }
 0x3b7   :  { %3859 = vmatprep.subr.bf16.mxu1 %v5137_v2 }
 0x3b9   :  { %3819 = vmatpush2.bf16.msra.mxu0 %v5132_v3 }
 0x3ba   :  { %3860 = vmatpush2.bf16.msra.mxu1 %v5135_v4  ;;  %4463 = vmatprep.subr.bf16.mxu0 %v5138_v5 }
 0x3bb   :  { %4485 = vmatprep.subr.bf16.mxu1 %v5139_v6 }
 0x3bc   :  { %3821 = vmatmul.mubr.bf16.vlgmr.msra.gmra.mxu0 %v6626_v50 }
 0x3bd   :  { %3862 = vmatmul.mubr.bf16.vlgmr.msra.gmra.mxu1 %v6628_v51  ;;  %4464 = vmatpush3.bf16.msra.mxu0 %v5140_v7 }
 0x3be   :  { %3902 = vmatprep.mubr.bf16.mxu0 %v6616_v46  ;;  %4486 = vmatpush3.bf16.msra.mxu1 %v5141_v10  ;;  %v5148_v46 = vld [vmem:[%s7150_s8 + $0x130] ss:$28 sps:$4 sm:$0xff]  }
 0x3bf   :  { %3942 = vmatprep.mubr.bf16.mxu1 %v6618_v47  ;;  %4465 = vmatprep.subr.bf16.mxu0 %v5142_v11  ;;  %v5150_v47 = vld [vmem:[%s7150_s8 + $0x2b8] ss:$28 sps:$4 sm:$0xff]  }
 0x3c0   :  { %4487 = vmatprep.subr.bf16.mxu1 %v5143_v12  ;;  %v2459_v12 = vsub.s32 5, %v6276_v38 }
 0x3c1   :  { %4466 = vmatpush3.bf16.msra.mxu0 %v5144_v13  ;;  %v2456_v13 = vrot.slane %v7117_v34, %v2455_v0 }
 0x3c2   :  { %4488 = vmatpush3.bf16.msra.mxu1 %v5145_v14  ;;  %4467 = vmatprep.subr.bf16.mxu0 %v5146_v15  ;;  %v2460_v14 = vrot.slane %v7117_v34, %v2459_v12 }
 0x3c3   :  { %4489 = vmatprep.subr.bf16.mxu1 %v5147_v17 }
 0x3c5   :  { %4468 = vmatpush3.bf16.msra.mxu0 %v5148_v46 }
 0x3c6   :  { %4490 = vmatpush3.bf16.msra.mxu1 %v5149_v18  ;;  %4469 = vmatprep.subr.bf16.mxu0 %v5150_v47 }
 0x3c7   :  { %4491 = vmatprep.subr.bf16.mxu1 %v5151_v21 }
 0x3c9   :  { %4470 = vmatpush3.bf16.msra.mxu0 %v5152_v22 }
 0x3ca   :  { %4492 = vmatpush3.bf16.msra.mxu1 %v5153_v23  ;;  %4471 = vmatprep.subr.bf16.mxu0 %v5154_v24 }
 0x3cb   :  { %4493 = vmatprep.subr.bf16.mxu1 %v5155_v25 }
 0x3cd   :  { %4472 = vmatpush3.bf16.msra.mxu0 %v5156_v26 }
 0x3ce   :  { %4494 = vmatpush3.bf16.msra.mxu1 %v5157_v27  ;;  %4473 = vmatprep.subr.bf16.mxu0 %v5158_v28 }
 0x3cf   :  { %4495 = vmatprep.subr.bf16.mxu1 %v5159_v29 }
 0x3d1   :  { %4474 = vmatpush3.bf16.msra.mxu0 %v5160_v9 }
 0x3d2   :  { %4496 = vmatpush3.bf16.msra.mxu1 %v5161_v30  ;;  %4475 = vmatprep.subr.bf16.mxu0 %v5162_v52  ;;  %v2463_v30 = vsub.s32 6, %v6276_v38 }
 0x3d3   :  { %4497 = vmatprep.subr.bf16.mxu1 %v5163_v31 }
 0x3d5   :  { %4476 = vmatpush3.bf16.msra.mxu0 %v5164_v20  ;;  %v2464_v20 = vrot.slane %v7117_v34, %v2463_v30 }
 0x3d6   :  { %4498 = vmatpush3.bf16.msra.mxu1 %v5165_v19  ;;  %4477 = vmatprep.subr.bf16.mxu0 %v5166_v32 }
 0x3d7   :  { %4499 = vmatprep.subr.bf16.mxu1 %v5167_v33 }
 0x3d9   :  { %4478 = vmatpush3.bf16.msra.mxu0 %v5168_v16 }
 0x3da   :  { %4500 = vmatpush3.bf16.msra.mxu1 %v5169_v8 }
 0x3dc   :  { %3903 = vmatmul.mubr.bf16.vlgmr.msra.gmra.mxu0 %v6626_v50 }
 0x3dd   :  { %3943 = vmatmul.mubr.bf16.vlgmr.msra.gmra.mxu1 %v6628_v51 }
 0x3fc   :  { %v3658_v36 = vpop.f32.mrf.mxu0  ;;  %v3699_v40 = vpop.f32.mrf.mxu1 }
 0x3fd   :  { %v3659_v42 = vadd.f32 %v3658_v36, %v2440_v35 }
 0x3fe   :  { %v3660_v43 = vpop.f32.mrf.mxu0  ;;  %v3701_v44 = vpop.f32.mrf.mxu1 }
 0x3ff   :  { %v3700_v45 = vadd.f32 %v3699_v40, %v3659_v42  ;;  %v3661_v50 = vadd.f32 %v3660_v43, %v2444_v37 }
 0x400   :  { %v3662_v48 = vpop.f32.mrf.mxu0  ;;  %v3703_v51 = vpop.f32.mrf.mxu1 }
 0x401   :  { %v3702_v49 = vadd.f32 %v3701_v44, %v3661_v50  ;;  %5172 = vtanh.f32 %v3700_v45 }
 0x402   :  { %v3663_v53 = vpop.f32.mrf.mxu0  ;;  %v3704_v54 = vpop.f32.mrf.mxu1 }
 0x403   :  { %5174 = vtanh.f32 %v3702_v49 }
 0x40e   :  { %v5173_v55 = vpop.eup %5172 }
 0x410   :  { %v5175_v56 = vpop.eup %5174 }
 0x411   :  { %v4459_v39 = vpack.c.bf16 %v5175_v56, %v5173_v55 }
 0x413   :  { %3986 = vst [vmem:[%s7156_s10] sm:$0xff] %v4459_v39 }
 0x43c   :  { %v3740_v58 = vpop.f32.mrf.mxu0  ;;  %v3781_v59 = vpop.f32.mrf.mxu1 }
 0x43d   :  { %v3741_v60 = vadd.f32 %v3740_v58, %v2448_v41 }
 0x43e   :  { %v3742_v61 = vpop.f32.mrf.mxu0  ;;  %v3783_v62 = vpop.f32.mrf.mxu1 }
 0x43f   :  { %v3782_v1 = vadd.f32 %v3781_v59, %v3741_v60  ;;  %v3743_v2 = vadd.f32 %v3742_v61, %v2452_v57 }
 0x440   :  { %v3744_v3 = vpop.f32.mrf.mxu0  ;;  %v3785_v4 = vpop.f32.mrf.mxu1 }
 0x441   :  { %v3784_v5 = vadd.f32 %v3783_v62, %v3743_v2  ;;  %5176 = vtanh.f32 %v3782_v1 }
 0x442   :  { %v3745_v6 = vpop.f32.mrf.mxu0  ;;  %v3786_v7 = vpop.f32.mrf.mxu1 }
 0x443   :  { %5178 = vtanh.f32 %v3784_v5 }
 0x44e   :  { %v5177_v10 = vpop.eup %5176 }
 0x450   :  { %v5179_v11 = vpop.eup %5178 }
 0x451   :  { %v4460_v63 = vpack.c.bf16 %v5179_v11, %v5177_v10 }
 0x453   :  { %3987 = vst [vmem:[%s7156_s10 + $0x8] sm:$0xff] %v4460_v63 }
 0x47c   :  { %v3822_v15 = vpop.f32.mrf.mxu0 }
 0x47d   :  { %v3823_v17 = vadd.f32 %v3822_v15, %v2456_v13  ;;  %v3863_v46 = vpop.f32.mrf.mxu1 }
 0x47e   :  { %v3824_v18 = vpop.f32.mrf.mxu0 }
 0x47f   :  { %v3864_v47 = vadd.f32 %v3863_v46, %v3823_v17  ;;  %v3825_v21 = vadd.f32 %v3824_v18, %v2460_v14  ;;  %v3865_v22 = vpop.f32.mrf.mxu1 }
 0x480   :  { %v3826_v23 = vpop.f32.mrf.mxu0 }
 0x481   :  { %v3866_v24 = vadd.f32 %v3865_v22, %v3825_v21  ;;  %v3867_v25 = vpop.f32.mrf.mxu1  ;;  %5180 = vtanh.f32 %v3864_v47 }
 0x482   :  { %v3827_v26 = vpop.f32.mrf.mxu0 }
 0x483   :  { %5182 = vtanh.f32 %v3866_v24  ;;  %v3868_v27 = vpop.f32.mrf.mxu1 }
 0x48e   :  { %v5181_v28 = vpop.eup %5180 }
 0x490   :  { %v5183_v29 = vpop.eup %5182 }
 0x491   :  { %v4461_v9 = vpack.c.bf16 %v5183_v29, %v5181_v28 }
 0x493   :  { %3988 = vst [vmem:[%s7156_s10 + $0x10] sm:$0xff] %v4461_v9 }
 0x49c   :  { %v4479_v52 = vpop.f32.mrf.mxu0 }
 0x49d   :  { %v4501_v31 = vpop.f32.mrf.mxu1 }
 0x49e   :  { %v4480_v19 = vpop.f32.mrf.mxu0 }
 0x49f   :  { %v4481_v32 = vadd.f32 %v4480_v19, %v4479_v52  ;;  %v4502_v33 = vpop.f32.mrf.mxu1 }
 0x4a0   :  { %v4482_v16 = vpop.f32.mrf.mxu0  ;;  %v4503_v35 = vadd.f32 %v4502_v33, %v4501_v31 }
 0x4a1   :  { %v3905_v8 = vadd.f32 %v4481_v32, %v2464_v20  ;;  %v4504_v37 = vpop.f32.mrf.mxu1 }
 0x4a2   :  { %v4483_v36 = vpop.f32.mrf.mxu0 }
 0x4a3   :  { %v3945_v40 = vadd.f32 %v4503_v35, %v3905_v8  ;;  %v4505_v42 = vpop.f32.mrf.mxu1 }
 0x4a5   :  { %5184 = vtanh.f32 %v3945_v40 }
 0x4b2   :  { %v5185_v43 = vpop.eup %5184 }
 0x4b3   :  { %v4462_v44 = vpack.c.bf16 %v5185_v43, %v5185_v43 }
 0x4b5   :  { %3990 = vst.msk [vmem:[%s7156_s10 + $0x18] sm:$0xf] %vm3989_vm1, %v4462_v44 }

// kernel: vae_forward.1
= control target key start
LH: loop header
LB: loop body
LE: loop exit
PB: predicated region body
PF: predicated region fallthrough
CT: control target
= control target key end

     0   :  { %vm1250_vm0 = vcmask 130048   ;;  %vm3989_vm1 = vcmask 125952   ;;  %s7145_s2 = inlined_call_operand.vmem [shape: bf16[784,512], index: 2, kind: input, shape index: {}]   ;;  %s7146_s0 = inlined_call_operand.vmem [shape: f32[8,784], index: 0, kind: input, shape index: {}]   ;;  %s7147_s4 = inlined_call_operand.vmem [shape: f32[512,256], index: 4, kind: input, shape index: {}]   ;;  %s7148_s3 = inlined_call_operand.vmem [shape: f32[1,512], index: 3, kind: input, shape index: {}]   ;;  %s7149_s6 = inlined_call_operand.vmem [shape: bf16[128,512], index: 6, kind: input, shape index: {}]   ;;  %s7150_s8 = inlined_call_operand.vmem [shape: bf16[512,784], index: 8, kind: input, shape index: {}]   ;;  %s7151_s5 = inlined_call_operand.vmem [shape: f32[1,256], index: 5, kind: input, shape index: {}]   ;;  %s7152_s11 = inlined_call_operand.vmem [shape: f32[8,256], index: 11, kind: output, shape index: {1}]   ;;  %s7153_s1 = inlined_call_operand.vmem [shape: f32[8,128], index: 1, kind: input, shape index: {}]   ;;  %s7154_s7 = inlined_call_operand.vmem [shape: f32[1,512], index: 7, kind: input, shape index: {}]   ;;  %s7155_s9 = inlined_call_operand.vmem [shape: f32[1,784], index: 9, kind: input, shape index: {}]   ;;  %s7156_s10 = inlined_call_operand.vmem [shape: bf16[8,784], index: 10, kind: output, shape index: {0}]  }
   0x1   :  { %v4508_v0 = vld [vmem:[%s7145_s2 + $0xe4] ss:$16 sps:$4 sm:$0xff]   ;;  %v4512_v2 = vld [vmem:[%s7145_s2 + $0xe0] ss:$16 sps:$4 sm:$0xff]   ;;  %v39_v46 = vld [vmem:[%s7146_s0 + $0x8] sm:$0xff] }
   0x2   :  { %v4510_v1 = vld [vmem:[%s7145_s2 + $0x2e4] ss:$16 sps:$4 sm:$0xff]   ;;  %1254 = vmatprep.subr.bf16.mxu0 %v4508_v0  ;;  %v4513_v3 = vld [vmem:[%s7145_s2 + $0x2e0] ss:$16 sps:$4 sm:$0xff]   ;;  %v5394_v49 = vpack.c.bf16 %v39_v46, %v39_v46  ;;  %v41_v50 = vld [vmem:[%s7146_s0 + $0x18] sm:$0xff] }
   0x3   :  { %1295 = vmatprep.subr.bf16.mxu1 %v4510_v1  ;;  %v4514_v4 = vld [vmem:[%s7145_s2 + $0xc4] ss:$16 sps:$4 sm:$0xff]   ;;  %1255 = vmatpush1.bf16.msra.mxu0 %v4512_v2  ;;  %v4518_v6 = vld [vmem:[%s7145_s2 + $0xc0] ss:$16 sps:$4 sm:$0xff]   ;;  %v5402_v52 = vpack.c.bf16 %v41_v50, %v41_v50 }
   0x4   :  { %1296 = vmatpush1.bf16.msra.mxu1 %v4513_v3  ;;  %v4516_v5 = vld [vmem:[%s7145_s2 + $0x2c4] ss:$16 sps:$4 sm:$0xff]   ;;  %1256 = vmatprep.subr.bf16.mxu0 %v4514_v4  ;;  %v4519_v7 = vld [vmem:[%s7145_s2 + $0x2c0] ss:$16 sps:$4 sm:$0xff]  }
   0x5   :  { %1297 = vmatprep.subr.bf16.mxu1 %v4516_v5  ;;  %v4520_v8 = vld [vmem:[%s7145_s2 + $0xa4] ss:$16 sps:$4 sm:$0xff]   ;;  %v4524_v10 = vld [vmem:[%s7145_s2 + $0xa0] ss:$16 sps:$4 sm:$0xff]   ;;  %1286 = vmatprep.mubr.bf16.mxu0 %v5394_v49 }
   0x6   :  { %v4522_v9 = vld [vmem:[%s7145_s2 + $0x2a4] ss:$16 sps:$4 sm:$0xff]   ;;  %v4525_v11 = vld [vmem:[%s7145_s2 + $0x2a0] ss:$16 sps:$4 sm:$0xff]   ;;  %1327 = vmatprep.mubr.bf16.mxu1 %v5402_v52 }
   0x7   :  { %1257 = vmatpush1.bf16.msra.mxu0 %v4518_v6  ;;  %v4526_v12 = vld [vmem:[%s7145_s2 + $0x84] ss:$16 sps:$4 sm:$0xff]   ;;  %v4530_v14 = vld [vmem:[%s7145_s2 + $0x80] ss:$16 sps:$4 sm:$0xff]  }
   0x8   :  { %1298 = vmatpush1.bf16.msra.mxu1 %v4519_v7  ;;  %1258 = vmatprep.subr.bf16.mxu0 %v4520_v8  ;;  %v4528_v13 = vld [vmem:[%s7145_s2 + $0x284] ss:$16 sps:$4 sm:$0xff]   ;;  %v4531_v15 = vld [vmem:[%s7145_s2 + $0x280] ss:$16 sps:$4 sm:$0xff]  }
   0x9   :  { %1299 = vmatprep.subr.bf16.mxu1 %v4522_v9  ;;  %v4532_v16 = vld [vmem:[%s7145_s2 + $0x64] ss:$16 sps:$4 sm:$0xff]   ;;  %v4536_v18 = vld [vmem:[%s7145_s2 + $0x60] ss:$16 sps:$4 sm:$0xff]  }
   0xa   :  { %v4534_v17 = vld [vmem:[%s7145_s2 + $0x264] ss:$16 sps:$4 sm:$0xff]   ;;  %v4537_v19 = vld [vmem:[%s7145_s2 + $0x260] ss:$16 sps:$4 sm:$0xff]  }
   0xb   :  { %1259 = vmatpush1.bf16.msra.mxu0 %v4524_v10  ;;  %v4538_v20 = vld [vmem:[%s7145_s2 + $0x44] ss:$16 sps:$4 sm:$0xff]   ;;  %v4542_v22 = vld [vmem:[%s7145_s2 + $0x40] ss:$16 sps:$4 sm:$0xff]  }
   0xc   :  { %1300 = vmatpush1.bf16.msra.mxu1 %v4525_v11  ;;  %1260 = vmatprep.subr.bf16.mxu0 %v4526_v12  ;;  %v4540_v21 = vld [vmem:[%s7145_s2 + $0x244] ss:$16 sps:$4 sm:$0xff]   ;;  %v4543_v23 = vld [vmem:[%s7145_s2 + $0x240] ss:$16 sps:$4 sm:$0xff]  }
   0xd   :  { %1301 = vmatprep.subr.bf16.mxu1 %v4528_v13  ;;  %v4544_v24 = vld [vmem:[%s7145_s2 + $0x24] ss:$16 sps:$4 sm:$0xff]   ;;  %v4548_v26 = vld [vmem:[%s7145_s2 + $0x20] ss:$16 sps:$4 sm:$0xff]   ;;  %v4615_v13 = vld [vmem:[%s7145_s2 + $0xec] ss:$16 sps:$4 sm:$0xff]  }
   0xe   :  { %v4546_v25 = vld [vmem:[%s7145_s2 + $0x224] ss:$16 sps:$4 sm:$0xff]   ;;  %v4549_v27 = vld [vmem:[%s7145_s2 + $0x220] ss:$16 sps:$4 sm:$0xff]  }
   0xf   :  { %1261 = vmatpush1.bf16.msra.mxu0 %v4530_v14  ;;  %v4550_v28 = vld [vmem:[%s7145_s2 + $0x4] ss:$16 sps:$4 sm:$0xff]   ;;  %v4554_v30 = vld [vmem:[%s7145_s2] ss:$16 sps:$4 sm:$0xff]  }
  0x10   :  { %1302 = vmatpush1.bf16.msra.mxu1 %v4531_v15  ;;  %1262 = vmatprep.subr.bf16.mxu0 %v4532_v16  ;;  %v4552_v29 = vld [vmem:[%s7145_s2 + $0x204] ss:$16 sps:$4 sm:$0xff]   ;;  %v4555_v31 = vld [vmem:[%s7145_s2 + $0x200] ss:$16 sps:$4 sm:$0xff]   ;;  %v5186_v16 = vmov 0  }
  0x11   :  { %1303 = vmatprep.subr.bf16.mxu1 %v4534_v17  ;;  %v4556_v32 = vld [vmem:[%s7145_s2 + $0x1e4] ss:$16 sps:$4 sm:$0xff]   ;;  %v4560_v34 = vld [vmem:[%s7145_s2 + $0x1e0] ss:$16 sps:$4 sm:$0xff]  }
  0x12   :  { %v4558_v33 = vld [vmem:[%s7145_s2 + $0x3e4] ss:$16 sps:$4 sm:$0xff]   ;;  %v4561_v35 = vld [vmem:[%s7145_s2 + $0x3e0] ss:$16 sps:$4 sm:$0xff]  }
  0x13   :  { %1263 = vmatpush1.bf16.msra.mxu0 %v4536_v18  ;;  %v4562_v36 = vld [vmem:[%s7145_s2 + $0x1c4] ss:$16 sps:$4 sm:$0xff]   ;;  %v4566_v38 = vld [vmem:[%s7145_s2 + $0x1c0] ss:$16 sps:$4 sm:$0xff]   ;;  %v4613_v18 = vld [vmem:[%s7145_s2 + $0xe8] ss:$16 sps:$4 sm:$0xff]  }
  0x14   :  { %1304 = vmatpush1.bf16.msra.mxu1 %v4537_v19  ;;  %1264 = vmatprep.subr.bf16.mxu0 %v4538_v20  ;;  %v4564_v37 = vld [vmem:[%s7145_s2 + $0x3c4] ss:$16 sps:$4 sm:$0xff]   ;;  %v4567_v39 = vld [vmem:[%s7145_s2 + $0x3c0] ss:$16 sps:$4 sm:$0xff]  }
  0x15   :  { %1305 = vmatprep.subr.bf16.mxu1 %v4540_v21  ;;  %v4568_v40 = vld [vmem:[%s7145_s2 + $0x1a4] ss:$16 sps:$4 sm:$0xff]   ;;  %v4572_v42 = vld [vmem:[%s7145_s2 + $0x1a0] ss:$16 sps:$4 sm:$0xff]   ;;  %v4621_v21 = vld [vmem:[%s7145_s2 + $0xcc] ss:$16 sps:$4 sm:$0xff]  }
  0x16   :  { %v4570_v41 = vld [vmem:[%s7145_s2 + $0x3a4] ss:$16 sps:$4 sm:$0xff]   ;;  %v4573_v43 = vld [vmem:[%s7145_s2 + $0x3a0] ss:$16 sps:$4 sm:$0xff]  }
  0x17   :  { %1265 = vmatpush1.bf16.msra.mxu0 %v4542_v22  ;;  %v4574_v44 = vld [vmem:[%s7145_s2 + $0x184] ss:$16 sps:$4 sm:$0xff]   ;;  %v4578_v47 = vld [vmem:[%s7145_s2 + $0x180] ss:$16 sps:$4 sm:$0xff]  }
  0x18   :  { %1306 = vmatpush1.bf16.msra.mxu1 %v4543_v23  ;;  %1266 = vmatprep.subr.bf16.mxu0 %v4544_v24  ;;  %v4576_v45 = vld [vmem:[%s7145_s2 + $0x384] ss:$16 sps:$4 sm:$0xff]   ;;  %v4579_v48 = vld [vmem:[%s7145_s2 + $0x380] ss:$16 sps:$4 sm:$0xff]   ;;  %v4619_v23 = vld [vmem:[%s7145_s2 + $0xc8] ss:$16 sps:$4 sm:$0xff]  }
  0x19   :  { %1307 = vmatprep.subr.bf16.mxu1 %v4546_v25  ;;  %v4580_v51 = vld [vmem:[%s7145_s2 + $0x164] ss:$16 sps:$4 sm:$0xff]   ;;  %v4584_v54 = vld [vmem:[%s7145_s2 + $0x160] ss:$16 sps:$4 sm:$0xff]   ;;  %v4627_v25 = vld [vmem:[%s7145_s2 + $0xac] ss:$16 sps:$4 sm:$0xff]  }
  0x1a   :  { %v4582_v53 = vld [vmem:[%s7145_s2 + $0x364] ss:$16 sps:$4 sm:$0xff]   ;;  %v4585_v55 = vld [vmem:[%s7145_s2 + $0x360] ss:$16 sps:$4 sm:$0xff]  }
  0x1b   :  { %1267 = vmatpush1.bf16.msra.mxu0 %v4548_v26  ;;  %v4586_v56 = vld [vmem:[%s7145_s2 + $0x144] ss:$16 sps:$4 sm:$0xff]   ;;  %v4590_v58 = vld [vmem:[%s7145_s2 + $0x140] ss:$16 sps:$4 sm:$0xff]  }
  0x1c   :  { %1308 = vmatpush1.bf16.msra.mxu1 %v4549_v27  ;;  %1268 = vmatprep.subr.bf16.mxu0 %v4550_v28  ;;  %v4588_v57 = vld [vmem:[%s7145_s2 + $0x344] ss:$16 sps:$4 sm:$0xff]   ;;  %v4591_v59 = vld [vmem:[%s7145_s2 + $0x340] ss:$16 sps:$4 sm:$0xff]   ;;  %v4625_v27 = vld [vmem:[%s7145_s2 + $0xa8] ss:$16 sps:$4 sm:$0xff]  }
  0x1d   :  { %1309 = vmatprep.subr.bf16.mxu1 %v4552_v29  ;;  %v4592_v60 = vld [vmem:[%s7145_s2 + $0x124] ss:$16 sps:$4 sm:$0xff]   ;;  %v4596_v62 = vld [vmem:[%s7145_s2 + $0x120] ss:$16 sps:$4 sm:$0xff]   ;;  %v4633_v29 = vld [vmem:[%s7145_s2 + $0x8c] ss:$16 sps:$4 sm:$0xff]  }
  0x1e   :  { %v4594_v61 = vld [vmem:[%s7145_s2 + $0x324] ss:$16 sps:$4 sm:$0xff]   ;;  %v4597_v63 = vld [vmem:[%s7145_s2 + $0x320] ss:$16 sps:$4 sm:$0xff]  }
  0x1f   :  { %1269 = vmatpush1.bf16.msra.mxu0 %v4554_v30  ;;  %v4598_v0 = vld [vmem:[%s7145_s2 + $0x104] ss:$16 sps:$4 sm:$0xff]   ;;  %v4602_v2 = vld [vmem:[%s7145_s2 + $0x100] ss:$16 sps:$4 sm:$0xff]  }
  0x20   :  { %1310 = vmatpush1.bf16.msra.mxu1 %v4555_v31  ;;  %1270 = vmatprep.subr.bf16.mxu0 %v4556_v32  ;;  %v4600_v1 = vld [vmem:[%s7145_s2 + $0x304] ss:$16 sps:$4 sm:$0xff]   ;;  %v4603_v3 = vld [vmem:[%s7145_s2 + $0x300] ss:$16 sps:$4 sm:$0xff]   ;;  %v4631_v31 = vld [vmem:[%s7145_s2 + $0x88] ss:$16 sps:$4 sm:$0xff]  }
  0x21   :  { %1311 = vmatprep.subr.bf16.mxu1 %v4558_v33  ;;  %v38_v4 = vld [vmem:[%s7146_s0] sm:$0xff]  ;;  %v40_v5 = vld [vmem:[%s7146_s0 + $0x10] sm:$0xff]  ;;  %v4639_v33 = vld [vmem:[%s7145_s2 + $0x6c] ss:$16 sps:$4 sm:$0xff]  }
  0x22   :  { %v4606_v6 = vld [vmem:[%s7145_s2 + $0x4e4] ss:$16 sps:$4 sm:$0xff]   ;;  %v5463_v8 = vpack.c.bf16 %v38_v4, %v38_v4  ;;  %v5465_v9 = vpack.c.bf16 %v40_v5, %v40_v5  ;;  %v4604_v10 = vld [vmem:[%s7145_s2 + $0x4e0] ss:$16 sps:$4 sm:$0xff]   ;;  %v4687_v4 = vld [vmem:[%s7145_s2 + $0x16c] ss:$16 sps:$4 sm:$0xff]  }
  0x23   :  { %1271 = vmatpush2.bf16.msra.mxu0 %v4560_v34  ;;  %v4609_v7 = vld [vmem:[%s7145_s2 + $0x604] ss:$16 sps:$4 sm:$0xff]   ;;  %v4607_v11 = vld [vmem:[%s7145_s2 + $0x600] ss:$16 sps:$4 sm:$0xff]  }
  0x24   :  { %1312 = vmatpush2.bf16.msra.mxu1 %v4561_v35  ;;  %1272 = vmatprep.subr.bf16.mxu0 %v4562_v36  ;;  %v4612_v12 = vld [vmem:[%s7145_s2 + $0x4c4] ss:$16 sps:$4 sm:$0xff]   ;;  %v4610_v14 = vld [vmem:[%s7145_s2 + $0x4c0] ss:$16 sps:$4 sm:$0xff]   ;;  %v43_v35 = vld [vmem:[%s7146_s0 + $0x28] sm:$0xff] }
  0x25   :  { %1313 = vmatprep.subr.bf16.mxu1 %v4564_v37  ;;  %v44_v15 = vld [vmem:[%s7146_s0 + $0x30] sm:$0xff]  ;;  %v5547_v36 = vpack.c.bf16 %v43_v35, %v43_v35  ;;  %v4637_v37 = vld [vmem:[%s7145_s2 + $0x68] ss:$16 sps:$4 sm:$0xff]  }
  0x26   :  { %v4618_v17 = vld [vmem:[%s7145_s2 + $0x4a4] ss:$16 sps:$4 sm:$0xff]   ;;  %v5494_v19 = vpack.c.bf16 %v44_v15, %v44_v15  ;;  %v4616_v20 = vld [vmem:[%s7145_s2 + $0x4a0] ss:$16 sps:$4 sm:$0xff]   ;;  %v4724_v35 = vld [vmem:[%s7145_s2 + $0x268] ss:$16 sps:$4 sm:$0xff]  }
  0x27   :  { %1273 = vmatpush2.bf16.msra.mxu0 %v4566_v38  ;;  %v4624_v22 = vld [vmem:[%s7145_s2 + $0x484] ss:$16 sps:$4 sm:$0xff]   ;;  %v4622_v24 = vld [vmem:[%s7145_s2 + $0x480] ss:$16 sps:$4 sm:$0xff]  }
  0x28   :  { %1314 = vmatpush2.bf16.msra.mxu1 %v4567_v39  ;;  %1274 = vmatprep.subr.bf16.mxu0 %v4568_v40  ;;  %v4630_v26 = vld [vmem:[%s7145_s2 + $0x464] ss:$16 sps:$4 sm:$0xff]   ;;  %v4628_v28 = vld [vmem:[%s7145_s2 + $0x460] ss:$16 sps:$4 sm:$0xff]   ;;  %v4645_v39 = vld [vmem:[%s7145_s2 + $0x4c] ss:$16 sps:$4 sm:$0xff]  }
  0x29   :  { %1315 = vmatprep.subr.bf16.mxu1 %v4570_v41  ;;  %v4636_v30 = vld [vmem:[%s7145_s2 + $0x444] ss:$16 sps:$4 sm:$0xff]   ;;  %v4634_v32 = vld [vmem:[%s7145_s2 + $0x440] ss:$16 sps:$4 sm:$0xff]   ;;  %v4643_v41 = vld [vmem:[%s7145_s2 + $0x48] ss:$16 sps:$4 sm:$0xff]  }
  0x2a   :  { %v4642_v34 = vld [vmem:[%s7145_s2 + $0x424] ss:$16 sps:$4 sm:$0xff]   ;;  %v4640_v38 = vld [vmem:[%s7145_s2 + $0x420] ss:$16 sps:$4 sm:$0xff]  }
  0x2b   :  { %1275 = vmatpush2.bf16.msra.mxu0 %v4572_v42  ;;  %v4648_v40 = vld [vmem:[%s7145_s2 + $0x404] ss:$16 sps:$4 sm:$0xff]   ;;  %v4646_v42 = vld [vmem:[%s7145_s2 + $0x400] ss:$16 sps:$4 sm:$0xff]  }
  0x2c   :  { %1316 = vmatpush2.bf16.msra.mxu1 %v4573_v43  ;;  %1276 = vmatprep.subr.bf16.mxu0 %v4574_v44  ;;  %v4651_v43 = vld [vmem:[%s7145_s2 + $0x2c] ss:$16 sps:$4 sm:$0xff]   ;;  %v4654_v44 = vld [vmem:[%s7145_s2 + $0x5e4] ss:$16 sps:$4 sm:$0xff]   ;;  %v4652_v46 = vld [vmem:[%s7145_s2 + $0x5e0] ss:$16 sps:$4 sm:$0xff]  }
  0x2d   :  { %1317 = vmatprep.subr.bf16.mxu1 %v4576_v45  ;;  %v4649_v45 = vld [vmem:[%s7145_s2 + $0x28] ss:$16 sps:$4 sm:$0xff]   ;;  %v4658_v50 = vld [vmem:[%s7145_s2 + $0x5c0] ss:$16 sps:$4 sm:$0xff]   ;;  %v4690_v5 = vld [vmem:[%s7145_s2 + $0x524] ss:$16 sps:$4 sm:$0xff]  }
  0x2e   :  { %v42_v15 = vld [vmem:[%s7146_s0 + $0x20] sm:$0xff] }
  0x2f   :  { %1277 = vmatpush2.bf16.msra.mxu0 %v4578_v47  ;;  %v4657_v47 = vld [vmem:[%s7145_s2 + $0xc] ss:$16 sps:$4 sm:$0xff]  }
  0x30   :  { %1318 = vmatpush2.bf16.msra.mxu1 %v4579_v48  ;;  %1278 = vmatprep.subr.bf16.mxu0 %v4580_v51  ;;  %v4660_v48 = vld [vmem:[%s7145_s2 + $0x5c4] ss:$16 sps:$4 sm:$0xff]   ;;  %v4663_v51 = vld [vmem:[%s7145_s2 + $0x1ec] ss:$16 sps:$4 sm:$0xff]  }
  0x31   :  { %1319 = vmatprep.subr.bf16.mxu1 %v4582_v53  ;;  %v4666_v53 = vld [vmem:[%s7145_s2 + $0x5a4] ss:$16 sps:$4 sm:$0xff]  }
  0x33   :  { %1279 = vmatpush2.bf16.msra.mxu0 %v4584_v54  ;;  %v4661_v54 = vld [vmem:[%s7145_s2 + $0x1e8] ss:$16 sps:$4 sm:$0xff]  }
  0x34   :  { %1320 = vmatpush2.bf16.msra.mxu1 %v4585_v55  ;;  %1280 = vmatprep.subr.bf16.mxu0 %v4586_v56  ;;  %v4664_v55 = vld [vmem:[%s7145_s2 + $0x5a0] ss:$16 sps:$4 sm:$0xff]   ;;  %v4669_v56 = vld [vmem:[%s7145_s2 + $0x1cc] ss:$16 sps:$4 sm:$0xff]  }
  0x35   :  { %1321 = vmatprep.subr.bf16.mxu1 %v4588_v57  ;;  %v4672_v57 = vld [vmem:[%s7145_s2 + $0x584] ss:$16 sps:$4 sm:$0xff]  }
  0x37   :  { %1281 = vmatpush2.bf16.msra.mxu0 %v4590_v58  ;;  %v4667_v58 = vld [vmem:[%s7145_s2 + $0x1c8] ss:$16 sps:$4 sm:$0xff]  }
  0x38   :  { %1322 = vmatpush2.bf16.msra.mxu1 %v4591_v59  ;;  %1282 = vmatprep.subr.bf16.mxu0 %v4592_v60  ;;  %v4670_v59 = vld [vmem:[%s7145_s2 + $0x580] ss:$16 sps:$4 sm:$0xff]   ;;  %v4675_v60 = vld [vmem:[%s7145_s2 + $0x1ac] ss:$16 sps:$4 sm:$0xff]  }
  0x39   :  { %1323 = vmatprep.subr.bf16.mxu1 %v4594_v61  ;;  %v4678_v61 = vld [vmem:[%s7145_s2 + $0x564] ss:$16 sps:$4 sm:$0xff]  }
  0x3b   :  { %1283 = vmatpush2.bf16.msra.mxu0 %v4596_v62  ;;  %v4673_v62 = vld [vmem:[%s7145_s2 + $0x1a8] ss:$16 sps:$4 sm:$0xff]  }
  0x3c   :  { %1324 = vmatpush2.bf16.msra.mxu1 %v4597_v63  ;;  %1284 = vmatprep.subr.bf16.mxu0 %v4598_v0  ;;  %v4676_v63 = vld [vmem:[%s7145_s2 + $0x560] ss:$16 sps:$4 sm:$0xff]   ;;  %v4681_v0 = vld [vmem:[%s7145_s2 + $0x18c] ss:$16 sps:$4 sm:$0xff]  }
  0x3d   :  { %1325 = vmatprep.subr.bf16.mxu1 %v4600_v1  ;;  %v4684_v1 = vld [vmem:[%s7145_s2 + $0x544] ss:$16 sps:$4 sm:$0xff]  }
  0x3f   :  { %1285 = vmatpush2.bf16.msra.mxu0 %v4602_v2  ;;  %v4679_v2 = vld [vmem:[%s7145_s2 + $0x188] ss:$16 sps:$4 sm:$0xff]  }
  0x40   :  { %1326 = vmatpush2.bf16.msra.mxu1 %v4603_v3  ;;  %1336 = vmatprep.subr.bf16.mxu0 %v4606_v6  ;;  %v4682_v3 = vld [vmem:[%s7145_s2 + $0x540] ss:$16 sps:$4 sm:$0xff]   ;;  %v4685_v6 = vld [vmem:[%s7145_s2 + $0x168] ss:$16 sps:$4 sm:$0xff]  }
  0x41   :  { %1391 = vmatprep.subr.bf16.mxu1 %v4609_v7  ;;  %v4688_v7 = vld [vmem:[%s7145_s2 + $0x520] ss:$16 sps:$4 sm:$0xff]  }
  0x42   :  { %1287 = vmatmul.mubr.bf16.vlgmr.msra.gmra.mxu0 %v5463_v8 }
  0x43   :  { %1328 = vmatmul.mubr.bf16.vlgmr.msra.gmra.mxu1 %v5465_v9  ;;  %1337 = vmatpush1.bf16.msra.mxu0 %v4604_v10  ;;  %v4693_v10 = vld [vmem:[%s7145_s2 + $0x14c] ss:$16 sps:$4 sm:$0xff]  }
  0x44   :  { %1392 = vmatpush1.bf16.msra.mxu1 %v4607_v11  ;;  %1338 = vmatprep.subr.bf16.mxu0 %v4612_v12  ;;  %v4696_v11 = vld [vmem:[%s7145_s2 + $0x504] ss:$16 sps:$4 sm:$0xff]   ;;  %v4691_v12 = vld [vmem:[%s7145_s2 + $0x148] ss:$16 sps:$4 sm:$0xff]  }
  0x45   :  { %1409 = vmatprep.mubr.bf16.mxu1 %v5186_v16  ;;  %1418 = vmatprep.subr.bf16.mxu1 %v4615_v13  ;;  %v4694_v13 = vld [vmem:[%s7145_s2 + $0x500] ss:$16 sps:$4 sm:$0xff]  }
  0x46   :  { %1368 = vmatprep.mubr.bf16.mxu0 %v5547_v36 }
  0x47   :  { %1339 = vmatpush1.bf16.msra.mxu0 %v4610_v14  ;;  %v4699_v14 = vld [vmem:[%s7145_s2 + $0x12c] ss:$16 sps:$4 sm:$0xff]  }
  0x48   :  { %1340 = vmatprep.subr.bf16.mxu0 %v4618_v17  ;;  %v4702_v17 = vld [vmem:[%s7145_s2 + $0x2ec] ss:$16 sps:$4 sm:$0xff]  }
  0x4b   :  { %4197 = vmatmul.mubr.msk.bf16.vlgmr.msra.gmra.mxu1 %vm1250_vm0, %v5494_v19  ;;  %1341 = vmatpush1.bf16.msra.mxu0 %v4616_v20  ;;  %v5676_v20 = vpack.c.bf16 %v42_v15, %v42_v15  ;;  %v4789_v15 = vld [vmem:[%s7145_s2 + $0x54c] ss:$16 sps:$4 sm:$0xff]  }
  0x4c   :  { %1419 = vmatpush1.bf16.msra.mxu1 %v4613_v18  ;;  %1342 = vmatprep.subr.bf16.mxu0 %v4624_v22  ;;  %v4697_v18 = vld [vmem:[%s7145_s2 + $0x128] ss:$16 sps:$4 sm:$0xff]   ;;  %v4705_v22 = vld [vmem:[%s7145_s2 + $0x10c] ss:$16 sps:$4 sm:$0xff]  }
  0x4d   :  { %1420 = vmatprep.subr.bf16.mxu1 %v4621_v21  ;;  %1450 = vmatprep.mubr.bf16.mxu1 %v5394_v49  ;;  %v4655_v49 = vld [vmem:[%s7145_s2 + $0x8] ss:$16 sps:$4 sm:$0xff]  }
  0x4e   :  { %v4700_v21 = vld [vmem:[%s7145_s2 + $0x2e8] ss:$16 sps:$4 sm:$0xff]  }
  0x4f   :  { %1343 = vmatpush1.bf16.msra.mxu0 %v4622_v24  ;;  %v4703_v24 = vld [vmem:[%s7145_s2 + $0x108] ss:$16 sps:$4 sm:$0xff]  }
  0x50   :  { %1421 = vmatpush1.bf16.msra.mxu1 %v4619_v23  ;;  %1344 = vmatprep.subr.bf16.mxu0 %v4630_v26  ;;  %v4708_v23 = vld [vmem:[%s7145_s2 + $0x2cc] ss:$16 sps:$4 sm:$0xff]  }
  0x51   :  { %1422 = vmatprep.subr.bf16.mxu1 %v4627_v25  ;;  %v4706_v25 = vld [vmem:[%s7145_s2 + $0x2c8] ss:$16 sps:$4 sm:$0xff]   ;;  %v4711_v26 = vld [vmem:[%s7145_s2 + $0x4ec] ss:$16 sps:$4 sm:$0xff]  }
  0x53   :  { %1345 = vmatpush1.bf16.msra.mxu0 %v4628_v28  ;;  %v4709_v28 = vld [vmem:[%s7145_s2 + $0x4e8] ss:$16 sps:$4 sm:$0xff]  }
  0x54   :  { %1423 = vmatpush1.bf16.msra.mxu1 %v4625_v27  ;;  %1346 = vmatprep.subr.bf16.mxu0 %v4636_v30  ;;  %v4714_v27 = vld [vmem:[%s7145_s2 + $0x2ac] ss:$16 sps:$4 sm:$0xff]  }
  0x55   :  { %1424 = vmatprep.subr.bf16.mxu1 %v4633_v29  ;;  %v4712_v29 = vld [vmem:[%s7145_s2 + $0x2a8] ss:$16 sps:$4 sm:$0xff]   ;;  %v4717_v30 = vld [vmem:[%s7145_s2 + $0x4cc] ss:$16 sps:$4 sm:$0xff]  }
  0x57   :  { %1347 = vmatpush1.bf16.msra.mxu0 %v4634_v32  ;;  %v4718_v32 = vld [vmem:[%s7145_s2 + $0x288] ss:$16 sps:$4 sm:$0xff]  }
  0x58   :  { %1425 = vmatpush1.bf16.msra.mxu1 %v4631_v31  ;;  %1348 = vmatprep.subr.bf16.mxu0 %v4642_v34  ;;  %v4715_v31 = vld [vmem:[%s7145_s2 + $0x4c8] ss:$16 sps:$4 sm:$0xff]  }
  0x59   :  { %1426 = vmatprep.subr.bf16.mxu1 %v4639_v33  ;;  %v4723_v33 = vld [vmem:[%s7145_s2 + $0x4ac] ss:$16 sps:$4 sm:$0xff]   ;;  %v4721_v34 = vld [vmem:[%s7145_s2 + $0x4a8] ss:$16 sps:$4 sm:$0xff]  }
  0x5b   :  { %1349 = vmatpush1.bf16.msra.mxu0 %v4640_v38  ;;  %v4727_v38 = vld [vmem:[%s7145_s2 + $0x488] ss:$16 sps:$4 sm:$0xff]  }
  0x5c   :  { %1427 = vmatpush1.bf16.msra.mxu1 %v4637_v37  ;;  %1350 = vmatprep.subr.bf16.mxu0 %v4648_v40  ;;  %v4729_v37 = vld [vmem:[%s7145_s2 + $0x48c] ss:$16 sps:$4 sm:$0xff]  }
  0x5d   :  { %1428 = vmatprep.subr.bf16.mxu1 %v4645_v39  ;;  %v4730_v39 = vld [vmem:[%s7145_s2 + $0x248] ss:$16 sps:$4 sm:$0xff]   ;;  %v4735_v40 = vld [vmem:[%s7145_s2 + $0x46c] ss:$16 sps:$4 sm:$0xff]  }
  0x5f   :  { %1351 = vmatpush1.bf16.msra.mxu0 %v4646_v42  ;;  %v4733_v42 = vld [vmem:[%s7145_s2 + $0x468] ss:$16 sps:$4 sm:$0xff]  }
  0x60   :  { %1429 = vmatpush1.bf16.msra.mxu1 %v4643_v41  ;;  %1352 = vmatprep.subr.bf16.mxu0 %v4654_v44  ;;  %v4738_v41 = vld [vmem:[%s7145_s2 + $0x22c] ss:$16 sps:$4 sm:$0xff]  }
  0x61   :  { %1430 = vmatprep.subr.bf16.mxu1 %v4651_v43  ;;  %v4736_v43 = vld [vmem:[%s7145_s2 + $0x228] ss:$16 sps:$4 sm:$0xff]   ;;  %v4741_v44 = vld [vmem:[%s7145_s2 + $0x44c] ss:$16 sps:$4 sm:$0xff]  }
  0x63   :  { %1353 = vmatpush2.bf16.msra.mxu0 %v4652_v46  ;;  %v4739_v46 = vld [vmem:[%s7145_s2 + $0x448] ss:$16 sps:$4 sm:$0xff]  }
  0x64   :  { %1431 = vmatpush1.bf16.msra.mxu1 %v4649_v45  ;;  %1354 = vmatprep.subr.bf16.mxu0 %v4660_v48  ;;  %v4744_v45 = vld [vmem:[%s7145_s2 + $0x20c] ss:$16 sps:$4 sm:$0xff]  }
  0x65   :  { %1432 = vmatprep.subr.bf16.mxu1 %v4657_v47  ;;  %v4742_v47 = vld [vmem:[%s7145_s2 + $0x208] ss:$16 sps:$4 sm:$0xff]   ;;  %v4747_v48 = vld [vmem:[%s7145_s2 + $0x42c] ss:$16 sps:$4 sm:$0xff]  }
  0x67   :  { %1355 = vmatpush2.bf16.msra.mxu0 %v4658_v50  ;;  %v4745_v50 = vld [vmem:[%s7145_s2 + $0x428] ss:$16 sps:$4 sm:$0xff]  }
  0x68   :  { %1433 = vmatpush1.bf16.msra.mxu1 %v4655_v49  ;;  %1356 = vmatprep.subr.bf16.mxu0 %v4666_v53  ;;  %v4750_v49 = vld [vmem:[%s7145_s2 + $0x3ec] ss:$16 sps:$4 sm:$0xff]  }
  0x69   :  { %1434 = vmatprep.subr.bf16.mxu1 %v4663_v51  ;;  %v4748_v51 = vld [vmem:[%s7145_s2 + $0x3e8] ss:$16 sps:$4 sm:$0xff]   ;;  %v4753_v53 = vld [vmem:[%s7145_s2 + $0x40c] ss:$16 sps:$4 sm:$0xff]  }
  0x6b   :  { %1357 = vmatpush2.bf16.msra.mxu0 %v4664_v55  ;;  %v4751_v55 = vld [vmem:[%s7145_s2 + $0x408] ss:$16 sps:$4 sm:$0xff]  }
  0x6c   :  { %1435 = vmatpush2.bf16.msra.mxu1 %v4661_v54  ;;  %1358 = vmatprep.subr.bf16.mxu0 %v4672_v57  ;;  %v4756_v54 = vld [vmem:[%s7145_s2 + $0x3cc] ss:$16 sps:$4 sm:$0xff]  }
  0x6d   :  { %1436 = vmatprep.subr.bf16.mxu1 %v4669_v56  ;;  %v4754_v56 = vld [vmem:[%s7145_s2 + $0x3c8] ss:$16 sps:$4 sm:$0xff]   ;;  %v4759_v57 = vld [vmem:[%s7145_s2 + $0x5ec] ss:$16 sps:$4 sm:$0xff]  }
  0x6f   :  { %1359 = vmatpush2.bf16.msra.mxu0 %v4670_v59  ;;  %v4757_v59 = vld [vmem:[%s7145_s2 + $0x5e8] ss:$16 sps:$4 sm:$0xff]  }
  0x70   :  { %1437 = vmatpush2.bf16.msra.mxu1 %v4667_v58  ;;  %1360 = vmatprep.subr.bf16.mxu0 %v4678_v61  ;;  %v4762_v58 = vld [vmem:[%s7145_s2 + $0x3ac] ss:$16 sps:$4 sm:$0xff]  }
  0x71   :  { %1438 = vmatprep.subr.bf16.mxu1 %v4675_v60  ;;  %v4760_v60 = vld [vmem:[%s7145_s2 + $0x3a8] ss:$16 sps:$4 sm:$0xff]   ;;  %v4765_v61 = vld [vmem:[%s7145_s2 + $0x5cc] ss:$16 sps:$4 sm:$0xff]  }
  0x73   :  { %1361 = vmatpush2.bf16.msra.mxu0 %v4676_v63  ;;  %v4763_v63 = vld [vmem:[%s7145_s2 + $0x5c8] ss:$16 sps:$4 sm:$0xff]  }
  0x74   :  { %1439 = vmatpush2.bf16.msra.mxu1 %v4673_v62  ;;  %1362 = vmatprep.subr.bf16.mxu0 %v4684_v1  ;;  %v4768_v62 = vld [vmem:[%s7145_s2 + $0x38c] ss:$16 sps:$4 sm:$0xff]  }
  0x75   :  { %1440 = vmatprep.subr.bf16.mxu1 %v4681_v0  ;;  %v4766_v0 = vld [vmem:[%s7145_s2 + $0x388] ss:$16 sps:$4 sm:$0xff]   ;;  %v4771_v1 = vld [vmem:[%s7145_s2 + $0x5ac] ss:$16 sps:$4 sm:$0xff]  }
  0x77   :  { %1363 = vmatpush2.bf16.msra.mxu0 %v4682_v3  ;;  %v4769_v3 = vld [vmem:[%s7145_s2 + $0x5a8] ss:$16 sps:$4 sm:$0xff]  }
  0x78   :  { %1441 = vmatpush2.bf16.msra.mxu1 %v4679_v2  ;;  %1364 = vmatprep.subr.bf16.mxu0 %v4690_v5  ;;  %v4774_v2 = vld [vmem:[%s7145_s2 + $0x36c] ss:$16 sps:$4 sm:$0xff]  }
  0x79   :  { %1442 = vmatprep.subr.bf16.mxu1 %v4687_v4  ;;  %v4772_v4 = vld [vmem:[%s7145_s2 + $0x368] ss:$16 sps:$4 sm:$0xff]   ;;  %v4777_v5 = vld [vmem:[%s7145_s2 + $0x58c] ss:$16 sps:$4 sm:$0xff]  }
  0x7b   :  { %1365 = vmatpush2.bf16.msra.mxu0 %v4688_v7  ;;  %v4775_v7 = vld [vmem:[%s7145_s2 + $0x588] ss:$16 sps:$4 sm:$0xff]  }
  0x7c   :  { %1443 = vmatpush2.bf16.msra.mxu1 %v4685_v6  ;;  %1366 = vmatprep.subr.bf16.mxu0 %v4696_v11  ;;  %v4780_v6 = vld [vmem:[%s7145_s2 + $0x34c] ss:$16 sps:$4 sm:$0xff]  }
  0x7d   :  { %1444 = vmatprep.subr.bf16.mxu1 %v4693_v10  ;;  %v4778_v10 = vld [vmem:[%s7145_s2 + $0x348] ss:$16 sps:$4 sm:$0xff]   ;;  %v4783_v11 = vld [vmem:[%s7145_s2 + $0x56c] ss:$16 sps:$4 sm:$0xff]  }
  0x7f   :  { %1367 = vmatpush2.bf16.msra.mxu0 %v4694_v13  ;;  %v4781_v13 = vld [vmem:[%s7145_s2 + $0x568] ss:$16 sps:$4 sm:$0xff]  }
  0x80   :  { %1445 = vmatpush2.bf16.msra.mxu1 %v4691_v12  ;;  %1459 = vmatprep.subr.bf16.mxu0 %v4702_v17  ;;  %v4786_v12 = vld [vmem:[%s7145_s2 + $0x32c] ss:$16 sps:$4 sm:$0xff]  }
  0x81   :  { %1446 = vmatprep.subr.bf16.mxu1 %v4699_v14  ;;  %v4784_v14 = vld [vmem:[%s7145_s2 + $0x328] ss:$16 sps:$4 sm:$0xff]   ;;  %v4792_v17 = vld [vmem:[%s7145_s2 + $0x30c] ss:$16 sps:$4 sm:$0xff]  }
  0x82   :  { %1369 = vmatmul.mubr.bf16.vlgmr.msra.gmra.mxu0 %v5676_v20 }
  0x83   :  { %1460 = vmatpush1.bf16.msra.mxu0 %v4700_v21  ;;  %1491 = vmatprep.mubr.bf16.mxu0 %v5402_v52  ;;  %v4720_v52 = vld [vmem:[%s7145_s2 + $0x28c] ss:$16 sps:$4 sm:$0xff]   ;;  %v4790_v21 = vld [vmem:[%s7145_s2 + $0x308] ss:$16 sps:$4 sm:$0xff]  }
  0x84   :  { %1447 = vmatpush2.bf16.msra.mxu1 %v4697_v18  ;;  %1461 = vmatprep.subr.bf16.mxu0 %v4708_v23  ;;  %v4787_v18 = vld [vmem:[%s7145_s2 + $0x548] ss:$16 sps:$4 sm:$0xff]   ;;  %v4798_v23 = vld [vmem:[%s7145_s2 + $0x60c] ss:$16 sps:$4 sm:$0xff]  }
  0x85   :  { %1448 = vmatprep.subr.bf16.mxu1 %v4705_v22  ;;  %v4795_v22 = vld [vmem:[%s7145_s2 + $0x52c] ss:$16 sps:$4 sm:$0xff]  }
  0x87   :  { %1462 = vmatpush1.bf16.msra.mxu0 %v4706_v25  ;;  %v4796_v25 = vld [vmem:[%s7145_s2 + $0x608] ss:$16 sps:$4 sm:$0xff]  }
  0x88   :  { %1449 = vmatpush2.bf16.msra.mxu1 %v4703_v24  ;;  %1463 = vmatprep.subr.bf16.mxu0 %v4714_v27  ;;  %v4793_v24 = vld [vmem:[%s7145_s2 + $0x528] ss:$16 sps:$4 sm:$0xff]  }
  0x89   :  { %1500 = vmatprep.subr.bf16.mxu1 %v4711_v26  ;;  %v4801_v26 = vld [vmem:[%s7145_s2 + $0x50c] ss:$16 sps:$4 sm:$0xff]  }
  0x8a   :  { %v1617_v27 = vld [vmem:[%s7147_s4 + $0xf8] sm:$0xff] }
  0x8b   :  { %1451 = vmatmul.mubr.bf16.vlgmr.msra.gmra.mxu1 %v5463_v8  ;;  %1464 = vmatpush1.bf16.msra.mxu0 %v4712_v29  ;;  %v4726_v8 = vld [vmem:[%s7145_s2 + $0x26c] ss:$16 sps:$4 sm:$0xff]   ;;  %v1616_v29 = vld [vmem:[%s7147_s4 + $0xf0] sm:$0xff] }
  0x8c   :  { %1501 = vmatpush1.bf16.msra.mxu1 %v4709_v28  ;;  %1465 = vmatprep.subr.bf16.mxu0 %v4720_v52  ;;  %v4799_v28 = vld [vmem:[%s7145_s2 + $0x508] ss:$16 sps:$4 sm:$0xff]  }
  0x8d   :  { %1502 = vmatprep.subr.bf16.mxu1 %v4717_v30  ;;  %1532 = vmatprep.mubr.bf16.mxu1 %v5547_v36  ;;  %v4732_v36 = vld [vmem:[%s7145_s2 + $0x24c] ss:$16 sps:$4 sm:$0xff]   ;;  %v1614_v30 = vld [vmem:[%s7147_s4 + $0xe0] sm:$0xff] }
  0x8e   :  { %v1613_v52 = vld [vmem:[%s7147_s4 + $0xd8] sm:$0xff] }
  0x8f   :  { %1466 = vmatpush1.bf16.msra.mxu0 %v4718_v32  ;;  %v1609_v32 = vld [vmem:[%s7147_s4 + $0xb8] sm:$0xff] }
  0x90   :  { %1503 = vmatpush1.bf16.msra.mxu1 %v4715_v31  ;;  %1467 = vmatprep.subr.bf16.mxu0 %v4726_v8  ;;  %v1612_v31 = vld [vmem:[%s7147_s4 + $0xd0] sm:$0xff]  ;;  %v1681_v8 = vld [vmem:[%s7147_s4 + $0x2f8] sm:$0xff] }
  0x91   :  { %1504 = vmatprep.subr.bf16.mxu1 %v4723_v33  ;;  %v1608_v33 = vld [vmem:[%s7147_s4 + $0xb0] sm:$0xff] }
  0x93   :  { %1468 = vmatpush1.bf16.msra.mxu0 %v4724_v35  ;;  %v1679_v35 = vld [vmem:[%s7147_s4 + $0x2e8] sm:$0xff] }
  0x94   :  { %1505 = vmatpush1.bf16.msra.mxu1 %v4721_v34  ;;  %1469 = vmatprep.subr.bf16.mxu0 %v4732_v36  ;;  %v1680_v34 = vld [vmem:[%s7147_s4 + $0x2f0] sm:$0xff]  ;;  %v1678_v36 = vld [vmem:[%s7147_s4 + $0x2e0] sm:$0xff] }
  0x95   :  { %1506 = vmatprep.subr.bf16.mxu1 %v4729_v37  ;;  %v1607_v37 = vld [vmem:[%s7147_s4 + $0xa8] sm:$0xff] }
  0x97   :  { %1470 = vmatpush1.bf16.msra.mxu0 %v4730_v39  ;;  %v1677_v39 = vld [vmem:[%s7147_s4 + $0x2d8] sm:$0xff] }
  0x98   :  { %1507 = vmatpush1.bf16.msra.mxu1 %v4727_v38  ;;  %1471 = vmatprep.subr.bf16.mxu0 %v4738_v41  ;;  %v1606_v38 = vld [vmem:[%s7147_s4 + $0xa0] sm:$0xff]  ;;  %v1676_v41 = vld [vmem:[%s7147_s4 + $0x2d0] sm:$0xff] }
  0x99   :  { %1508 = vmatprep.subr.bf16.mxu1 %v4735_v40  ;;  %v1605_v40 = vld [vmem:[%s7147_s4 + $0x98] sm:$0xff] }
  0x9b   :  { %1472 = vmatpush1.bf16.msra.mxu0 %v4736_v43  ;;  %v1675_v43 = vld [vmem:[%s7147_s4 + $0x2c8] sm:$0xff] }
  0x9c   :  { %1509 = vmatpush1.bf16.msra.mxu1 %v4733_v42  ;;  %1473 = vmatprep.subr.bf16.mxu0 %v4744_v45  ;;  %v1604_v42 = vld [vmem:[%s7147_s4 + $0x90] sm:$0xff]  ;;  %v1674_v45 = vld [vmem:[%s7147_s4 + $0x2c0] sm:$0xff] }
  0x9d   :  { %1510 = vmatprep.subr.bf16.mxu1 %v4741_v44  ;;  %v1603_v44 = vld [vmem:[%s7147_s4 + $0x88] sm:$0xff] }
  0x9f   :  { %1474 = vmatpush1.bf16.msra.mxu0 %v4742_v47  ;;  %v1673_v47 = vld [vmem:[%s7147_s4 + $0x2b8] sm:$0xff] }
  0xa0   :  { %1511 = vmatpush1.bf16.msra.mxu1 %v4739_v46  ;;  %1475 = vmatprep.subr.bf16.mxu0 %v4750_v49  ;;  %v1602_v46 = vld [vmem:[%s7147_s4 + $0x80] sm:$0xff]  ;;  %v1672_v49 = vld [vmem:[%s7147_s4 + $0x2b0] sm:$0xff] }
  0xa1   :  { %1512 = vmatprep.subr.bf16.mxu1 %v4747_v48  ;;  %v1601_v48 = vld [vmem:[%s7147_s4 + $0x78] sm:$0xff] }
  0xa3   :  { %1476 = vmatpush2.bf16.msra.mxu0 %v4748_v51  ;;  %v1671_v51 = vld [vmem:[%s7147_s4 + $0x2a8] sm:$0xff] }
  0xa4   :  { %1513 = vmatpush1.bf16.msra.mxu1 %v4745_v50  ;;  %1477 = vmatprep.subr.bf16.mxu0 %v4756_v54  ;;  %v1600_v50 = vld [vmem:[%s7147_s4 + $0x70] sm:$0xff]  ;;  %v1670_v54 = vld [vmem:[%s7147_s4 + $0x2a0] sm:$0xff] }
  0xa5   :  { %1514 = vmatprep.subr.bf16.mxu1 %v4753_v53  ;;  %v1599_v53 = vld [vmem:[%s7147_s4 + $0x68] sm:$0xff] }
  0xa7   :  { %1478 = vmatpush2.bf16.msra.mxu0 %v4754_v56  ;;  %v1669_v56 = vld [vmem:[%s7147_s4 + $0x298] sm:$0xff] }
  0xa8   :  { %1515 = vmatpush1.bf16.msra.mxu1 %v4751_v55  ;;  %1479 = vmatprep.subr.bf16.mxu0 %v4762_v58  ;;  %v1598_v55 = vld [vmem:[%s7147_s4 + $0x60] sm:$0xff]  ;;  %v1668_v58 = vld [vmem:[%s7147_s4 + $0x290] sm:$0xff] }
  0xa9   :  { %1516 = vmatprep.subr.bf16.mxu1 %v4759_v57  ;;  %v1597_v57 = vld [vmem:[%s7147_s4 + $0x58] sm:$0xff] }
  0xab   :  { %1480 = vmatpush2.bf16.msra.mxu0 %v4760_v60  ;;  %v1667_v60 = vld [vmem:[%s7147_s4 + $0x288] sm:$0xff] }
  0xac   :  { %1517 = vmatpush2.bf16.msra.mxu1 %v4757_v59  ;;  %1481 = vmatprep.subr.bf16.mxu0 %v4768_v62  ;;  %v1596_v59 = vld [vmem:[%s7147_s4 + $0x50] sm:$0xff]  ;;  %v1666_v62 = vld [vmem:[%s7147_s4 + $0x280] sm:$0xff] }
  0xad   :  { %1518 = vmatprep.subr.bf16.mxu1 %v4765_v61  ;;  %v1595_v61 = vld [vmem:[%s7147_s4 + $0x48] sm:$0xff] }
  0xaf   :  { %1482 = vmatpush2.bf16.msra.mxu0 %v4766_v0  ;;  %v1665_v0 = vld [vmem:[%s7147_s4 + $0x278] sm:$0xff] }
  0xb0   :  { %1519 = vmatpush2.bf16.msra.mxu1 %v4763_v63  ;;  %1483 = vmatprep.subr.bf16.mxu0 %v4774_v2  ;;  %v1594_v63 = vld [vmem:[%s7147_s4 + $0x40] sm:$0xff]  ;;  %v1664_v2 = vld [vmem:[%s7147_s4 + $0x270] sm:$0xff] }
  0xb1   :  { %1520 = vmatprep.subr.bf16.mxu1 %v4771_v1  ;;  %v1593_v1 = vld [vmem:[%s7147_s4 + $0x38] sm:$0xff] }
  0xb3   :  { %1484 = vmatpush2.bf16.msra.mxu0 %v4772_v4  ;;  %v1663_v4 = vld [vmem:[%s7147_s4 + $0x268] sm:$0xff] }
  0xb4   :  { %1521 = vmatpush2.bf16.msra.mxu1 %v4769_v3  ;;  %1485 = vmatprep.subr.bf16.mxu0 %v4780_v6  ;;  %v1592_v3 = vld [vmem:[%s7147_s4 + $0x30] sm:$0xff]  ;;  %v1662_v6 = vld [vmem:[%s7147_s4 + $0x260] sm:$0xff] }
  0xb5   :  { %1522 = vmatprep.subr.bf16.mxu1 %v4777_v5  ;;  %v1591_v5 = vld [vmem:[%s7147_s4 + $0x28] sm:$0xff] }
  0xb7   :  { %1486 = vmatpush2.bf16.msra.mxu0 %v4778_v10  ;;  %v1661_v10 = vld [vmem:[%s7147_s4 + $0x258] sm:$0xff] }
  0xb8   :  { %1523 = vmatpush2.bf16.msra.mxu1 %v4775_v7  ;;  %1487 = vmatprep.subr.bf16.mxu0 %v4786_v12  ;;  %v1590_v7 = vld [vmem:[%s7147_s4 + $0x20] sm:$0xff]  ;;  %v1660_v12 = vld [vmem:[%s7147_s4 + $0x250] sm:$0xff] }
  0xb9   :  { %1524 = vmatprep.subr.bf16.mxu1 %v4783_v11  ;;  %v1589_v11 = vld [vmem:[%s7147_s4 + $0x18] sm:$0xff] }
  0xbb   :  { %1488 = vmatpush2.bf16.msra.mxu0 %v4784_v14  ;;  %v1659_v14 = vld [vmem:[%s7147_s4 + $0x248] sm:$0xff] }
  0xbc   :  { %1525 = vmatpush2.bf16.msra.mxu1 %v4781_v13  ;;  %1489 = vmatprep.subr.bf16.mxu0 %v4792_v17  ;;  %v1588_v13 = vld [vmem:[%s7147_s4 + $0x10] sm:$0xff]  ;;  %v1658_v17 = vld [vmem:[%s7147_s4 + $0x240] sm:$0xff] }
  0xbd   :  { %1526 = vmatprep.subr.bf16.mxu1 %v4789_v15  ;;  %v1587_v15 = vld [vmem:[%s7147_s4 + $0x8] sm:$0xff] }
  0xbf   :  { %1490 = vmatpush2.bf16.msra.mxu0 %v4790_v21  ;;  %v1657_v21 = vld [vmem:[%s7147_s4 + $0x238] sm:$0xff] }
  0xc0   :  { %1527 = vmatpush2.bf16.msra.mxu1 %v4787_v18  ;;  %1555 = vmatprep.subr.bf16.mxu0 %v4798_v23  ;;  %v1586_v18 = vld [vmem:[%s7147_s4] sm:$0xff]  ;;  %v1656_v23 = vld [vmem:[%s7147_s4 + $0x230] sm:$0xff] }
  0xc1   :  { %1528 = vmatprep.subr.bf16.mxu1 %v4795_v22  ;;  %v1649_v22 = vld [vmem:[%s7147_s4 + $0x1f8] sm:$0xff] }
  0xc2   :  { %1492 = vmatmul.mubr.bf16.vlgmr.msra.gmra.mxu0 %v5465_v9  ;;  %v1615_v9 = vld [vmem:[%s7147_s4 + $0xe8] sm:$0xff] }
  0xc3   :  { %1556 = vmatpush1.bf16.msra.mxu0 %v4796_v25  ;;  %1573 = vmatprep.mubr.bf16.mxu0 %v5186_v16  ;;  %v1655_v25 = vld [vmem:[%s7147_s4 + $0x228] sm:$0xff] }
  0xc4   :  { %1529 = vmatpush2.bf16.msra.mxu1 %v4793_v24  ;;  %1726 = vmatprep.subr.mxu0 %v1617_v27  ;;  %v1648_v24 = vld [vmem:[%s7147_s4 + $0x1f0] sm:$0xff]  ;;  %v1654_v27 = vld [vmem:[%s7147_s4 + $0x220] sm:$0xff] }
  0xc5   :  { %1530 = vmatprep.subr.bf16.mxu1 %v4801_v26  ;;  %v1647_v26 = vld [vmem:[%s7147_s4 + $0x1e8] sm:$0xff] }
  0xc8   :  { %1531 = vmatpush2.bf16.msra.mxu1 %v4799_v28  ;;  %v1646_v28 = vld [vmem:[%s7147_s4 + $0x1e0] sm:$0xff] }
  0xc9   :  { %1797 = vmatprep.subr.mxu1 %v1681_v8  ;;  %v1641_v8 = vld [vmem:[%s7147_s4 + $0x1b8] sm:$0xff] }
  0xca   :  { %4198 = vmatmul.mubr.msk.bf16.vlgmr.msra.gmra.mxu0 %vm1250_vm0, %v5494_v19  ;;  %v1610_v19 = vld [vmem:[%s7147_s4 + $0xc0] sm:$0xff] }
  0xcb   :  { %1533 = vmatmul.mubr.bf16.vlgmr.msra.gmra.mxu1 %v5676_v20  ;;  %1727 = vmatpush1.msra.mxu0 %v1616_v29  ;;  %v1611_v20 = vld [vmem:[%s7147_s4 + $0xc8] sm:$0xff]  ;;  %v1653_v29 = vld [vmem:[%s7147_s4 + $0x218] sm:$0xff] }
  0xcc   :  { %1728 = vmatprep.subr.mxu0 %v1615_v9  ;;  %1798 = vmatpush1.msra.mxu1 %v1680_v34  ;;  %v1645_v9 = vld [vmem:[%s7147_s4 + $0x1d8] sm:$0xff]  ;;  %v1712_v34 = vld [vmem:[%s7147_s4 + $0x3f0] sm:$0xff] }
  0xcd   :  { %1729 = vmatpush1.msra.mxu0 %v1614_v30  ;;  %1799 = vmatprep.subr.mxu1 %v1679_v35  ;;  %v1652_v30 = vld [vmem:[%s7147_s4 + $0x210] sm:$0xff] }
  0xce   :  { %1730 = vmatprep.subr.mxu0 %v1613_v52  ;;  %1800 = vmatpush1.msra.mxu1 %v1678_v36  ;;  %v1644_v52 = vld [vmem:[%s7147_s4 + $0x1d0] sm:$0xff]  ;;  %v1639_v36 = vld [vmem:[%s7147_s4 + $0x1a8] sm:$0xff] }
  0xcf   :  { %1731 = vmatpush1.msra.mxu0 %v1612_v31  ;;  %1801 = vmatprep.subr.mxu1 %v1677_v39  ;;  %v1651_v31 = vld [vmem:[%s7147_s4 + $0x208] sm:$0xff]  ;;  %v1640_v35 = vld [vmem:[%s7147_s4 + $0x1b0] sm:$0xff]  ;;  %v1638_v39 = vld [vmem:[%s7147_s4 + $0x1a0] sm:$0xff] }
  0xd0   :  { %1732 = vmatprep.subr.mxu0 %v1611_v20  ;;  %1802 = vmatpush1.msra.mxu1 %v1676_v41  ;;  %v1643_v20 = vld [vmem:[%s7147_s4 + $0x1c8] sm:$0xff]  ;;  %v1637_v41 = vld [vmem:[%s7147_s4 + $0x198] sm:$0xff] }
  0xd1   :  { %1733 = vmatpush1.msra.mxu0 %v1610_v19  ;;  %1803 = vmatprep.subr.mxu1 %v1675_v43  ;;  %v1650_v19 = vld [vmem:[%s7147_s4 + $0x200] sm:$0xff]  ;;  %v1636_v43 = vld [vmem:[%s7147_s4 + $0x190] sm:$0xff] }
  0xd2   :  { %1734 = vmatprep.subr.mxu0 %v1609_v32  ;;  %1804 = vmatpush1.msra.mxu1 %v1674_v45  ;;  %v1642_v32 = vld [vmem:[%s7147_s4 + $0x1c0] sm:$0xff]  ;;  %v1635_v45 = vld [vmem:[%s7147_s4 + $0x188] sm:$0xff] }
  0xd3   :  { %1735 = vmatpush1.msra.mxu0 %v1608_v33  ;;  %1805 = vmatprep.subr.mxu1 %v1673_v47  ;;  %v1713_v33 = vld [vmem:[%s7147_s4 + $0x3f8] sm:$0xff]  ;;  %v1634_v47 = vld [vmem:[%s7147_s4 + $0x180] sm:$0xff] }
  0xd4   :  { %1736 = vmatprep.subr.mxu0 %v1607_v37  ;;  %1806 = vmatpush1.msra.mxu1 %v1672_v49  ;;  %v1711_v37 = vld [vmem:[%s7147_s4 + $0x3e8] sm:$0xff]  ;;  %v1633_v49 = vld [vmem:[%s7147_s4 + $0x178] sm:$0xff] }
  0xd5   :  { %1737 = vmatpush1.msra.mxu0 %v1606_v38  ;;  %1807 = vmatprep.subr.mxu1 %v1671_v51  ;;  %v1710_v38 = vld [vmem:[%s7147_s4 + $0x3e0] sm:$0xff]  ;;  %v1632_v51 = vld [vmem:[%s7147_s4 + $0x170] sm:$0xff] }
  0xd6   :  { %1738 = vmatprep.subr.mxu0 %v1605_v40  ;;  %1808 = vmatpush1.msra.mxu1 %v1670_v54  ;;  %v1709_v40 = vld [vmem:[%s7147_s4 + $0x3d8] sm:$0xff]  ;;  %v1631_v54 = vld [vmem:[%s7147_s4 + $0x168] sm:$0xff] }
  0xd7   :  { %1739 = vmatpush1.msra.mxu0 %v1604_v42  ;;  %1809 = vmatprep.subr.mxu1 %v1669_v56  ;;  %v1708_v42 = vld [vmem:[%s7147_s4 + $0x3d0] sm:$0xff]  ;;  %v1630_v56 = vld [vmem:[%s7147_s4 + $0x160] sm:$0xff] }
  0xd8   :  { %1740 = vmatprep.subr.mxu0 %v1603_v44  ;;  %1810 = vmatpush1.msra.mxu1 %v1668_v58  ;;  %v1707_v44 = vld [vmem:[%s7147_s4 + $0x3c8] sm:$0xff]  ;;  %v1629_v58 = vld [vmem:[%s7147_s4 + $0x158] sm:$0xff] }
  0xd9   :  { %1741 = vmatpush1.msra.mxu0 %v1602_v46  ;;  %1811 = vmatprep.subr.mxu1 %v1667_v60  ;;  %v1706_v46 = vld [vmem:[%s7147_s4 + $0x3c0] sm:$0xff]  ;;  %v1628_v60 = vld [vmem:[%s7147_s4 + $0x150] sm:$0xff] }
  0xda   :  { %1742 = vmatprep.subr.mxu0 %v1601_v48  ;;  %1812 = vmatpush1.msra.mxu1 %v1666_v62  ;;  %v1705_v48 = vld [vmem:[%s7147_s4 + $0x3b8] sm:$0xff]  ;;  %v1627_v62 = vld [vmem:[%s7147_s4 + $0x148] sm:$0xff] }
  0xdb   :  { %1743 = vmatpush1.msra.mxu0 %v1600_v50  ;;  %1813 = vmatprep.subr.mxu1 %v1665_v0  ;;  %v1704_v50 = vld [vmem:[%s7147_s4 + $0x3b0] sm:$0xff]  ;;  %v1625_v0 = vld [vmem:[%s7147_s4 + $0x138] sm:$0xff] }
  0xdc   :  { %1744 = vmatprep.subr.mxu0 %v1599_v53  ;;  %1814 = vmatpush1.msra.mxu1 %v1664_v2  ;;  %v1703_v53 = vld [vmem:[%s7147_s4 + $0x3a8] sm:$0xff] }
  0xdd   :  { %1745 = vmatpush1.msra.mxu0 %v1598_v55  ;;  %1815 = vmatprep.subr.mxu1 %v1663_v4  ;;  %v1702_v55 = vld [vmem:[%s7147_s4 + $0x3a0] sm:$0xff]  ;;  %v1623_v2 = vld [vmem:[%s7147_s4 + $0x128] sm:$0xff] }
  0xde   :  { %1746 = vmatprep.subr.mxu0 %v1597_v57  ;;  %1816 = vmatpush1.msra.mxu1 %v1662_v6  ;;  %v1701_v57 = vld [vmem:[%s7147_s4 + $0x398] sm:$0xff]  ;;  %v1698_v6 = vld [vmem:[%s7147_s4 + $0x380] sm:$0xff] }
  0xdf   :  { %1747 = vmatpush1.msra.mxu0 %v1596_v59  ;;  %1817 = vmatprep.subr.mxu1 %v1661_v10  ;;  %v1700_v59 = vld [vmem:[%s7147_s4 + $0x390] sm:$0xff]  ;;  %v1697_v10 = vld [vmem:[%s7147_s4 + $0x378] sm:$0xff] }
  0xe0   :  { %1748 = vmatprep.subr.mxu0 %v1595_v61  ;;  %1818 = vmatpush1.msra.mxu1 %v1660_v12  ;;  %v1699_v61 = vld [vmem:[%s7147_s4 + $0x388] sm:$0xff] }
  0xe1   :  { %1749 = vmatpush1.msra.mxu0 %v1594_v63  ;;  %1819 = vmatprep.subr.mxu1 %v1659_v14  ;;  %v1626_v63 = vld [vmem:[%s7147_s4 + $0x140] sm:$0xff]  ;;  %v1696_v14 = vld [vmem:[%s7147_s4 + $0x370] sm:$0xff] }
  0xe2   :  { %1750 = vmatprep.subr.mxu0 %v1593_v1  ;;  %1820 = vmatpush1.msra.mxu1 %v1658_v17  ;;  %v1624_v1 = vld [vmem:[%s7147_s4 + $0x130] sm:$0xff]  ;;  %v1695_v17 = vld [vmem:[%s7147_s4 + $0x368] sm:$0xff] }
  0xe3   :  { %1751 = vmatpush1.msra.mxu0 %v1592_v3  ;;  %1821 = vmatprep.subr.mxu1 %v1657_v21 }
  0xe4   :  { %1752 = vmatprep.subr.mxu0 %v1591_v5  ;;  %1822 = vmatpush1.msra.mxu1 %v1656_v23  ;;  %v1622_v5 = vld [vmem:[%s7147_s4 + $0x120] sm:$0xff] }
  0xe5   :  { %1753 = vmatpush1.msra.mxu0 %v1590_v7  ;;  %1823 = vmatprep.subr.mxu1 %v1655_v25  ;;  %v1621_v7 = vld [vmem:[%s7147_s4 + $0x118] sm:$0xff]  ;;  %v1694_v23 = vld [vmem:[%s7147_s4 + $0x360] sm:$0xff] }
  0xe6   :  { %1754 = vmatprep.subr.mxu0 %v1589_v11  ;;  %1824 = vmatpush1.msra.mxu1 %v1654_v27  ;;  %v1692_v27 = vld [vmem:[%s7147_s4 + $0x350] sm:$0xff] }
  0xe7   :  { %1755 = vmatpush1.msra.mxu0 %v1588_v13  ;;  %1825 = vmatprep.subr.mxu1 %v1653_v29  ;;  %v1620_v13 = vld [vmem:[%s7147_s4 + $0x110] sm:$0xff] }
  0xe8   :  { %1756 = vmatprep.subr.mxu0 %v1587_v15  ;;  %1826 = vmatpush1.msra.mxu1 %v1652_v30  ;;  %v1619_v15 = vld [vmem:[%s7147_s4 + $0x108] sm:$0xff]  ;;  %v1689_v30 = vld [vmem:[%s7147_s4 + $0x338] sm:$0xff] }
  0xe9   :  { %1757 = vmatpush1.msra.mxu0 %v1586_v18  ;;  %1827 = vmatprep.subr.mxu1 %v1651_v31  ;;  %v1688_v31 = vld [vmem:[%s7147_s4 + $0x330] sm:$0xff] }
  0xea   :  { %1758 = vmatprep.subr.mxu0 %v1649_v22  ;;  %1828 = vmatpush1.msra.mxu1 %v1650_v19  ;;  %v1618_v22 = vld [vmem:[%s7147_s4 + $0x100] sm:$0xff] }
  0xeb   :  { %1759 = vmatpush2.msra.mxu0 %v1648_v24  ;;  %1829 = vmatprep.subr.mxu1 %v1713_v33  ;;  %v1693_v24 = vld [vmem:[%s7147_s4 + $0x358] sm:$0xff] }
  0xec   :  { %1760 = vmatprep.subr.mxu0 %v1647_v26  ;;  %1830 = vmatpush2.msra.mxu1 %v1712_v34  ;;  %v1685_v33 = vld [vmem:[%s7147_s4 + $0x318] sm:$0xff]  ;;  %v1684_v34 = vld [vmem:[%s7147_s4 + $0x310] sm:$0xff] }
  0xed   :  { %1761 = vmatpush2.msra.mxu0 %v1646_v28  ;;  %1831 = vmatprep.subr.mxu1 %v1711_v37  ;;  %v1691_v28 = vld [vmem:[%s7147_s4 + $0x348] sm:$0xff]  ;;  %v1682_v37 = vld [vmem:[%s7147_s4 + $0x300] sm:$0xff] }
  0xee   :  { %1762 = vmatprep.subr.mxu0 %v1645_v9  ;;  %1832 = vmatpush2.msra.mxu1 %v1710_v38  ;;  %v1690_v9 = vld [vmem:[%s7147_s4 + $0x340] sm:$0xff] }
  0xef   :  { %1763 = vmatpush2.msra.mxu0 %v1644_v52  ;;  %1833 = vmatprep.subr.mxu1 %v1709_v40  ;;  %v248_v40 = vld [vmem:[%s7148_s3] sm:$0xf] }
  0xf0   :  { %1764 = vmatprep.subr.mxu0 %v1643_v20  ;;  %1834 = vmatpush2.msra.mxu1 %v1708_v42  ;;  %v1687_v20 = vld [vmem:[%s7147_s4 + $0x328] sm:$0xff] }
  0xf1   :  { %1765 = vmatpush2.msra.mxu0 %v1642_v32  ;;  %1835 = vmatprep.subr.mxu1 %v1707_v44  ;;  %v1686_v32 = vld [vmem:[%s7147_s4 + $0x320] sm:$0xff] }
  0xf2   :  { %1766 = vmatprep.subr.mxu0 %v1641_v8  ;;  %1836 = vmatpush2.msra.mxu1 %v1706_v46 }
  0xf3   :  { %1767 = vmatpush2.msra.mxu0 %v1640_v35  ;;  %1837 = vmatprep.subr.mxu1 %v1705_v48  ;;  %v1683_v35 = vld [vmem:[%s7147_s4 + $0x308] sm:$0xff] }
  0xf4   :  { %1768 = vmatprep.subr.mxu0 %v1639_v36  ;;  %1838 = vmatpush2.msra.mxu1 %v1704_v50  ;;  %v250_v36 = vlaneseq }
  0xf5   :  { %1769 = vmatpush2.msra.mxu0 %v1638_v39  ;;  %1839 = vmatprep.subr.mxu1 %v1703_v53 }
  0xf6   :  { %1770 = vmatprep.subr.mxu0 %v1637_v41  ;;  %1840 = vmatpush2.msra.mxu1 %v1702_v55  ;;  %v6276_v38 = vshrl.u32 %v250_v36, 7  ;;  %v4825_v36 = vld [vmem:[%s7149_s6 + $0x8c] ss:$16 sps:$4 sm:$0xff]  }
  0xf7   :  { %1771 = vmatpush2.msra.mxu0 %v1636_v43  ;;  %1841 = vmatprep.subr.mxu1 %v1701_v57 }
  0xf8   :  { %1772 = vmatprep.subr.mxu0 %v1635_v45  ;;  %1842 = vmatpush2.msra.mxu1 %v1700_v59  ;;  %v6279_v39 = vsub.s32 0, %v6276_v38  ;;  %v6285_v41 = vsub.s32 1, %v6276_v38 }
  0xf9   :  { %1773 = vmatpush2.msra.mxu0 %v1634_v47  ;;  %1843 = vmatprep.subr.mxu1 %v1699_v61 }
  0xfa   :  { %1774 = vmatprep.subr.mxu0 %v1633_v49  ;;  %1844 = vmatpush2.msra.mxu1 %v1698_v6  ;;  %v253_v42 = vrot.slane %v248_v40, %v6279_v39  ;;  %v257_v43 = vrot.slane %v248_v40, %v6285_v41 }
  0xfb   :  { %1775 = vmatpush2.msra.mxu0 %v1632_v51  ;;  %1845 = vmatprep.subr.mxu1 %v1697_v10 }
  0xfc   :  { %1776 = vmatprep.subr.mxu0 %v1631_v54  ;;  %1846 = vmatpush2.msra.mxu1 %v1696_v14 }
  0xfd   :  { %1777 = vmatpush2.msra.mxu0 %v1630_v56  ;;  %1847 = vmatprep.subr.mxu1 %v1695_v17 }
  0xfe   :  { %1778 = vmatprep.subr.mxu0 %v1629_v58  ;;  %1848 = vmatpush2.msra.mxu1 %v1694_v23 }
  0xff   :  { %1779 = vmatpush2.msra.mxu0 %v1628_v60  ;;  %1849 = vmatprep.subr.mxu1 %v1693_v24 }
 0x100   :  { %1780 = vmatprep.subr.mxu0 %v1627_v62  ;;  %1850 = vmatpush2.msra.mxu1 %v1692_v27 }
 0x101   :  { %1781 = vmatpush2.msra.mxu0 %v1626_v63  ;;  %1851 = vmatprep.subr.mxu1 %v1691_v28  ;;  %v6293_v63 = vsub.s32 2, %v6276_v38  ;;  %v4802_v28 = vld [vmem:[%s7149_s6 + $0xe0] ss:$16 sps:$4 sm:$0xff]  }
 0x102   :  { %v6206_v3 = vpop.f32.mrf.mxu0  ;;  %1782 = vmatprep.subr.mxu0 %v1625_v0  ;;  %1852 = vmatpush2.msra.mxu1 %v1690_v9  ;;  %v6296_v0 = vsub.s32 3, %v6276_v38  ;;  %v4804_v9 = vld [vmem:[%s7149_s6 + $0xe4] ss:$16 sps:$4 sm:$0xff]  }
 0x103   :  { %v6208_v4 = vpop.f32.mrf.mxu1  ;;  %1783 = vmatpush2.msra.mxu0 %v1624_v1  ;;  %1853 = vmatprep.subr.mxu1 %v1689_v30  ;;  %v1289_v44 = vadd.f32 %v6206_v3, %v253_v42  ;;  %v4823_v42 = vld [vmem:[%s7149_s6 + $0x88] ss:$16 sps:$4 sm:$0xff]  }
 0x104   :  { %v1290_v11 = vpop.f32.mrf.mxu0  ;;  %1784 = vmatprep.subr.mxu0 %v1623_v2  ;;  %1854 = vmatpush2.msra.mxu1 %v1688_v31  ;;  %v261_v2 = vrot.slane %v248_v40, %v6293_v63  ;;  %v4807_v31 = vld [vmem:[%s7149_s6 + $0xec] ss:$16 sps:$4 sm:$0xff]  }
 0x105   :  { %v1331_v12 = vpop.f32.mrf.mxu1  ;;  %1785 = vmatpush2.msra.mxu0 %v1622_v5  ;;  %1855 = vmatprep.subr.mxu1 %v1687_v20  ;;  %v1291_v45 = vadd.f32 %v1290_v11, %v257_v43  ;;  %v1330_v46 = vadd.f32 %v6208_v4, %v1289_v44  ;;  %v265_v4 = vrot.slane %v248_v40, %v6296_v0  ;;  %v4810_v20 = vld [vmem:[%s7149_s6 + $0xc4] ss:$16 sps:$4 sm:$0xff]   ;;  %v4820_v40 = vld [vmem:[%s7149_s6 + $0x80] ss:$16 sps:$4 sm:$0xff]  }
 0x106   :  { %v1292_v18 = vpop.f32.mrf.mxu0  ;;  %1786 = vmatprep.subr.mxu0 %v1621_v7  ;;  %1856 = vmatpush2.msra.mxu1 %v1686_v32  ;;  %v4808_v32 = vld [vmem:[%s7149_s6 + $0xc0] ss:$16 sps:$4 sm:$0xff]   ;;  %v4828_v43 = vld [vmem:[%s7149_s6 + $0x64] ss:$16 sps:$4 sm:$0xff]  }
 0x107   :  { %v1333_v21 = vpop.f32.mrf.mxu1  ;;  %1787 = vmatpush2.msra.mxu0 %v1620_v13  ;;  %1857 = vmatprep.subr.mxu1 %v1685_v33  ;;  %v1332_v48 = vadd.f32 %v1331_v12, %v1291_v45  ;;  %v4811_v33 = vld [vmem:[%s7149_s6 + $0xc8] ss:$16 sps:$4 sm:$0xff]   ;;  %v4826_v44 = vld [vmem:[%s7149_s6 + $0x60] ss:$16 sps:$4 sm:$0xff]  }
 0x108   :  { %v1293_v25 = vpop.f32.mrf.mxu0  ;;  %1788 = vmatprep.subr.mxu0 %v1619_v15  ;;  %1858 = vmatpush2.msra.mxu1 %v1684_v34  ;;  %v4814_v34 = vld [vmem:[%s7149_s6 + $0xa0] ss:$16 sps:$4 sm:$0xff]   ;;  %v4829_v45 = vld [vmem:[%s7149_s6 + $0x68] ss:$16 sps:$4 sm:$0xff]  }
 0x109   :  { %v1334_v26 = vpop.f32.mrf.mxu1  ;;  %1789 = vmatpush2.msra.mxu0 %v1618_v22  ;;  %1859 = vmatprep.subr.mxu1 %v1683_v35  ;;  %v4817_v35 = vld [vmem:[%s7149_s6 + $0xa8] ss:$16 sps:$4 sm:$0xff]  }
 0x10a   :  { %1860 = vmatpush2.msra.mxu1 %v1682_v37  ;;  %2089 = vmatprep.subr.bf16.mxu0 %v4804_v9  ;;  %v4822_v37 = vld [vmem:[%s7149_s6 + $0x84] ss:$16 sps:$4 sm:$0xff]   ;;  %v4867_v9 = vld [vmem:[%s7150_s8 + $0x49c] ss:$28 sps:$4 sm:$0xff]  }
 0x10b   :  { %v1411_v29 = vpop.f32.mrf.mxu1  ;;  %2130 = vmatprep.subr.bf16.mxu1 %v4807_v31  ;;  %v4870_v31 = vld [vmem:[%s7150_s8 + $0xe4] ss:$28 sps:$4 sm:$0xff]  }
 0x10d   :  { %v1413_v52 = vpop.f32.mrf.mxu1 }
 0x10f   :  { %v1415_v19 = vpop.f32.mrf.mxu1 }
 0x110   :  { %v4813_v19 = vld [vmem:[%s7149_s6 + $0xcc] ss:$16 sps:$4 sm:$0xff]  }
 0x111   :  { %v1416_v8 = vpop.f32.mrf.mxu1 }
 0x112   :  { %v4819_v8 = vld [vmem:[%s7149_s6 + $0xac] ss:$16 sps:$4 sm:$0xff]  }
 0x142   :  { %v1370_v47 = vpop.f32.mrf.mxu0 }
 0x143   :  { %v1371_v49 = vadd.f32 %v1370_v47, %v1330_v46  ;;  %v4831_v46 = vld [vmem:[%s7149_s6 + $0x6c] ss:$16 sps:$4 sm:$0xff]   ;;  %v4834_v47 = vld [vmem:[%s7149_s6 + $0x44] ss:$16 sps:$4 sm:$0xff]  }
 0x144   :  { %v1372_v50 = vpop.f32.mrf.mxu0 }
 0x145   :  { %v1373_v51 = vadd.f32 %v1372_v50, %v1332_v48  ;;  %v1412_v53 = vadd.f32 %v1411_v29, %v1371_v49  ;;  %v4837_v48 = vld [vmem:[%s7149_s6 + $0x4c] ss:$16 sps:$4 sm:$0xff]   ;;  %v4832_v49 = vld [vmem:[%s7149_s6 + $0x40] ss:$16 sps:$4 sm:$0xff]   ;;  %v4835_v50 = vld [vmem:[%s7149_s6 + $0x48] ss:$16 sps:$4 sm:$0xff]  }
 0x146   :  { %v1374_v54 = vpop.f32.mrf.mxu0 }
 0x147   :  { %v1414_v55 = vadd.f32 %v1413_v52, %v1373_v51  ;;  %v1582_v58 = vmax.f32 %v1412_v53, 0.0  ;;  %v4805_v52 = vld [vmem:[%s7149_s6 + $0xe8] ss:$16 sps:$4 sm:$0xff]   ;;  %v4840_v51 = vld [vmem:[%s7149_s6 + $0x24] ss:$16 sps:$4 sm:$0xff]  }
 0x148   :  { %v1375_v56 = vpop.f32.mrf.mxu0  ;;  %v4843_v53 = vld [vmem:[%s7149_s6 + $0x2c] ss:$16 sps:$4 sm:$0xff]   ;;  %v4838_v54 = vld [vmem:[%s7149_s6 + $0x20] ss:$16 sps:$4 sm:$0xff]  }
 0x149   :  { %v1583_v57 = vmax.f32 %v1414_v55, 0.0  ;;  %v4841_v55 = vld [vmem:[%s7149_s6 + $0x28] ss:$16 sps:$4 sm:$0xff]   ;;  %v4846_v56 = vld [vmem:[%s7149_s6 + $0x4] ss:$16 sps:$4 sm:$0xff]  }
 0x14b   :  { %v1452_v59 = vpop.f32.mrf.mxu1  ;;  %1790 = vmatprep.mubr.f32.mxu0 %v1583_v57  ;;  %v4849_v57 = vld [vmem:[%s7149_s6 + $0xc] ss:$16 sps:$4 sm:$0xff]  }
 0x14c   :  { %1791 = vmatmul.mubr.f32.vlgmr.msra.gmra.mxu0 %v1582_v58  ;;  %v1453_v6 = vadd.f32 %v1452_v59, %v261_v2  ;;  %v4844_v58 = vld [vmem:[%s7149_s6] ss:$16 sps:$4 sm:$0xff]   ;;  %v4847_v59 = vld [vmem:[%s7149_s6 + $0x8] ss:$16 sps:$4 sm:$0xff]  }
 0x14d   :  { %v1454_v60 = vpop.f32.mrf.mxu1  ;;  %2121 = vmatprep.mubr.bf16.mxu0 %v5186_v16  ;;  %2090 = vmatpush1.bf16.msra.mxu0 %v4802_v28  ;;  %v4859_v28 = vld [vmem:[%s7150_s8 + $0x4d0] ss:$28 sps:$4 sm:$0xff]  }
 0x14e   :  { %v1455_v10 = vadd.f32 %v1454_v60, %v265_v4  ;;  %2091 = vmatprep.subr.bf16.mxu0 %v4810_v20  ;;  %v4852_v60 = vld [vmem:[%s7150_s8 + $0x18c] ss:$28 sps:$4 sm:$0xff]   ;;  %v4873_v20 = vld [vmem:[%s7150_s8 + $0x464] ss:$28 sps:$4 sm:$0xff]  }
 0x14f   :  { %v1456_v61 = vpop.f32.mrf.mxu1 }
 0x150   :  { %v4855_v61 = vld [vmem:[%s7150_s8 + $0x50c] ss:$28 sps:$4 sm:$0xff]  }
 0x151   :  { %v1457_v62 = vpop.f32.mrf.mxu1  ;;  %2092 = vmatpush1.bf16.msra.mxu0 %v4808_v32  ;;  %v4871_v32 = vld [vmem:[%s7150_s8 + $0x460] ss:$28 sps:$4 sm:$0xff]  }
 0x152   :  { %v1714_v62 = vld [vmem:[%s7151_s5] sm:$0x3] }
 0x153   :  { %v1719_v2 = vrot.slane %v1714_v62, %v6279_v39 }
 0x182   :  { %v1493_v1 = vpop.f32.mrf.mxu0 }
 0x183   :  { %v1494_v11 = vadd.f32 %v1493_v1, %v1453_v6 }
 0x184   :  { %v1495_v3 = vpop.f32.mrf.mxu0 }
 0x185   :  { %v1496_v14 = vadd.f32 %v1495_v3, %v1455_v10  ;;  %v1723_v3 = vrot.slane %v1714_v62, %v6285_v41  ;;  %v4913_v62 = vld [vmem:[%s7150_s8 + $0x658] ss:$28 sps:$4 sm:$0xff]  }
 0x186   :  { %v1497_v5 = vpop.f32.mrf.mxu0 }
 0x188   :  { %v1498_v7 = vpop.f32.mrf.mxu0 }
 0x18a   :  { %v1575_v13 = vpop.f32.mrf.mxu0 }
 0x18b   :  { %v1534_v12 = vpop.f32.mrf.mxu1 }
 0x18c   :  { %v1535_v15 = vadd.f32 %v1534_v12, %v1494_v11  ;;  %v1577_v18 = vpop.f32.mrf.mxu0 }
 0x18d   :  { %v1536_v17 = vpop.f32.mrf.mxu1 }
 0x18e   :  { %v1537_v21 = vadd.f32 %v1536_v17, %v1496_v14  ;;  %v1576_v22 = vadd.f32 %v1575_v13, %v1535_v15  ;;  %v1579_v24 = vpop.f32.mrf.mxu0  ;;  %v1871_v15 = vld [vmem:[%s7153_s1] sm:$0xff] }
 0x18f   :  { %v1538_v23 = vpop.f32.mrf.mxu1 }
 0x190   :  { %v1578_v25 = vadd.f32 %v1577_v18, %v1537_v21  ;;  %v1580_v27 = vpop.f32.mrf.mxu0  ;;  %v1584_v30 = vmax.f32 %v1576_v22, 0.0  ;;  %v4850_v22 = vld [vmem:[%s7150_s8 + $0x188] ss:$28 sps:$4 sm:$0xff]  }
 0x191   :  { %v1539_v26 = vpop.f32.mrf.mxu1  ;;  %v4853_v23 = vld [vmem:[%s7150_s8 + $0x508] ss:$28 sps:$4 sm:$0xff]   ;;  %v4856_v27 = vld [vmem:[%s7150_s8 + $0x150] ss:$28 sps:$4 sm:$0xff]  }
 0x192   :  { %v1585_v29 = vmax.f32 %v1578_v25, 0.0  ;;  %v4858_v25 = vld [vmem:[%s7150_s8 + $0x154] ss:$28 sps:$4 sm:$0xff]  }
 0x193   :  { %v4861_v26 = vld [vmem:[%s7150_s8 + $0x4d4] ss:$28 sps:$4 sm:$0xff]  }
 0x194   :  { %1861 = vmatprep.mubr.f32.mxu1 %v1585_v29  ;;  %v4864_v29 = vld [vmem:[%s7150_s8 + $0x11c] ss:$28 sps:$4 sm:$0xff]  }
 0x195   :  { %1862 = vmatmul.mubr.f32.vlgmr.msra.gmra.mxu1 %v1584_v30  ;;  %v4862_v30 = vld [vmem:[%s7150_s8 + $0x118] ss:$28 sps:$4 sm:$0xff]  }
 0x196   :  { %2131 = vmatpush1.bf16.msra.mxu1 %v4805_v52  ;;  %2162 = vmatprep.mubr.bf16.mxu1 %v5186_v16  ;;  %v4816_v16 = vld [vmem:[%s7149_s6 + $0xa4] ss:$16 sps:$4 sm:$0xff]  }
 0x197   :  { %2132 = vmatprep.subr.bf16.mxu1 %v4813_v19  ;;  %2093 = vmatprep.subr.bf16.mxu0 %v4816_v16  ;;  %v4865_v52 = vld [vmem:[%s7150_s8 + $0x498] ss:$28 sps:$4 sm:$0xff]   ;;  %v4868_v19 = vld [vmem:[%s7150_s8 + $0xe0] ss:$28 sps:$4 sm:$0xff]   ;;  %v4879_v16 = vld [vmem:[%s7150_s8 + $0x42c] ss:$28 sps:$4 sm:$0xff]  }
 0x198   :  { %2094 = vmatpush1.bf16.msra.mxu0 %v4814_v34  ;;  %v4877_v34 = vld [vmem:[%s7150_s8 + $0x428] ss:$28 sps:$4 sm:$0xff]  }
 0x199   :  { %2095 = vmatprep.subr.bf16.mxu0 %v4822_v37  ;;  %v4885_v37 = vld [vmem:[%s7150_s8 + $0x3f4] ss:$28 sps:$4 sm:$0xff]  }
 0x19a   :  { %2133 = vmatpush1.bf16.msra.mxu1 %v4811_v33  ;;  %v4876_v33 = vld [vmem:[%s7150_s8 + $0xac] ss:$28 sps:$4 sm:$0xff]  }
 0x19b   :  { %2134 = vmatprep.subr.bf16.mxu1 %v4819_v8  ;;  %v4874_v8 = vld [vmem:[%s7150_s8 + $0xa8] ss:$28 sps:$4 sm:$0xff]  }
 0x19c   :  { %2096 = vmatpush1.bf16.msra.mxu0 %v4820_v40  ;;  %v4883_v40 = vld [vmem:[%s7150_s8 + $0x3f0] ss:$28 sps:$4 sm:$0xff]  }
 0x19d   :  { %2097 = vmatprep.subr.bf16.mxu0 %v4828_v43  ;;  %v4891_v43 = vld [vmem:[%s7150_s8 + $0x3bc] ss:$28 sps:$4 sm:$0xff]  }
 0x19e   :  { %2135 = vmatpush1.bf16.msra.mxu1 %v4817_v35  ;;  %v4882_v35 = vld [vmem:[%s7150_s8 + $0x74] ss:$28 sps:$4 sm:$0xff]  }
 0x19f   :  { %2136 = vmatprep.subr.bf16.mxu1 %v4825_v36  ;;  %v4880_v36 = vld [vmem:[%s7150_s8 + $0x70] ss:$28 sps:$4 sm:$0xff]  }
 0x1a0   :  { %2098 = vmatpush1.bf16.msra.mxu0 %v4826_v44  ;;  %v4886_v44 = vld [vmem:[%s7150_s8 + $0x38] ss:$28 sps:$4 sm:$0xff]  }
 0x1a1   :  { %2099 = vmatprep.subr.bf16.mxu0 %v4834_v47  ;;  %v4897_v47 = vld [vmem:[%s7150_s8 + $0x384] ss:$28 sps:$4 sm:$0xff]  }
 0x1a2   :  { %2137 = vmatpush1.bf16.msra.mxu1 %v4823_v42  ;;  %v4888_v42 = vld [vmem:[%s7150_s8 + $0x3c] ss:$28 sps:$4 sm:$0xff]  }
 0x1a3   :  { %2138 = vmatprep.subr.bf16.mxu1 %v4831_v46  ;;  %v4894_v46 = vld [vmem:[%s7150_s8 + $0x4] ss:$28 sps:$4 sm:$0xff]  }
 0x1a4   :  { %2100 = vmatpush1.bf16.msra.mxu0 %v4832_v49  ;;  %v4895_v49 = vld [vmem:[%s7150_s8 + $0x380] ss:$28 sps:$4 sm:$0xff]  }
 0x1a5   :  { %2101 = vmatprep.subr.bf16.mxu0 %v4840_v51  ;;  %v4903_v51 = vld [vmem:[%s7150_s8 + $0x6cc] ss:$28 sps:$4 sm:$0xff]  }
 0x1a6   :  { %2139 = vmatpush1.bf16.msra.mxu1 %v4829_v45  ;;  %v4889_v45 = vld [vmem:[%s7150_s8 + $0x3b8] ss:$28 sps:$4 sm:$0xff]  }
 0x1a7   :  { %2140 = vmatprep.subr.bf16.mxu1 %v4837_v48  ;;  %v4892_v48 = vld [vmem:[%s7150_s8] ss:$28 sps:$4 sm:$0xff]  }
 0x1a8   :  { %2102 = vmatpush1.bf16.msra.mxu0 %v4838_v54  ;;  %v4901_v54 = vld [vmem:[%s7150_s8 + $0x6c8] ss:$28 sps:$4 sm:$0xff]  }
 0x1a9   :  { %2103 = vmatprep.subr.bf16.mxu0 %v4846_v56  ;;  %v4909_v56 = vld [vmem:[%s7150_s8 + $0x694] ss:$28 sps:$4 sm:$0xff]  }
 0x1aa   :  { %2141 = vmatpush1.bf16.msra.mxu1 %v4835_v50  ;;  %v4900_v50 = vld [vmem:[%s7150_s8 + $0x34c] ss:$28 sps:$4 sm:$0xff]  }
 0x1ab   :  { %2142 = vmatprep.subr.bf16.mxu1 %v4843_v53  ;;  %v4898_v53 = vld [vmem:[%s7150_s8 + $0x348] ss:$28 sps:$4 sm:$0xff]  }
 0x1ac   :  { %2104 = vmatpush1.bf16.msra.mxu0 %v4844_v58  ;;  %v4907_v58 = vld [vmem:[%s7150_s8 + $0x690] ss:$28 sps:$4 sm:$0xff]  }
 0x1ad   :  { %3624 = vmatprep.subr.bf16.mxu0 %v4852_v60  ;;  %v4915_v60 = vld [vmem:[%s7150_s8 + $0x65c] ss:$28 sps:$4 sm:$0xff]  }
 0x1ae   :  { %2143 = vmatpush1.bf16.msra.mxu1 %v4841_v55  ;;  %v4906_v55 = vld [vmem:[%s7150_s8 + $0x314] ss:$28 sps:$4 sm:$0xff]  }
 0x1af   :  { %2144 = vmatprep.subr.bf16.mxu1 %v4849_v57  ;;  %v4904_v57 = vld [vmem:[%s7150_s8 + $0x310] ss:$28 sps:$4 sm:$0xff]  }
 0x1b2   :  { %2145 = vmatpush1.bf16.msra.mxu1 %v4847_v59  ;;  %v4912_v59 = vld [vmem:[%s7150_s8 + $0x2dc] ss:$28 sps:$4 sm:$0xff]  }
 0x1b3   :  { %3665 = vmatprep.subr.bf16.mxu1 %v4855_v61  ;;  %v4910_v61 = vld [vmem:[%s7150_s8 + $0x2d8] ss:$28 sps:$4 sm:$0xff]  }
 0x20c   :  { %v1792_v1 = vpop.f32.mrf.mxu0 }
 0x20d   :  { %v1793_v5 = vadd.f32 %v1792_v1, %v1719_v2  ;;  %v4918_v1 = vld [vmem:[%s7150_s8 + $0x2a4] ss:$28 sps:$4 sm:$0xff]  }
 0x20e   :  { %v1794_v4 = vpop.f32.mrf.mxu0  ;;  %v4921_v2 = vld [vmem:[%s7150_s8 + $0x624] ss:$28 sps:$4 sm:$0xff]  }
 0x20f   :  { %v1795_v7 = vadd.f32 %v1794_v4, %v1723_v3  ;;  %v4916_v3 = vld [vmem:[%s7150_s8 + $0x2a0] ss:$28 sps:$4 sm:$0xff]  }
 0x210   :  { %v4919_v4 = vld [vmem:[%s7150_s8 + $0x620] ss:$28 sps:$4 sm:$0xff]  }
 0x255   :  { %v1863_v6 = vpop.f32.mrf.mxu1 }
 0x256   :  { %v1864_v10 = vadd.f32 %v1863_v6, %v1793_v5  ;;  %v4924_v5 = vld [vmem:[%s7150_s8 + $0x26c] ss:$28 sps:$4 sm:$0xff]  }
 0x257   :  { %v1865_v11 = vpop.f32.mrf.mxu1  ;;  %v4927_v6 = vld [vmem:[%s7150_s8 + $0x5ec] ss:$28 sps:$4 sm:$0xff]  }
 0x258   :  { %3991 = vst [vmem:[%s7152_s11] sm:$0xff] %v1864_v10  ;;  %v1866_v12 = vadd.f32 %v1865_v11, %v1795_v7  ;;  %v4922_v7 = vld [vmem:[%s7150_s8 + $0x268] ss:$28 sps:$4 sm:$0xff]   ;;  %v4930_v11 = vld [vmem:[%s7150_s8 + $0x234] ss:$28 sps:$4 sm:$0xff]  }
 0x25a   :  { %v1868_v13 = vmul.f32 0.5, %v1866_v12  ;;  %3992 = vst [vmem:[%s7152_s11 + $0x8] sm:$0xff] %v1866_v12  ;;  %v4933_v12 = vld [vmem:[%s7150_s8 + $0x5b4] ss:$28 sps:$4 sm:$0xff]  }
 0x25c   :  { %v1869_v14 = vmul.f32 1.442695, %v1868_v13  ;;  %v4928_v13 = vld [vmem:[%s7150_s8 + $0x230] ss:$28 sps:$4 sm:$0xff]  }
 0x25e   :  { %5170 = vpow2.f32 %v1869_v14  ;;  %v4931_v14 = vld [vmem:[%s7150_s8 + $0x5b0] ss:$28 sps:$4 sm:$0xff]  }
 0x26b   :  { %v5171_v17 = vpop.eup %5170 }
 0x26c   :  { %v1872_v18 = vmul.f32 %v5171_v17, %v1871_v15  ;;  %v4936_v15 = vld [vmem:[%s7150_s8 + $0x1fc] ss:$28 sps:$4 sm:$0xff]  }
 0x26d   :  { %v4939_v17 = vld [vmem:[%s7150_s8 + $0x57c] ss:$28 sps:$4 sm:$0xff]  }
 0x26e   :  { %v1873_v21 = vadd.f32 %v1872_v18, %v1864_v10  ;;  %v4925_v10 = vld [vmem:[%s7150_s8 + $0x5e8] ss:$28 sps:$4 sm:$0xff]   ;;  %v4934_v18 = vld [vmem:[%s7150_s8 + $0x1f8] ss:$28 sps:$4 sm:$0xff]  }
 0x270   :  { %v1874_v24 = vpack.c.bf16 %v1873_v21, %v1873_v21  ;;  %v4937_v21 = vld [vmem:[%s7150_s8 + $0x578] ss:$28 sps:$4 sm:$0xff]  }
 0x272   :  { %2122 = vmatmul.mubr.bf16.vlgmr.msra.gmra.mxu0 %v1874_v24  ;;  %2163 = vmatmul.mubr.bf16.vlgmr.msra.gmra.mxu1 %v1874_v24  ;;  %v4940_v24 = vld [vmem:[%s7150_s8 + $0x1c0] ss:$28 sps:$4 sm:$0xff]  }
 0x273   :  { %3625 = vmatpush1.bf16.msra.mxu0 %v4850_v22  ;;  %3666 = vmatpush1.bf16.msra.mxu1 %v4853_v23  ;;  %v4942_v22 = vld [vmem:[%s7150_s8 + $0x1c4] ss:$28 sps:$4 sm:$0xff]  }
 0x274   :  { %3626 = vmatprep.subr.bf16.mxu0 %v4858_v25  ;;  %3667 = vmatprep.subr.bf16.mxu1 %v4861_v26  ;;  %v4945_v23 = vld [vmem:[%s7150_s8 + $0x544] ss:$28 sps:$4 sm:$0xff]   ;;  %v4948_v26 = vld [vmem:[%s7150_s8 + $0x194] ss:$28 sps:$4 sm:$0xff]  }
 0x275   :  { %v4943_v25 = vld [vmem:[%s7150_s8 + $0x540] ss:$28 sps:$4 sm:$0xff]  }
 0x277   :  { %3627 = vmatpush1.bf16.msra.mxu0 %v4856_v27  ;;  %3668 = vmatpush1.bf16.msra.mxu1 %v4859_v28  ;;  %v4951_v27 = vld [vmem:[%s7150_s8 + $0x514] ss:$28 sps:$4 sm:$0xff]   ;;  %v1907_v28 = vld [vmem:[%s7154_s7] sm:$0xf] }
 0x278   :  { %3628 = vmatprep.subr.bf16.mxu0 %v4864_v29  ;;  %3669 = vmatprep.subr.bf16.mxu1 %v4867_v9  ;;  %v1912_v29 = vrot.slane %v1907_v28, %v6279_v39  ;;  %v1920_v9 = vrot.slane %v1907_v28, %v6293_v63 }
 0x27b   :  { %3629 = vmatpush1.bf16.msra.mxu0 %v4862_v30  ;;  %3670 = vmatpush1.bf16.msra.mxu1 %v4865_v52  ;;  %v1916_v30 = vrot.slane %v1907_v28, %v6285_v41  ;;  %v1924_v52 = vrot.slane %v1907_v28, %v6296_v0  ;;  %v5002_v28 = vld [vmem:[%s7150_s8 + $0x31c] ss:$28 sps:$4 sm:$0xff]  }
 0x27c   :  { %3630 = vmatprep.subr.bf16.mxu0 %v4870_v31  ;;  %3671 = vmatprep.subr.bf16.mxu1 %v4873_v20 }
 0x27f   :  { %3631 = vmatpush1.bf16.msra.mxu0 %v4868_v19  ;;  %3672 = vmatpush1.bf16.msra.mxu1 %v4871_v32 }
 0x280   :  { %3632 = vmatprep.subr.bf16.mxu0 %v4876_v33  ;;  %3673 = vmatprep.subr.bf16.mxu1 %v4879_v16 }
 0x283   :  { %3633 = vmatpush1.bf16.msra.mxu0 %v4874_v8  ;;  %3674 = vmatpush1.bf16.msra.mxu1 %v4877_v34 }
 0x284   :  { %3634 = vmatprep.subr.bf16.mxu0 %v4882_v35  ;;  %3675 = vmatprep.subr.bf16.mxu1 %v4885_v37 }
 0x287   :  { %3635 = vmatpush1.bf16.msra.mxu0 %v4880_v36  ;;  %3676 = vmatpush1.bf16.msra.mxu1 %v4883_v40 }
 0x288   :  { %3636 = vmatprep.subr.bf16.mxu0 %v4888_v42  ;;  %3677 = vmatprep.subr.bf16.mxu1 %v4891_v43 }
 0x28b   :  { %3637 = vmatpush1.bf16.msra.mxu0 %v4886_v44  ;;  %3678 = vmatpush1.bf16.msra.mxu1 %v4889_v45 }
 0x28c   :  { %3638 = vmatprep.subr.bf16.mxu0 %v4894_v46  ;;  %3679 = vmatprep.subr.bf16.mxu1 %v4897_v47 }
 0x28f   :  { %3639 = vmatpush1.bf16.msra.mxu0 %v4892_v48  ;;  %3680 = vmatpush1.bf16.msra.mxu1 %v4895_v49  ;;  %v4946_v48 = vld [vmem:[%s7150_s8 + $0x190] ss:$28 sps:$4 sm:$0xff]  }
 0x290   :  { %3640 = vmatprep.subr.bf16.mxu0 %v4900_v50  ;;  %3681 = vmatprep.subr.bf16.mxu1 %v4903_v51  ;;  %v4949_v49 = vld [vmem:[%s7150_s8 + $0x510] ss:$28 sps:$4 sm:$0xff]  }
 0x293   :  { %3641 = vmatpush2.bf16.msra.mxu0 %v4898_v53  ;;  %3682 = vmatpush2.bf16.msra.mxu1 %v4901_v54  ;;  %v4954_v53 = vld [vmem:[%s7150_s8 + $0x15c] ss:$28 sps:$4 sm:$0xff]  }
 0x294   :  { %3642 = vmatprep.subr.bf16.mxu0 %v4906_v55  ;;  %3683 = vmatprep.subr.bf16.mxu1 %v4909_v56  ;;  %v4957_v54 = vld [vmem:[%s7150_s8 + $0x4dc] ss:$28 sps:$4 sm:$0xff]  }
 0x295   :  { %v4952_v55 = vld [vmem:[%s7150_s8 + $0x158] ss:$28 sps:$4 sm:$0xff]  }
 0x296   :  { %v4955_v56 = vld [vmem:[%s7150_s8 + $0x4d8] ss:$28 sps:$4 sm:$0xff]  }
 0x297   :  { %3643 = vmatpush2.bf16.msra.mxu0 %v4904_v57  ;;  %3684 = vmatpush2.bf16.msra.mxu1 %v4907_v58  ;;  %v4960_v57 = vld [vmem:[%s7150_s8 + $0x124] ss:$28 sps:$4 sm:$0xff]  }
 0x298   :  { %3644 = vmatprep.subr.bf16.mxu0 %v4912_v59  ;;  %3685 = vmatprep.subr.bf16.mxu1 %v4915_v60  ;;  %v4963_v58 = vld [vmem:[%s7150_s8 + $0x4a4] ss:$28 sps:$4 sm:$0xff]  }
 0x299   :  { %v4958_v59 = vld [vmem:[%s7150_s8 + $0x120] ss:$28 sps:$4 sm:$0xff]  }
 0x29a   :  { %v4961_v60 = vld [vmem:[%s7150_s8 + $0x4a0] ss:$28 sps:$4 sm:$0xff]  }
 0x29b   :  { %3645 = vmatpush2.bf16.msra.mxu0 %v4910_v61  ;;  %3686 = vmatpush2.bf16.msra.mxu1 %v4913_v62  ;;  %v4966_v61 = vld [vmem:[%s7150_s8 + $0xec] ss:$28 sps:$4 sm:$0xff]  }
 0x29c   :  { %3646 = vmatprep.subr.bf16.mxu0 %v4918_v1  ;;  %3687 = vmatprep.subr.bf16.mxu1 %v4921_v2  ;;  %v4969_v62 = vld [vmem:[%s7150_s8 + $0x46c] ss:$28 sps:$4 sm:$0xff]  }
 0x29d   :  { %v4964_v1 = vld [vmem:[%s7150_s8 + $0xe8] ss:$28 sps:$4 sm:$0xff]  }
 0x29e   :  { %v4967_v2 = vld [vmem:[%s7150_s8 + $0x468] ss:$28 sps:$4 sm:$0xff]  }
 0x29f   :  { %3647 = vmatpush2.bf16.msra.mxu0 %v4916_v3  ;;  %3688 = vmatpush2.bf16.msra.mxu1 %v4919_v4  ;;  %v4972_v3 = vld [vmem:[%s7150_s8 + $0xb4] ss:$28 sps:$4 sm:$0xff]  }
 0x2a0   :  { %3648 = vmatprep.subr.bf16.mxu0 %v4924_v5  ;;  %3689 = vmatprep.subr.bf16.mxu1 %v4927_v6  ;;  %v4975_v4 = vld [vmem:[%s7150_s8 + $0x434] ss:$28 sps:$4 sm:$0xff]  }
 0x2a1   :  { %v4970_v5 = vld [vmem:[%s7150_s8 + $0xb0] ss:$28 sps:$4 sm:$0xff]  }
 0x2a2   :  { %v4973_v6 = vld [vmem:[%s7150_s8 + $0x430] ss:$28 sps:$4 sm:$0xff]  }
 0x2a3   :  { %3649 = vmatpush2.bf16.msra.mxu0 %v4922_v7  ;;  %3690 = vmatpush2.bf16.msra.mxu1 %v4925_v10  ;;  %v4978_v7 = vld [vmem:[%s7150_s8 + $0x7c] ss:$28 sps:$4 sm:$0xff]  }
 0x2a4   :  { %3650 = vmatprep.subr.bf16.mxu0 %v4930_v11  ;;  %3691 = vmatprep.subr.bf16.mxu1 %v4933_v12  ;;  %v4981_v10 = vld [vmem:[%s7150_s8 + $0x3fc] ss:$28 sps:$4 sm:$0xff]  }
 0x2a5   :  { %v4976_v11 = vld [vmem:[%s7150_s8 + $0x78] ss:$28 sps:$4 sm:$0xff]  }
 0x2a6   :  { %v4979_v12 = vld [vmem:[%s7150_s8 + $0x3f8] ss:$28 sps:$4 sm:$0xff]  }
 0x2a7   :  { %3651 = vmatpush2.bf16.msra.mxu0 %v4928_v13  ;;  %3692 = vmatpush2.bf16.msra.mxu1 %v4931_v14  ;;  %v4984_v13 = vld [vmem:[%s7150_s8 + $0x44] ss:$28 sps:$4 sm:$0xff]  }
 0x2a8   :  { %3652 = vmatprep.subr.bf16.mxu0 %v4936_v15  ;;  %3693 = vmatprep.subr.bf16.mxu1 %v4939_v17  ;;  %v4987_v14 = vld [vmem:[%s7150_s8 + $0x3c4] ss:$28 sps:$4 sm:$0xff]  }
 0x2a9   :  { %v4982_v15 = vld [vmem:[%s7150_s8 + $0x40] ss:$28 sps:$4 sm:$0xff]  }
 0x2aa   :  { %v4985_v17 = vld [vmem:[%s7150_s8 + $0x3c0] ss:$28 sps:$4 sm:$0xff]  }
 0x2ab   :  { %3653 = vmatpush2.bf16.msra.mxu0 %v4934_v18  ;;  %3694 = vmatpush2.bf16.msra.mxu1 %v4937_v21  ;;  %v4990_v18 = vld [vmem:[%s7150_s8 + $0xc] ss:$28 sps:$4 sm:$0xff]  }
 0x2ac   :  { %3654 = vmatprep.subr.bf16.mxu0 %v4942_v22  ;;  %3695 = vmatprep.subr.bf16.mxu1 %v4945_v23  ;;  %v4993_v21 = vld [vmem:[%s7150_s8 + $0x38c] ss:$28 sps:$4 sm:$0xff]  }
 0x2ad   :  { %v4988_v22 = vld [vmem:[%s7150_s8 + $0x8] ss:$28 sps:$4 sm:$0xff]  }
 0x2ae   :  { %v4991_v23 = vld [vmem:[%s7150_s8 + $0x388] ss:$28 sps:$4 sm:$0xff]  }
 0x2af   :  { %3655 = vmatpush2.bf16.msra.mxu0 %v4940_v24  ;;  %3696 = vmatpush2.bf16.msra.mxu1 %v4943_v25  ;;  %v4996_v24 = vld [vmem:[%s7150_s8 + $0x354] ss:$28 sps:$4 sm:$0xff]  }
 0x2b0   :  { %3706 = vmatprep.subr.bf16.mxu0 %v4948_v26  ;;  %3747 = vmatprep.subr.bf16.mxu1 %v4951_v27  ;;  %v4999_v25 = vld [vmem:[%s7150_s8 + $0x6d4] ss:$28 sps:$4 sm:$0xff]  }
 0x2b1   :  { %v4994_v26 = vld [vmem:[%s7150_s8 + $0x350] ss:$28 sps:$4 sm:$0xff]  }
 0x2b2   :  { %v4997_v27 = vld [vmem:[%s7150_s8 + $0x6d0] ss:$28 sps:$4 sm:$0xff]  }
 0x332   :  { %v2123_v31 = vpop.f32.mrf.mxu0  ;;  %v2164_v20 = vpop.f32.mrf.mxu1 }
 0x333   :  { %v2124_v19 = vadd.f32 %v2123_v31, %v1912_v29  ;;  %v2165_v32 = vadd.f32 %v2164_v20, %v1920_v9  ;;  %v5005_v29 = vld [vmem:[%s7150_s8 + $0x69c] ss:$28 sps:$4 sm:$0xff]   ;;  %v5011_v31 = vld [vmem:[%s7150_s8 + $0x664] ss:$28 sps:$4 sm:$0xff]  }
 0x334   :  { %v2125_v33 = vpop.f32.mrf.mxu0  ;;  %v2166_v16 = vpop.f32.mrf.mxu1  ;;  %v5000_v9 = vld [vmem:[%s7150_s8 + $0x318] ss:$28 sps:$4 sm:$0xff]   ;;  %v5006_v20 = vld [vmem:[%s7150_s8 + $0x2e0] ss:$28 sps:$4 sm:$0xff]  }
 0x335   :  { %v2126_v8 = vadd.f32 %v2125_v33, %v1916_v30  ;;  %v2167_v34 = vadd.f32 %v2166_v16, %v1924_v52  ;;  %v2171_v35 = vmax.f32 %v2124_v19, 0.0  ;;  %v2173_v37 = vmax.f32 %v2165_v32, 0.0  ;;  %v5003_v30 = vld [vmem:[%s7150_s8 + $0x698] ss:$28 sps:$4 sm:$0xff]   ;;  %v5008_v52 = vld [vmem:[%s7150_s8 + $0x2e4] ss:$28 sps:$4 sm:$0xff]  }
 0x336   :  { %v2127_v36 = vpop.f32.mrf.mxu0  ;;  %v2168_v40 = vpop.f32.mrf.mxu1  ;;  %v5009_v19 = vld [vmem:[%s7150_s8 + $0x660] ss:$28 sps:$4 sm:$0xff]   ;;  %v5014_v32 = vld [vmem:[%s7150_s8 + $0x2ac] ss:$28 sps:$4 sm:$0xff]  }
 0x337   :  { %v2172_v42 = vmax.f32 %v2126_v8, 0.0  ;;  %v2174_v43 = vmax.f32 %v2167_v34, 0.0  ;;  %v6626_v50 = vpack.c.bf16 %v2171_v35, %v2171_v35  ;;  %v6628_v51 = vpack.c.bf16 %v2173_v37, %v2173_v37  ;;  %v5017_v33 = vld [vmem:[%s7150_s8 + $0x62c] ss:$28 sps:$4 sm:$0xff]   ;;  %v5020_v34 = vld [vmem:[%s7150_s8 + $0x274] ss:$28 sps:$4 sm:$0xff]  }
 0x338   :  { %v2128_v44 = vpop.f32.mrf.mxu0  ;;  %v2169_v45 = vpop.f32.mrf.mxu1  ;;  %v5012_v16 = vld [vmem:[%s7150_s8 + $0x2a8] ss:$28 sps:$4 sm:$0xff]   ;;  %v5023_v35 = vld [vmem:[%s7150_s8 + $0x5f4] ss:$28 sps:$4 sm:$0xff]   ;;  %v5026_v40 = vld [vmem:[%s7150_s8 + $0x23c] ss:$28 sps:$4 sm:$0xff]  }
 0x339   :  { %v6616_v46 = vpack.c.bf16 %v2172_v42, %v2172_v42  ;;  %v6618_v47 = vpack.c.bf16 %v2174_v43, %v2174_v43  ;;  %v5015_v8 = vld [vmem:[%s7150_s8 + $0x628] ss:$28 sps:$4 sm:$0xff]   ;;  %v5018_v37 = vld [vmem:[%s7150_s8 + $0x270] ss:$28 sps:$4 sm:$0xff]   ;;  %v5029_v42 = vld [vmem:[%s7150_s8 + $0x5bc] ss:$28 sps:$4 sm:$0xff]  }
 0x33a   :  { %v5021_v36 = vld [vmem:[%s7150_s8 + $0x5f0] ss:$28 sps:$4 sm:$0xff]   ;;  %v5024_v43 = vld [vmem:[%s7150_s8 + $0x238] ss:$28 sps:$4 sm:$0xff]   ;;  %v5032_v45 = vld [vmem:[%s7150_s8 + $0x204] ss:$28 sps:$4 sm:$0xff]  }
 0x33b   :  { %3656 = vmatprep.mubr.bf16.mxu0 %v6616_v46  ;;  %3697 = vmatprep.mubr.bf16.mxu1 %v6618_v47  ;;  %v5027_v44 = vld [vmem:[%s7150_s8 + $0x5b8] ss:$28 sps:$4 sm:$0xff]  }
 0x33c   :  { %3657 = vmatmul.mubr.bf16.vlgmr.msra.gmra.mxu0 %v6626_v50  ;;  %3698 = vmatmul.mubr.bf16.vlgmr.msra.gmra.mxu1 %v6628_v51 }
 0x33d   :  { %3707 = vmatpush1.bf16.msra.mxu0 %v4946_v48  ;;  %3748 = vmatpush1.bf16.msra.mxu1 %v4949_v49  ;;  %v5035_v48 = vld [vmem:[%s7150_s8 + $0x584] ss:$28 sps:$4 sm:$0xff]  }
 0x33e   :  { %3738 = vmatprep.mubr.bf16.mxu0 %v6616_v46  ;;  %3779 = vmatprep.mubr.bf16.mxu1 %v6618_v47  ;;  %v5030_v49 = vld [vmem:[%s7150_s8 + $0x200] ss:$28 sps:$4 sm:$0xff]  }
 0x33f   :  { %3708 = vmatprep.subr.bf16.mxu0 %v4954_v53  ;;  %3749 = vmatprep.subr.bf16.mxu1 %v4957_v54  ;;  %v5033_v53 = vld [vmem:[%s7150_s8 + $0x580] ss:$28 sps:$4 sm:$0xff]   ;;  %v5038_v54 = vld [vmem:[%s7150_s8 + $0x1cc] ss:$28 sps:$4 sm:$0xff]  }
 0x341   :  { %3709 = vmatpush1.bf16.msra.mxu0 %v4952_v55  ;;  %3750 = vmatpush1.bf16.msra.mxu1 %v4955_v56  ;;  %v5041_v55 = vld [vmem:[%s7150_s8 + $0x54c] ss:$28 sps:$4 sm:$0xff]  }
 0x342   :  { %3710 = vmatprep.subr.bf16.mxu0 %v4960_v57  ;;  %3751 = vmatprep.subr.bf16.mxu1 %v4963_v58  ;;  %v5036_v56 = vld [vmem:[%s7150_s8 + $0x1c8] ss:$28 sps:$4 sm:$0xff]   ;;  %v5044_v58 = vld [vmem:[%s7150_s8 + $0x19c] ss:$28 sps:$4 sm:$0xff]  }
 0x343   :  { %v5039_v57 = vld [vmem:[%s7150_s8 + $0x548] ss:$28 sps:$4 sm:$0xff]  }
 0x345   :  { %3711 = vmatpush1.bf16.msra.mxu0 %v4958_v59  ;;  %3752 = vmatpush1.bf16.msra.mxu1 %v4961_v60  ;;  %v5047_v59 = vld [vmem:[%s7150_s8 + $0x51c] ss:$28 sps:$4 sm:$0xff]  }
 0x346   :  { %3712 = vmatprep.subr.bf16.mxu0 %v4966_v61  ;;  %3753 = vmatprep.subr.bf16.mxu1 %v4969_v62  ;;  %v5042_v60 = vld [vmem:[%s7150_s8 + $0x198] ss:$28 sps:$4 sm:$0xff]   ;;  %v5050_v62 = vld [vmem:[%s7150_s8 + $0x164] ss:$28 sps:$4 sm:$0xff]  }
 0x347   :  { %v5045_v61 = vld [vmem:[%s7150_s8 + $0x518] ss:$28 sps:$4 sm:$0xff]  }
 0x349   :  { %3713 = vmatpush1.bf16.msra.mxu0 %v4964_v1  ;;  %3754 = vmatpush1.bf16.msra.mxu1 %v4967_v2  ;;  %v5053_v1 = vld [vmem:[%s7150_s8 + $0x4e4] ss:$28 sps:$4 sm:$0xff]  }
 0x34a   :  { %3714 = vmatprep.subr.bf16.mxu0 %v4972_v3  ;;  %3755 = vmatprep.subr.bf16.mxu1 %v4975_v4  ;;  %v5048_v2 = vld [vmem:[%s7150_s8 + $0x160] ss:$28 sps:$4 sm:$0xff]   ;;  %v5056_v4 = vld [vmem:[%s7150_s8 + $0x12c] ss:$28 sps:$4 sm:$0xff]  }
 0x34b   :  { %v5051_v3 = vld [vmem:[%s7150_s8 + $0x4e0] ss:$28 sps:$4 sm:$0xff]  }
 0x34d   :  { %3715 = vmatpush1.bf16.msra.mxu0 %v4970_v5  ;;  %3756 = vmatpush1.bf16.msra.mxu1 %v4973_v6  ;;  %v5059_v5 = vld [vmem:[%s7150_s8 + $0x4ac] ss:$28 sps:$4 sm:$0xff]  }
 0x34e   :  { %3716 = vmatprep.subr.bf16.mxu0 %v4978_v7  ;;  %3757 = vmatprep.subr.bf16.mxu1 %v4981_v10  ;;  %v5054_v6 = vld [vmem:[%s7150_s8 + $0x128] ss:$28 sps:$4 sm:$0xff]   ;;  %v5062_v10 = vld [vmem:[%s7150_s8 + $0xf4] ss:$28 sps:$4 sm:$0xff]  }
 0x34f   :  { %v5057_v7 = vld [vmem:[%s7150_s8 + $0x4a8] ss:$28 sps:$4 sm:$0xff]  }
 0x351   :  { %3717 = vmatpush1.bf16.msra.mxu0 %v4976_v11  ;;  %3758 = vmatpush1.bf16.msra.mxu1 %v4979_v12  ;;  %v5065_v11 = vld [vmem:[%s7150_s8 + $0x474] ss:$28 sps:$4 sm:$0xff]  }
 0x352   :  { %3718 = vmatprep.subr.bf16.mxu0 %v4984_v13  ;;  %3759 = vmatprep.subr.bf16.mxu1 %v4987_v14  ;;  %v5060_v12 = vld [vmem:[%s7150_s8 + $0xf0] ss:$28 sps:$4 sm:$0xff]   ;;  %v5068_v14 = vld [vmem:[%s7150_s8 + $0xbc] ss:$28 sps:$4 sm:$0xff]  }
 0x353   :  { %v5063_v13 = vld [vmem:[%s7150_s8 + $0x470] ss:$28 sps:$4 sm:$0xff]  }
 0x355   :  { %3719 = vmatpush1.bf16.msra.mxu0 %v4982_v15  ;;  %3760 = vmatpush1.bf16.msra.mxu1 %v4985_v17  ;;  %v5071_v15 = vld [vmem:[%s7150_s8 + $0x43c] ss:$28 sps:$4 sm:$0xff]  }
 0x356   :  { %3720 = vmatprep.subr.bf16.mxu0 %v4990_v18  ;;  %3761 = vmatprep.subr.bf16.mxu1 %v4993_v21  ;;  %v5066_v17 = vld [vmem:[%s7150_s8 + $0xb8] ss:$28 sps:$4 sm:$0xff]   ;;  %v5074_v21 = vld [vmem:[%s7150_s8 + $0x84] ss:$28 sps:$4 sm:$0xff]  }
 0x357   :  { %v5069_v18 = vld [vmem:[%s7150_s8 + $0x438] ss:$28 sps:$4 sm:$0xff]  }
 0x359   :  { %3721 = vmatpush1.bf16.msra.mxu0 %v4988_v22  ;;  %3762 = vmatpush1.bf16.msra.mxu1 %v4991_v23  ;;  %v5077_v22 = vld [vmem:[%s7150_s8 + $0x404] ss:$28 sps:$4 sm:$0xff]  }
 0x35a   :  { %3722 = vmatprep.subr.bf16.mxu0 %v4996_v24  ;;  %3763 = vmatprep.subr.bf16.mxu1 %v4999_v25  ;;  %v5072_v23 = vld [vmem:[%s7150_s8 + $0x80] ss:$28 sps:$4 sm:$0xff]   ;;  %v5080_v25 = vld [vmem:[%s7150_s8 + $0x4c] ss:$28 sps:$4 sm:$0xff]  }
 0x35b   :  { %v5075_v24 = vld [vmem:[%s7150_s8 + $0x400] ss:$28 sps:$4 sm:$0xff]  }
 0x35d   :  { %3723 = vmatpush2.bf16.msra.mxu0 %v4994_v26  ;;  %3764 = vmatpush2.bf16.msra.mxu1 %v4997_v27  ;;  %v5083_v26 = vld [vmem:[%s7150_s8 + $0x3cc] ss:$28 sps:$4 sm:$0xff]  }
 0x35e   :  { %3724 = vmatprep.subr.bf16.mxu0 %v5002_v28  ;;  %3765 = vmatprep.subr.bf16.mxu1 %v5005_v29  ;;  %v5078_v27 = vld [vmem:[%s7150_s8 + $0x48] ss:$28 sps:$4 sm:$0xff]   ;;  %v5086_v29 = vld [vmem:[%s7150_s8 + $0x14] ss:$28 sps:$4 sm:$0xff]  }
 0x35f   :  { %v5081_v28 = vld [vmem:[%s7150_s8 + $0x3c8] ss:$28 sps:$4 sm:$0xff]  }
 0x361   :  { %3725 = vmatpush2.bf16.msra.mxu0 %v5000_v9  ;;  %3766 = vmatpush2.bf16.msra.mxu1 %v5003_v30  ;;  %v5089_v9 = vld [vmem:[%s7150_s8 + $0x394] ss:$28 sps:$4 sm:$0xff]  }
 0x362   :  { %3726 = vmatprep.subr.bf16.mxu0 %v5008_v52  ;;  %3767 = vmatprep.subr.bf16.mxu1 %v5011_v31  ;;  %v5084_v30 = vld [vmem:[%s7150_s8 + $0x10] ss:$28 sps:$4 sm:$0xff]   ;;  %v5092_v31 = vld [vmem:[%s7150_s8 + $0x35c] ss:$28 sps:$4 sm:$0xff]  }
 0x363   :  { %v5087_v52 = vld [vmem:[%s7150_s8 + $0x390] ss:$28 sps:$4 sm:$0xff]  }
 0x365   :  { %3727 = vmatpush2.bf16.msra.mxu0 %v5006_v20  ;;  %3768 = vmatpush2.bf16.msra.mxu1 %v5009_v19  ;;  %v5095_v20 = vld [vmem:[%s7150_s8 + $0x6dc] ss:$28 sps:$4 sm:$0xff]  }
 0x366   :  { %3728 = vmatprep.subr.bf16.mxu0 %v5014_v32  ;;  %3769 = vmatprep.subr.bf16.mxu1 %v5017_v33  ;;  %v5090_v19 = vld [vmem:[%s7150_s8 + $0x358] ss:$28 sps:$4 sm:$0xff]   ;;  %v5098_v33 = vld [vmem:[%s7150_s8 + $0x324] ss:$28 sps:$4 sm:$0xff]  }
 0x367   :  { %v5093_v32 = vld [vmem:[%s7150_s8 + $0x6d8] ss:$28 sps:$4 sm:$0xff]  }
 0x369   :  { %3729 = vmatpush2.bf16.msra.mxu0 %v5012_v16  ;;  %3770 = vmatpush2.bf16.msra.mxu1 %v5015_v8  ;;  %v5101_v16 = vld [vmem:[%s7150_s8 + $0x6a4] ss:$28 sps:$4 sm:$0xff]  }
 0x36a   :  { %3730 = vmatprep.subr.bf16.mxu0 %v5020_v34  ;;  %3771 = vmatprep.subr.bf16.mxu1 %v5023_v35  ;;  %v5096_v8 = vld [vmem:[%s7150_s8 + $0x320] ss:$28 sps:$4 sm:$0xff]   ;;  %v5104_v35 = vld [vmem:[%s7150_s8 + $0x2ec] ss:$28 sps:$4 sm:$0xff]  }
 0x36b   :  { %v5099_v34 = vld [vmem:[%s7150_s8 + $0x6a0] ss:$28 sps:$4 sm:$0xff]  }
 0x36d   :  { %3731 = vmatpush2.bf16.msra.mxu0 %v5018_v37  ;;  %3772 = vmatpush2.bf16.msra.mxu1 %v5021_v36  ;;  %v5107_v37 = vld [vmem:[%s7150_s8 + $0x66c] ss:$28 sps:$4 sm:$0xff]  }
 0x36e   :  { %3732 = vmatprep.subr.bf16.mxu0 %v5026_v40  ;;  %3773 = vmatprep.subr.bf16.mxu1 %v5029_v42  ;;  %v5102_v36 = vld [vmem:[%s7150_s8 + $0x2e8] ss:$28 sps:$4 sm:$0xff]   ;;  %v5110_v42 = vld [vmem:[%s7150_s8 + $0x2b4] ss:$28 sps:$4 sm:$0xff]  }
 0x36f   :  { %v5105_v40 = vld [vmem:[%s7150_s8 + $0x668] ss:$28 sps:$4 sm:$0xff]  }
 0x371   :  { %3733 = vmatpush2.bf16.msra.mxu0 %v5024_v43  ;;  %3774 = vmatpush2.bf16.msra.mxu1 %v5027_v44  ;;  %v5113_v43 = vld [vmem:[%s7150_s8 + $0x634] ss:$28 sps:$4 sm:$0xff]  }
 0x372   :  { %3734 = vmatprep.subr.bf16.mxu0 %v5032_v45  ;;  %3775 = vmatprep.subr.bf16.mxu1 %v5035_v48  ;;  %v5108_v44 = vld [vmem:[%s7150_s8 + $0x2b0] ss:$28 sps:$4 sm:$0xff]   ;;  %v5116_v48 = vld [vmem:[%s7150_s8 + $0x27c] ss:$28 sps:$4 sm:$0xff]  }
 0x373   :  { %v5111_v45 = vld [vmem:[%s7150_s8 + $0x630] ss:$28 sps:$4 sm:$0xff]  }
 0x375   :  { %3735 = vmatpush2.bf16.msra.mxu0 %v5030_v49  ;;  %3776 = vmatpush2.bf16.msra.mxu1 %v5033_v53  ;;  %v5119_v49 = vld [vmem:[%s7150_s8 + $0x5fc] ss:$28 sps:$4 sm:$0xff]  }
 0x376   :  { %3736 = vmatprep.subr.bf16.mxu0 %v5038_v54  ;;  %3777 = vmatprep.subr.bf16.mxu1 %v5041_v55  ;;  %v5114_v53 = vld [vmem:[%s7150_s8 + $0x278] ss:$28 sps:$4 sm:$0xff]   ;;  %v5122_v55 = vld [vmem:[%s7150_s8 + $0x244] ss:$28 sps:$4 sm:$0xff]  }
 0x377   :  { %v5117_v54 = vld [vmem:[%s7150_s8 + $0x5f8] ss:$28 sps:$4 sm:$0xff]  }
 0x379   :  { %3737 = vmatpush2.bf16.msra.mxu0 %v5036_v56  ;;  %3778 = vmatpush2.bf16.msra.mxu1 %v5039_v57  ;;  %v5125_v56 = vld [vmem:[%s7150_s8 + $0x5c4] ss:$28 sps:$4 sm:$0xff]  }
 0x37a   :  { %3788 = vmatprep.subr.bf16.mxu0 %v5044_v58  ;;  %3829 = vmatprep.subr.bf16.mxu1 %v5047_v59  ;;  %v5120_v57 = vld [vmem:[%s7150_s8 + $0x240] ss:$28 sps:$4 sm:$0xff]   ;;  %v5128_v59 = vld [vmem:[%s7150_s8 + $0x20c] ss:$28 sps:$4 sm:$0xff]  }
 0x37b   :  { %v5123_v58 = vld [vmem:[%s7150_s8 + $0x5c0] ss:$28 sps:$4 sm:$0xff]  }
 0x37c   :  { %3739 = vmatmul.mubr.bf16.vlgmr.msra.gmra.mxu0 %v6626_v50  ;;  %3780 = vmatmul.mubr.bf16.vlgmr.msra.gmra.mxu1 %v6628_v51 }
 0x37d   :  { %3789 = vmatpush1.bf16.msra.mxu0 %v5042_v60  ;;  %3820 = vmatprep.mubr.bf16.mxu0 %v6616_v46  ;;  %v5131_v60 = vld [vmem:[%s7150_s8 + $0x58c] ss:$28 sps:$4 sm:$0xff]  }
 0x37e   :  { %3830 = vmatpush1.bf16.msra.mxu1 %v5045_v61  ;;  %3861 = vmatprep.mubr.bf16.mxu1 %v6618_v47  ;;  %v5126_v61 = vld [vmem:[%s7150_s8 + $0x208] ss:$28 sps:$4 sm:$0xff]  }
 0x37f   :  { %3790 = vmatprep.subr.bf16.mxu0 %v5050_v62  ;;  %3831 = vmatprep.subr.bf16.mxu1 %v5053_v1  ;;  %v5129_v62 = vld [vmem:[%s7150_s8 + $0x588] ss:$28 sps:$4 sm:$0xff]   ;;  %v5134_v1 = vld [vmem:[%s7150_s8 + $0x1d4] ss:$28 sps:$4 sm:$0xff]  }
 0x381   :  { %3791 = vmatpush1.bf16.msra.mxu0 %v5048_v2  ;;  %v5137_v2 = vld [vmem:[%s7150_s8 + $0x554] ss:$28 sps:$4 sm:$0xff]  }
 0x382   :  { %3832 = vmatpush1.bf16.msra.mxu1 %v5051_v3  ;;  %3792 = vmatprep.subr.bf16.mxu0 %v5056_v4  ;;  %v5132_v3 = vld [vmem:[%s7150_s8 + $0x1d0] ss:$28 sps:$4 sm:$0xff]  }
 0x383   :  { %3833 = vmatprep.subr.bf16.mxu1 %v5059_v5  ;;  %v5135_v4 = vld [vmem:[%s7150_s8 + $0x550] ss:$28 sps:$4 sm:$0xff]   ;;  %v5138_v5 = vld [vmem:[%s7150_s8 + $0x360] ss:$28 sps:$4 sm:$0xff]  }
 0x385   :  { %3793 = vmatpush1.bf16.msra.mxu0 %v5054_v6  ;;  %v5139_v6 = vld [vmem:[%s7150_s8 + $0x6e0] ss:$28 sps:$4 sm:$0xff]  }
 0x386   :  { %3834 = vmatpush1.bf16.msra.mxu1 %v5057_v7  ;;  %3794 = vmatprep.subr.bf16.mxu0 %v5062_v10  ;;  %v5140_v7 = vld [vmem:[%s7150_s8 + $0x1a0] ss:$28 sps:$4 sm:$0xff]  }
 0x387   :  { %3835 = vmatprep.subr.bf16.mxu1 %v5065_v11  ;;  %v5141_v10 = vld [vmem:[%s7150_s8 + $0x520] ss:$28 sps:$4 sm:$0xff]   ;;  %v5142_v11 = vld [vmem:[%s7150_s8 + $0x328] ss:$28 sps:$4 sm:$0xff]  }
 0x389   :  { %3795 = vmatpush1.bf16.msra.mxu0 %v5060_v12  ;;  %v5143_v12 = vld [vmem:[%s7150_s8 + $0x6a8] ss:$28 sps:$4 sm:$0xff]  }
 0x38a   :  { %3836 = vmatpush1.bf16.msra.mxu1 %v5063_v13  ;;  %3796 = vmatprep.subr.bf16.mxu0 %v5068_v14  ;;  %v5144_v13 = vld [vmem:[%s7150_s8 + $0x168] ss:$28 sps:$4 sm:$0xff]  }
 0x38b   :  { %3837 = vmatprep.subr.bf16.mxu1 %v5071_v15  ;;  %v5145_v14 = vld [vmem:[%s7150_s8 + $0x4e8] ss:$28 sps:$4 sm:$0xff]   ;;  %v5146_v15 = vld [vmem:[%s7150_s8 + $0x2f0] ss:$28 sps:$4 sm:$0xff]  }
 0x38d   :  { %3797 = vmatpush1.bf16.msra.mxu0 %v5066_v17  ;;  %v5147_v17 = vld [vmem:[%s7150_s8 + $0x670] ss:$28 sps:$4 sm:$0xff]  }
 0x38e   :  { %3838 = vmatpush1.bf16.msra.mxu1 %v5069_v18  ;;  %3798 = vmatprep.subr.bf16.mxu0 %v5074_v21  ;;  %v5149_v18 = vld [vmem:[%s7150_s8 + $0x4b0] ss:$28 sps:$4 sm:$0xff]   ;;  %v5151_v21 = vld [vmem:[%s7150_s8 + $0x638] ss:$28 sps:$4 sm:$0xff]  }
 0x38f   :  { %3839 = vmatprep.subr.bf16.mxu1 %v5077_v22  ;;  %v5152_v22 = vld [vmem:[%s7150_s8 + $0xf8] ss:$28 sps:$4 sm:$0xff]  }
 0x391   :  { %3799 = vmatpush1.bf16.msra.mxu0 %v5072_v23  ;;  %v5153_v23 = vld [vmem:[%s7150_s8 + $0x478] ss:$28 sps:$4 sm:$0xff]  }
 0x392   :  { %3840 = vmatpush1.bf16.msra.mxu1 %v5075_v24  ;;  %3800 = vmatprep.subr.bf16.mxu0 %v5080_v25  ;;  %v5154_v24 = vld [vmem:[%s7150_s8 + $0x280] ss:$28 sps:$4 sm:$0xff]  }
 0x393   :  { %3841 = vmatprep.subr.bf16.mxu1 %v5083_v26  ;;  %v5155_v25 = vld [vmem:[%s7150_s8 + $0x600] ss:$28 sps:$4 sm:$0xff]  }
 0x394   :  { %v5156_v26 = vld [vmem:[%s7150_s8 + $0xc0] ss:$28 sps:$4 sm:$0xff]  }
 0x395   :  { %3801 = vmatpush1.bf16.msra.mxu0 %v5078_v27  ;;  %v5157_v27 = vld [vmem:[%s7150_s8 + $0x440] ss:$28 sps:$4 sm:$0xff]  }
 0x396   :  { %3842 = vmatpush1.bf16.msra.mxu1 %v5081_v28  ;;  %3802 = vmatprep.subr.bf16.mxu0 %v5086_v29  ;;  %v5158_v28 = vld [vmem:[%s7150_s8 + $0x248] ss:$28 sps:$4 sm:$0xff]  }
 0x397   :  { %3843 = vmatprep.subr.bf16.mxu1 %v5089_v9  ;;  %v5159_v29 = vld [vmem:[%s7150_s8 + $0x5c8] ss:$28 sps:$4 sm:$0xff]  }
 0x398   :  { %v5160_v9 = vld [vmem:[%s7150_s8 + $0x88] ss:$28 sps:$4 sm:$0xff]  }
 0x399   :  { %3803 = vmatpush1.bf16.msra.mxu0 %v5084_v30  ;;  %v5161_v30 = vld [vmem:[%s7150_s8 + $0x408] ss:$28 sps:$4 sm:$0xff]  }
 0x39a   :  { %3844 = vmatpush1.bf16.msra.mxu1 %v5087_v52  ;;  %3804 = vmatprep.subr.bf16.mxu0 %v5092_v31  ;;  %v5162_v52 = vld [vmem:[%s7150_s8 + $0x210] ss:$28 sps:$4 sm:$0xff]  }
 0x39b   :  { %3845 = vmatprep.subr.bf16.mxu1 %v5095_v20  ;;  %v5163_v31 = vld [vmem:[%s7150_s8 + $0x590] ss:$28 sps:$4 sm:$0xff]  }
 0x39c   :  { %v5164_v20 = vld [vmem:[%s7150_s8 + $0x50] ss:$28 sps:$4 sm:$0xff]  }
 0x39d   :  { %3805 = vmatpush2.bf16.msra.mxu0 %v5090_v19  ;;  %v5165_v19 = vld [vmem:[%s7150_s8 + $0x3d0] ss:$28 sps:$4 sm:$0xff]  }
 0x39e   :  { %3846 = vmatpush2.bf16.msra.mxu1 %v5093_v32  ;;  %3806 = vmatprep.subr.bf16.mxu0 %v5098_v33  ;;  %v5166_v32 = vld [vmem:[%s7150_s8 + $0x1d8] ss:$28 sps:$4 sm:$0xff]  }
 0x39f   :  { %3847 = vmatprep.subr.bf16.mxu1 %v5101_v16  ;;  %v5167_v33 = vld [vmem:[%s7150_s8 + $0x558] ss:$28 sps:$4 sm:$0xff]  }
 0x3a0   :  { %v5168_v16 = vld [vmem:[%s7150_s8 + $0x18] ss:$28 sps:$4 sm:$0xff]  }
 0x3a1   :  { %3807 = vmatpush2.bf16.msra.mxu0 %v5096_v8  ;;  %v5169_v8 = vld [vmem:[%s7150_s8 + $0x398] ss:$28 sps:$4 sm:$0xff]  }
 0x3a2   :  { %3848 = vmatpush2.bf16.msra.mxu1 %v5099_v34  ;;  %3808 = vmatprep.subr.bf16.mxu0 %v5104_v35  ;;  %v7117_v34 = vld [vmem:[%s7155_s9] sm:$0x7f] }
 0x3a3   :  { %3849 = vmatprep.subr.bf16.mxu1 %v5107_v37  ;;  %v2440_v35 = vrot.slane %v7117_v34, %v6279_v39  ;;  %v2444_v37 = vrot.slane %v7117_v34, %v6285_v41  ;;  %v2448_v41 = vrot.slane %v7117_v34, %v6293_v63 }
 0x3a5   :  { %3809 = vmatpush2.bf16.msra.mxu0 %v5102_v36 }
 0x3a6   :  { %3850 = vmatpush2.bf16.msra.mxu1 %v5105_v40  ;;  %3810 = vmatprep.subr.bf16.mxu0 %v5110_v42 }
 0x3a7   :  { %3851 = vmatprep.subr.bf16.mxu1 %v5113_v43 }
 0x3a9   :  { %3811 = vmatpush2.bf16.msra.mxu0 %v5108_v44 }
 0x3aa   :  { %3852 = vmatpush2.bf16.msra.mxu1 %v5111_v45  ;;  %3812 = vmatprep.subr.bf16.mxu0 %v5116_v48 }
 0x3ab   :  { %3853 = vmatprep.subr.bf16.mxu1 %v5119_v49 }
 0x3ad   :  { %3813 = vmatpush2.bf16.msra.mxu0 %v5114_v53 }
 0x3ae   :  { %3854 = vmatpush2.bf16.msra.mxu1 %v5117_v54  ;;  %3814 = vmatprep.subr.bf16.mxu0 %v5122_v55 }
 0x3af   :  { %3855 = vmatprep.subr.bf16.mxu1 %v5125_v56 }
 0x3b1   :  { %3815 = vmatpush2.bf16.msra.mxu0 %v5120_v57  ;;  %v2452_v57 = vrot.slane %v7117_v34, %v6296_v0  ;;  %v2455_v0 = vsub.s32 4, %v6276_v38 }
 0x3b2   :  { %3856 = vmatpush2.bf16.msra.mxu1 %v5123_v58  ;;  %3816 = vmatprep.subr.bf16.mxu0 %v5128_v59 }
 0x3b3   :  { %3857 = vmatprep.subr.bf16.mxu1 %v5131_v60 }
 0x3b5   :  { %3817 = vmatpush2.bf16.msra.mxu0 %v5126_v61 }
 0x3b6   :  { %3858 = vmatpush2.bf16.msra.mxu1 %v5129_v62  ;;  %3818 = vmatprep.subr.bf16.mxu0 %v5134_v1 }
 0x3b7   :  { %3859 = vmatprep.subr.bf16.mxu1 %v5137_v2 }
 0x3b9   :  { %3819 = vmatpush2.bf16.msra.mxu0 %v5132_v3 }
 0x3ba   :  { %3860 = vmatpush2.bf16.msra.mxu1 %v5135_v4  ;;  %4463 = vmatprep.subr.bf16.mxu0 %v5138_v5 }
 0x3bb   :  { %4485 = vmatprep.subr.bf16.mxu1 %v5139_v6 }
 0x3bc   :  { %3821 = vmatmul.mubr.bf16.vlgmr.msra.gmra.mxu0 %v6626_v50 }
 0x3bd   :  { %3862 = vmatmul.mubr.bf16.vlgmr.msra.gmra.mxu1 %v6628_v51  ;;  %4464 = vmatpush3.bf16.msra.mxu0 %v5140_v7 }
 0x3be   :  { %3902 = vmatprep.mubr.bf16.mxu0 %v6616_v46  ;;  %4486 = vmatpush3.bf16.msra.mxu1 %v5141_v10  ;;  %v5148_v46 = vld [vmem:[%s7150_s8 + $0x130] ss:$28 sps:$4 sm:$0xff]  }
 0x3bf   :  { %3942 = vmatprep.mubr.bf16.mxu1 %v6618_v47  ;;  %4465 = vmatprep.subr.bf16.mxu0 %v5142_v11  ;;  %v5150_v47 = vld [vmem:[%s7150_s8 + $0x2b8] ss:$28 sps:$4 sm:$0xff]  }
 0x3c0   :  { %4487 = vmatprep.subr.bf16.mxu1 %v5143_v12  ;;  %v2459_v12 = vsub.s32 5, %v6276_v38 }
 0x3c1   :  { %4466 = vmatpush3.bf16.msra.mxu0 %v5144_v13  ;;  %v2456_v13 = vrot.slane %v7117_v34, %v2455_v0 }
 0x3c2   :  { %4488 = vmatpush3.bf16.msra.mxu1 %v5145_v14  ;;  %4467 = vmatprep.subr.bf16.mxu0 %v5146_v15  ;;  %v2460_v14 = vrot.slane %v7117_v34, %v2459_v12 }
 0x3c3   :  { %4489 = vmatprep.subr.bf16.mxu1 %v5147_v17 }
 0x3c5   :  { %4468 = vmatpush3.bf16.msra.mxu0 %v5148_v46 }
 0x3c6   :  { %4490 = vmatpush3.bf16.msra.mxu1 %v5149_v18  ;;  %4469 = vmatprep.subr.bf16.mxu0 %v5150_v47 }
 0x3c7   :  { %4491 = vmatprep.subr.bf16.mxu1 %v5151_v21 }
 0x3c9   :  { %4470 = vmatpush3.bf16.msra.mxu0 %v5152_v22 }
 0x3ca   :  { %4492 = vmatpush3.bf16.msra.mxu1 %v5153_v23  ;;  %4471 = vmatprep.subr.bf16.mxu0 %v5154_v24 }
 0x3cb   :  { %4493 = vmatprep.subr.bf16.mxu1 %v5155_v25 }
 0x3cd   :  { %4472 = vmatpush3.bf16.msra.mxu0 %v5156_v26 }
 0x3ce   :  { %4494 = vmatpush3.bf16.msra.mxu1 %v5157_v27  ;;  %4473 = vmatprep.subr.bf16.mxu0 %v5158_v28 }
 0x3cf   :  { %4495 = vmatprep.subr.bf16.mxu1 %v5159_v29 }
 0x3d1   :  { %4474 = vmatpush3.bf16.msra.mxu0 %v5160_v9 }
 0x3d2   :  { %4496 = vmatpush3.bf16.msra.mxu1 %v5161_v30  ;;  %4475 = vmatprep.subr.bf16.mxu0 %v5162_v52  ;;  %v2463_v30 = vsub.s32 6, %v6276_v38 }
 0x3d3   :  { %4497 = vmatprep.subr.bf16.mxu1 %v5163_v31 }
 0x3d5   :  { %4476 = vmatpush3.bf16.msra.mxu0 %v5164_v20  ;;  %v2464_v20 = vrot.slane %v7117_v34, %v2463_v30 }
 0x3d6   :  { %4498 = vmatpush3.bf16.msra.mxu1 %v5165_v19  ;;  %4477 = vmatprep.subr.bf16.mxu0 %v5166_v32 }
 0x3d7   :  { %4499 = vmatprep.subr.bf16.mxu1 %v5167_v33 }
 0x3d9   :  { %4478 = vmatpush3.bf16.msra.mxu0 %v5168_v16 }
 0x3da   :  { %4500 = vmatpush3.bf16.msra.mxu1 %v5169_v8 }
 0x3dc   :  { %3903 = vmatmul.mubr.bf16.vlgmr.msra.gmra.mxu0 %v6626_v50 }
 0x3dd   :  { %3943 = vmatmul.mubr.bf16.vlgmr.msra.gmra.mxu1 %v6628_v51 }
 0x3fc   :  { %v3658_v36 = vpop.f32.mrf.mxu0  ;;  %v3699_v40 = vpop.f32.mrf.mxu1 }
 0x3fd   :  { %v3659_v42 = vadd.f32 %v3658_v36, %v2440_v35 }
 0x3fe   :  { %v3660_v43 = vpop.f32.mrf.mxu0  ;;  %v3701_v44 = vpop.f32.mrf.mxu1 }
 0x3ff   :  { %v3700_v45 = vadd.f32 %v3699_v40, %v3659_v42  ;;  %v3661_v50 = vadd.f32 %v3660_v43, %v2444_v37 }
 0x400   :  { %v3662_v48 = vpop.f32.mrf.mxu0  ;;  %v3703_v51 = vpop.f32.mrf.mxu1 }
 0x401   :  { %v3702_v49 = vadd.f32 %v3701_v44, %v3661_v50  ;;  %5172 = vtanh.f32 %v3700_v45 }
 0x402   :  { %v3663_v53 = vpop.f32.mrf.mxu0  ;;  %v3704_v54 = vpop.f32.mrf.mxu1 }
 0x403   :  { %5174 = vtanh.f32 %v3702_v49 }
 0x40e   :  { %v5173_v55 = vpop.eup %5172 }
 0x410   :  { %v5175_v56 = vpop.eup %5174 }
 0x411   :  { %v4459_v39 = vpack.c.bf16 %v5175_v56, %v5173_v55 }
 0x413   :  { %3986 = vst [vmem:[%s7156_s10] sm:$0xff] %v4459_v39 }
 0x43c   :  { %v3740_v58 = vpop.f32.mrf.mxu0  ;;  %v3781_v59 = vpop.f32.mrf.mxu1 }
 0x43d   :  { %v3741_v60 = vadd.f32 %v3740_v58, %v2448_v41 }
 0x43e   :  { %v3742_v61 = vpop.f32.mrf.mxu0  ;;  %v3783_v62 = vpop.f32.mrf.mxu1 }
 0x43f   :  { %v3782_v1 = vadd.f32 %v3781_v59, %v3741_v60  ;;  %v3743_v2 = vadd.f32 %v3742_v61, %v2452_v57 }
 0x440   :  { %v3744_v3 = vpop.f32.mrf.mxu0  ;;  %v3785_v4 = vpop.f32.mrf.mxu1 }
 0x441   :  { %v3784_v5 = vadd.f32 %v3783_v62, %v3743_v2  ;;  %5176 = vtanh.f32 %v3782_v1 }
 0x442   :  { %v3745_v6 = vpop.f32.mrf.mxu0  ;;  %v3786_v7 = vpop.f32.mrf.mxu1 }
 0x443   :  { %5178 = vtanh.f32 %v3784_v5 }
 0x44e   :  { %v5177_v10 = vpop.eup %5176 }
 0x450   :  { %v5179_v11 = vpop.eup %5178 }
 0x451   :  { %v4460_v63 = vpack.c.bf16 %v5179_v11, %v5177_v10 }
 0x453   :  { %3987 = vst [vmem:[%s7156_s10 + $0x8] sm:$0xff] %v4460_v63 }
 0x47c   :  { %v3822_v15 = vpop.f32.mrf.mxu0 }
 0x47d   :  { %v3823_v17 = vadd.f32 %v3822_v15, %v2456_v13  ;;  %v3863_v46 = vpop.f32.mrf.mxu1 }
 0x47e   :  { %v3824_v18 = vpop.f32.mrf.mxu0 }
 0x47f   :  { %v3864_v47 = vadd.f32 %v3863_v46, %v3823_v17  ;;  %v3825_v21 = vadd.f32 %v3824_v18, %v2460_v14  ;;  %v3865_v22 = vpop.f32.mrf.mxu1 }
 0x480   :  { %v3826_v23 = vpop.f32.mrf.mxu0 }
 0x481   :  { %v3866_v24 = vadd.f32 %v3865_v22, %v3825_v21  ;;  %v3867_v25 = vpop.f32.mrf.mxu1  ;;  %5180 = vtanh.f32 %v3864_v47 }
 0x482   :  { %v3827_v26 = vpop.f32.mrf.mxu0 }
 0x483   :  { %5182 = vtanh.f32 %v3866_v24  ;;  %v3868_v27 = vpop.f32.mrf.mxu1 }
 0x48e   :  { %v5181_v28 = vpop.eup %5180 }
 0x490   :  { %v5183_v29 = vpop.eup %5182 }
 0x491   :  { %v4461_v9 = vpack.c.bf16 %v5183_v29, %v5181_v28 }
 0x493   :  { %3988 = vst [vmem:[%s7156_s10 + $0x10] sm:$0xff] %v4461_v9 }
 0x49c   :  { %v4479_v52 = vpop.f32.mrf.mxu0 }
 0x49d   :  { %v4501_v31 = vpop.f32.mrf.mxu1 }
 0x49e   :  { %v4480_v19 = vpop.f32.mrf.mxu0 }
 0x49f   :  { %v4481_v32 = vadd.f32 %v4480_v19, %v4479_v52  ;;  %v4502_v33 = vpop.f32.mrf.mxu1 }
 0x4a0   :  { %v4482_v16 = vpop.f32.mrf.mxu0  ;;  %v4503_v35 = vadd.f32 %v4502_v33, %v4501_v31 }
 0x4a1   :  { %v3905_v8 = vadd.f32 %v4481_v32, %v2464_v20  ;;  %v4504_v37 = vpop.f32.mrf.mxu1 }
 0x4a2   :  { %v4483_v36 = vpop.f32.mrf.mxu0 }
 0x4a3   :  { %v3945_v40 = vadd.f32 %v4503_v35, %v3905_v8  ;;  %v4505_v42 = vpop.f32.mrf.mxu1 }
 0x4a5   :  { %5184 = vtanh.f32 %v3945_v40 }
 0x4b2   :  { %v5185_v43 = vpop.eup %5184 }
 0x4b3   :  { %v4462_v44 = vpack.c.bf16 %v5185_v43, %v5185_v43 }
 0x4b5   :  { %3990 = vst.msk [vmem:[%s7156_s10 + $0x18] sm:$0xf] %vm3989_vm1, %v4462_v44 }

</bundles_post_ra>
